<compile_context>
chip_gen: v5e
topology: v5e:2x2
jax: 0.10.0
libtpu: 0.0.40
codegen_flags: <defaults>
</compile_context>

<pallas_src>
import jax
import jax.numpy as jnp
from jax.experimental import pallas as pl
from jax.experimental.pallas import tpu as pltpu

NUM_CLASSES = 256
TILE_M = 512       # rows (pixels) processed per grid step
NUM_CORES = 2      # v7x: 2 TensorCores; on v5e/v6e this is a trivial serial loop


def _round_up(v, m):
    return ((v + m - 1) // m) * m


def _make_ce_kernel(n, tile_m):
    def ce_kernel(logits_ref, x_ref, acc_ref):
        c = pl.program_id(0)          # core-split axis ("parallel")
        i = pl.program_id(1)          # row-tile sweep ("arbitrary", carries acc)
        bpc = pl.num_programs(1)

        @pl.when(i == 0)
        def _():
            acc_ref[...] = jnp.zeros_like(acc_ref)

        logits = logits_ref[...].astype(jnp.float32)                      # (tile_m, 256)
        # target = (x * 255).long() -> truncation toward zero (x >= 0)
        tgt = (x_ref[...].astype(jnp.float32) * 255.0).astype(jnp.int32)  # (tile_m, 1)

        # numerically stable log-sum-exp over the class (lane) axis
        m = jnp.max(logits, axis=-1, keepdims=True)                       # (tile_m, 1)
        lse = m + jnp.log(jnp.sum(jnp.exp(logits - m), axis=-1, keepdims=True))

        # gather logit[r, target[r]] via one-hot compare on the lane axis
        lanes = jax.lax.broadcasted_iota(jnp.int32, logits.shape, 1)
        picked = jnp.sum(jnp.where(lanes == tgt, logits, 0.0),
                         axis=-1, keepdims=True)                          # (tile_m, 1)

        # mask rows past the end of the (possibly non-divisible) input
        row0 = (c * bpc + i) * tile_m
        rows = jax.lax.broadcasted_iota(jnp.int32, (tile_m, 1), 0)
        valid = (row0 + rows) < n

        nll = jnp.where(valid, lse - picked, 0.0)                         # (tile_m, 1)
        acc_ref[...] += nll.reshape(1, tile_m, 1)

    return ce_kernel


def pixelcnn_loss(out, x):
    """out: [B, H, W, 256] float logits, x: [B, H, W] float in [0, 1] -> scalar loss."""
    logits = out.reshape(-1, NUM_CLASSES)     # (N, 256) — matches out.view(-1, 256)
    x_flat = x.reshape(-1, 1)                 # (N, 1)
    n = logits.shape[0]

    tile_m = min(TILE_M, _round_up(n, 8))
    nblocks = pl.cdiv(n, tile_m)
    bpc = pl.cdiv(nblocks, NUM_CORES)         # row tiles per core

    # Clamp so a core's (possibly empty) tail tile reads an in-bounds block;
    # its rows are zeroed by the validity mask in the kernel.
    def row_block(c, i):
        return (jnp.minimum(c * bpc + i, nblocks - 1), 0)

    partials = pl.pallas_call(
        _make_ce_kernel(n, tile_m),
        out_shape=jax.ShapeDtypeStruct((NUM_CORES, tile_m, 1), jnp.float32),
        grid_spec=pltpu.PrefetchScalarGridSpec(
            num_scalar_prefetch=0,
            grid=(NUM_CORES, bpc),
            in_specs=[
                pl.BlockSpec((tile_m, NUM_CLASSES), row_block),
                pl.BlockSpec((tile_m, 1), row_block),
            ],
            # Output block depends only on c -> resident accumulator across i.
            out_specs=pl.BlockSpec((1, tile_m, 1), lambda c, i: (c, 0, 0)),
        ),
        compiler_params=pltpu.CompilerParams(
            dimension_semantics=("parallel", "arbitrary"),
        ),
    )(logits, x_flat)

    # Single final reduction (per-core, per-row partial sums) + mean.
    return jnp.sum(partials) / n


def _reference_loss(out, x):
    logits = out.reshape(-1, NUM_CLASSES).astype(jnp.float32)
    tgt = (x.reshape(-1).astype(jnp.float32) * 255.0).astype(jnp.int32)
    lse = jax.scipy.special.logsumexp(logits, axis=-1)
    picked = jnp.take_along_axis(logits, tgt[:, None], axis=-1)[:, 0]
    return jnp.mean(lse - picked)


if __name__ == "__main__":
    key = jax.random.PRNGKey(0)
    k1, k2 = jax.random.split(key)

    B, H, W = 2, 16, 16
    # out: per-pixel logits over 256 intensity levels (channel-last layout so
    # that reshape(-1, 256) matches PyTorch's contiguous out.view(-1, 256))
    out = jax.random.normal(k1, (B, H, W, NUM_CLASSES), dtype=jnp.float32)
    # x: "image" in [0, 1]
    x = jax.random.uniform(k2, (B, H, W), dtype=jnp.float32)

    # TODO(synk): the module's unused self.inv_norm (transforms.Normalize) has no
    # role in forward() and is not implemented.
    loss = pixelcnn_loss(out, x)
    jax.block_until_ready(loss)

    ref = _reference_loss(out, x)
    assert jnp.allclose(loss, ref, atol=1e-4, rtol=1e-4), (loss, ref)

    print("KERNEL_OK")
</pallas_src>

<mosaic_0001>
module attributes {stable_mosaic.version = 11 : i64} {
  func.func @ce_kernel(%arg0: i32, %arg1: i32, %arg2: memref<512x256xf32, #tpu.memory_space<vmem>>, %arg3: memref<512x1xf32, #tpu.memory_space<vmem>>, %arg4: memref<1x512x1xf32, #tpu.memory_space<vmem>>) attributes {dimension_semantics = [#tpu.dimension_semantics<parallel>, #tpu.dimension_semantics<arbitrary>], iteration_bounds = array<i64: 2, 1>, scalar_prefetch = 0 : i64, scratch_operands = 0 : i64, tpu.core_type = #tpu.core_type<tc>, window_params = [{transform_indices = @transform_0, window_bounds = array<i64: 512, 256>}, {transform_indices = @transform_1, window_bounds = array<i64: 512, 1>}, {transform_indices = @transform_2, window_bounds = array<i64: 1, 512, 1>}]} {
    %c0_i32 = arith.constant 0 : i32
    %0 = arith.cmpi eq, %arg1, %c0_i32 : i32
    %1 = arith.extui %0 : i1 to i32
    %c0_i32_0 = arith.constant 0 : i32
    %2 = arith.cmpi ne, %1, %c0_i32_0 : i32
    scf.if %2 {
      %cst_16 = arith.constant 0.000000e+00 : f32
      %39 = vector.broadcast %cst_16 : f32 to vector<1x512x1xf32>
      %c0_17 = arith.constant 0 : index
      %c0_18 = arith.constant 0 : index
      %c0_19 = arith.constant 0 : index
      %40 = vector.load %arg4[%c0_17, %c0_18, %c0_19] : memref<1x512x1xf32, #tpu.memory_space<vmem>>, vector<1x512x1xf32>
      tpu.vector_store %arg4[%c0_17, %c0_18, %c0_19], %39 {strides = array<i32>} : memref<1x512x1xf32, #tpu.memory_space<vmem>>, vector<1x512x1xf32>,
    } else {
    }
    %c0 = arith.constant 0 : index
    %c0_1 = arith.constant 0 : index
    %3 = vector.load %arg2[%c0, %c0_1] : memref<512x256xf32, #tpu.memory_space<vmem>>, vector<512x256xf32>
    %c0_2 = arith.constant 0 : index
    %c0_3 = arith.constant 0 : index
    %4 = vector.load %arg3[%c0_2, %c0_3] : memref<512x1xf32, #tpu.memory_space<vmem>>, vector<512x1xf32>
    %cst = arith.constant 2.550000e+02 : f32
    %5 = vector.broadcast %cst : f32 to vector<512x1xf32>
    %6 = arith.mulf %4, %5 : vector<512x1xf32>
    %7 = arith.fptosi %6 : vector<512x1xf32> to vector<512x1xi32>
    %cst_4 = arith.constant dense<0xFF800000> : vector<512xf32>
    %8 = vector.multi_reduction <maximumf>, %3, %cst_4 [1] : vector<512x256xf32> to vector<512xf32>
    %9 = vector.shape_cast %8 : vector<512xf32> to vector<512x1xf32>
    %10 = vector.broadcast %9 : vector<512x1xf32> to vector<512x256xf32>
    %11 = arith.subf %3, %10 : vector<512x256xf32>
    %12 = math.exp %11 : vector<512x256xf32>
    %cst_5 = arith.constant dense<0.000000e+00> : vector<512xf32>
    %13 = vector.multi_reduction <add>, %12, %cst_5 [1] : vector<512x256xf32> to vector<512xf32>
    %14 = vector.shape_cast %13 : vector<512xf32> to vector<512x1xf32>
    %15 = math.log %14 : vector<512x1xf32>
    %16 = arith.addf %9, %15 : vector<512x1xf32>
    %17 = tpu.iota {dimensions = array<i32: 1>} : vector<512x256xi32>
    %18 = vector.broadcast %7 : vector<512x1xi32> to vector<512x256xi32>
    %19 = arith.cmpi eq, %17, %18 : vector<512x256xi32>
    %cst_6 = arith.constant 0.000000e+00 : f32
    %20 = vector.broadcast %cst_6 : f32 to vector<512x256xf32>
    %21 = arith.select %19, %3, %20 : vector<512x256xi1>, vector<512x256xf32>
    %cst_7 = arith.constant dense<0.000000e+00> : vector<512xf32>
    %22 = vector.multi_reduction <add>, %21, %cst_7 [1] : vector<512x256xf32> to vector<512xf32>
    %23 = vector.shape_cast %22 : vector<512xf32> to vector<512x1xf32>
    %c1_i32 = arith.constant 1 : i32
    %24 = arith.muli %arg0, %c1_i32 : i32
    %25 = arith.addi %24, %arg1 : i32
    %c512_i32 = arith.constant 512 : i32
    %26 = arith.muli %25, %c512_i32 : i32
    %27 = tpu.iota {dimensions = array<i32: 0>} : vector<512x1xi32>
    %28 = vector.broadcast %26 : i32 to vector<512x1xi32>
    %29 = arith.addi %28, %27 : vector<512x1xi32>
    %c512_i32_8 = arith.constant 512 : i32
    %30 = vector.broadcast %c512_i32_8 : i32 to vector<512x1xi32>
    %31 = arith.cmpi slt, %29, %30 : vector<512x1xi32>
    %32 = arith.subf %16, %23 : vector<512x1xf32>
    %cst_9 = arith.constant 0.000000e+00 : f32
    %33 = vector.broadcast %cst_9 : f32 to vector<512x1xf32>
    %34 = arith.select %31, %32, %33 : vector<512x1xi1>, vector<512x1xf32>
    %c0_10 = arith.constant 0 : index
    %c0_11 = arith.constant 0 : index
    %c0_12 = arith.constant 0 : index
    %35 = vector.load %arg4[%c0_10, %c0_11, %c0_12] : memref<1x512x1xf32, #tpu.memory_space<vmem>>, vector<1x512x1xf32>
    %36 = vector.shape_cast %34 : vector<512x1xf32> to vector<1x512x1xf32>
    %37 = arith.addf %35, %36 : vector<1x512x1xf32>
    %c0_13 = arith.constant 0 : index
    %c0_14 = arith.constant 0 : index
    %c0_15 = arith.constant 0 : index
    %38 = vector.load %arg4[%c0_13, %c0_14, %c0_15] : memref<1x512x1xf32, #tpu.memory_space<vmem>>, vector<1x512x1xf32>
    tpu.vector_store %arg4[%c0_13, %c0_14, %c0_15], %37 {strides = array<i32>} : memref<1x512x1xf32, #tpu.memory_space<vmem>>, vector<1x512x1xf32>,
    return
  }
  func.func @transform_0(%arg0: i32, %arg1: i32) -> (i32, i32) {
    %c1_i32 = arith.constant 1 : i32
    %0 = arith.muli %arg0, %c1_i32 : i32
    %1 = arith.addi %0, %arg1 : i32
    %c0_i32 = arith.constant 0 : i32
    %2 = arith.minsi %1, %c0_i32 : i32
    %c0_i32_0 = arith.constant 0 : i32
    %c0_i32_1 = arith.constant 0 : i32
    return %2, %c0_i32_0 : i32, i32
  }
  func.func @transform_1(%arg0: i32, %arg1: i32) -> (i32, i32) {
    %c1_i32 = arith.constant 1 : i32
    %0 = arith.muli %arg0, %c1_i32 : i32
    %1 = arith.addi %0, %arg1 : i32
    %c0_i32 = arith.constant 0 : i32
    %2 = arith.minsi %1, %c0_i32 : i32
    %c0_i32_0 = arith.constant 0 : i32
    %c0_i32_1 = arith.constant 0 : i32
    return %2, %c0_i32_0 : i32, i32
  }
  func.func @transform_2(%arg0: i32, %arg1: i32) -> (i32, i32, i32) {
    %c0_i32 = arith.constant 0 : i32
    %c0_i32_0 = arith.constant 0 : i32
    %c0_i32_1 = arith.constant 0 : i32
    return %arg0, %c0_i32, %c0_i32_0 : i32, i32, i32
  }
}

</mosaic_0001>

<bundles_post_ra>
// kernel: tpu_custom_call.1
= control target key start
LH: loop header
LB: loop body
LE: loop exit
PB: predicated region body
PF: predicated region fallthrough
CT: control target
= control target key end

     0   :  { %7 = vsyncpa [#allocation3], 0  ;;  %s6392_s0 = inlined_call_operand.hbm [shape: f32[512,256], index: 0, kind: input, shape index: {}]   ;;  %s6393_s1 = inlined_call_operand.vmem [shape: f32[512,1], index: 1, kind: input, shape index: {}]   ;;  %s6394_s2 = inlined_call_operand.vmem [shape: f32[2,512,1], index: 2, kind: output, shape index: {}]  }
   0x1   :  { %9 = vsyncpa [#allocation3 + $0x1], 0  ;;  %s3895_s9 = smov 0   ;;  %s3897_s10 = smov 0  }
   0x2   :  { %s3899_s11 = smov 0   ;;  %s3901_s12 = smov 0  }
   0x3   :  { %s3903_s13 = smov 0  }
   0x4 LB: > { %s2831_s14 = sadd.s32 4294967295, %s3873_s13   ;;  %s27_s15 = sadd.s32 1, %s3869_s12  ;;  %s3873_s13 = sphi %s3903_s13, %s15_s13   ;;  %s3869_s12 = sphi %s3901_s12, %s6804_s12   ;;  %s3865_s11 = sphi %s3899_s11, %s6803_s11   ;;  %s3861_s10 = sphi %s3897_s10, %s6382_s10   ;;  %s3857_s9 = sphi %s3895_s9, %s6802_s9  }
   0x5   : > { %p29_p0 = scmp.ge.s32.totalorder %s27_s15, 2  ;;  %p3854_p1 = scmp.ne.s32.totalorder %s3861_s10, 0 }
   0x6   : > { %p48_p2 = scmp.eq.s32.totalorder %s3873_s13, 0  ;;  %p53_p3 = scmp.ne.s32.totalorder %s3861_s10, %s3857_s9 }
   0x7   : > { %s6806_s15 = smov (%p29_p0, %s27_s15), 0  ;;  %p54_p4 = scmp.eq.s32.totalorder %s2831_s14, 0 }
   0x8   : > { %p49_p5 = por %p3854_p1, %p48_p2  ;;  %p3177_p7 = scmp.lt.s32.totalorder %s3873_s13, 2 }
   0x9   : > { %p3925_p6 = por %p54_p4, %p53_p3  ;;  %s149_s19 = sshll.u32 %s6392_s0, 4  ;;  %s150_s19 = int_to_ptr.hbm [resolvable:$true] %s149_s19 }
   0xa   : > { %s3875_s20 = smov [#allocation2]   ;;  %p3933_p8 = pnand %p3177_p7, %p49_p5 }
   0xb   : > { %s151_s21 = sshll.u32 %s3875_s20, 4  ;;  %p2839_p9 = scmp.ge.s32.totalorder %s3873_s13, 1  ;;  %s152_s21 = int_to_ptr.vmem [resolvable:$true] %s151_s21 }
   0xc   : > { %p174_p10 = scmp.lt.s32.totalorder %s3873_s13, 3  ;;  %s3796_s23 = sshra.s32 %s150_s19, 4  ;;  %s3797_s23 = int_to_ptr.hbm [resolvable:$true] %s3796_s23 }
   0xd   : > { %s3798_s24 = scalar_lea.hbm %s3797_s23, 1024  ;;  %p3800_p12 = pneg %p3933_p8 }
   0xe   : > { %p3799_p11 = scmp.ne.s32.totalorder %s3797_s23, %s3798_s24  ;;  %s3803_s27 = scalar_lea.hbm %s6392_s0, 1024 }
   0xf   : > { %p3805_p1 = scmp.lt.s32.totalorder %s3803_s27, %s3798_s24 }
  0x10   : > { %p3801_p13 = pnand %p3800_p12, %p3799_p11 }
  0x12   : > { %p3802_p0 = pneg %p3801_p13 }
  0x14   : > { %p3807_p2 = pnand %p3805_p1, %p3802_p0 }
  0x16   : > { %3810 = shalt.err (!%p3807_p2)
}
  0x17   : > { %s3876_s28 = smov 256   ;;  %s3877_s29 = smov 16  }
  0x18   : > { %3176 = dma.hbm_to_vmem [thread:$0]  (!%p3933_p8), %s150_s19, 16384, %s152_s21, [#allocation3], %s3876_s28, %s3876_s28, %s3877_s29  }
  0x19   : > { %p175_p3 = pnand %p2839_p9, %p174_p10 }
  0x1b   : > { %178 = sbr.rel (%p175_p3) target bundleno = 893 (0x37d), region = 28 }
  0x20   : > { %s180_s30 = sand.u32 1, %s3861_s10  }
  0x21   : > { %s2840_s3 = sshll.u32 %s180_s30, 10  ;;  %s181_s4 = scalar_lea.sflag [#allocation3], %s180_s30 }
  0x22   : > { %s3951_s5 = scalar_lea.vmem [#allocation2], %s2840_s3 }
  0x23   : > { %3851 = dma.done.wait (%p3925_p6), %s181_s4, 16384  }
  0x24   : > { %3853 = vsyncadd (%p3925_p6), %s181_s4, 4294950912  ;;  %v3958_v0 = vld [vmem:[%s3951_s5 + $0x40] sm:$0xff]  ;;  %v3961_v1 = vld [vmem:[%s3951_s5 + $0x48] sm:$0xff]  ;;  %p219_p4 = scmp.lt.s32.totalorder %s3865_s11, 0  ;;  %p230_p6 = scmp.lt.s32.totalorder %s3865_s11, 1 }
  0x25   : > { %v3964_v2 = vld [vmem:[%s3951_s5 + $0x20] sm:$0xff]  ;;  %v636_v3 = vmax.f32 %v3958_v0, %v3961_v1  ;;  %v3969_v4 = vld [vmem:[%s3951_s5 + $0x28] sm:$0xff]  ;;  %v3982_v9 = vld [vmem:[%s3951_s5 + $0x50] sm:$0xff]  ;;  %s2845_s23 = sshll.u32 %s3865_s11, 9 }
  0x26   : > { %v3972_v5 = vld [vmem:[%s3951_s5] sm:$0xff]  ;;  %v3975_v6 = vld [vmem:[%s3951_s5 + $0x8] sm:$0xff]  ;;  %v630_v7 = vmax.f32 %v3964_v2, %v3969_v4  ;;  %v3985_v10 = vld [vmem:[%s3951_s5 + $0x58] sm:$0xff]  ;;  %s4718_s6 = scalar_select %p219_p4, %s3865_s11, 0 }
  0x27   : > { %v624_v8 = vmax.f32 %v3972_v5, %v3975_v6  ;;  %637 = vmax.xlane.f32.xlu2 %v636_v3  ;;  %v3988_v11 = vld [vmem:[%s3951_s5 + $0x30] sm:$0xff]  ;;  %v3991_v12 = vld [vmem:[%s3951_s5 + $0x38] sm:$0xff]  ;;  %v639_v15 = vmax.f32 %v3982_v9, %v3985_v10  ;;  %v4006_v18 = vld [vmem:[%s3951_s5 + $0x80] sm:$0xff]  ;;  %s231_s18 = scalar_select %p230_p6, %s3865_s11, 1 }
  0x28   : > { %631 = vmax.xlane.f32.xlu1 %v630_v7  ;;  %v3994_v13 = vld [vmem:[%s3951_s5 + $0x10] sm:$0xff]  ;;  %v3997_v14 = vld [vmem:[%s3951_s5 + $0x18] sm:$0xff]  ;;  %v633_v16 = vmax.f32 %v3988_v11, %v3991_v12  ;;  %v4009_v19 = vld [vmem:[%s3951_s5 + $0x88] sm:$0xff]  ;;  %s2841_s7 = sshll.u32 %s4718_s6, 6 }
  0x29   : > { %625 = vmax.xlane.f32.xlu0 %v624_v8  ;;  %v627_v17 = vmax.f32 %v3994_v13, %v3997_v14  ;;  %v4012_v20 = vld [vmem:[%s3951_s5 + $0x70] sm:$0xff]  ;;  %v4015_v21 = vld [vmem:[%s3951_s5 + $0x78] sm:$0xff]  ;;  %v4018_v22 = vld [vmem:[%s3951_s5 + $0x60] sm:$0xff]  ;;  %v648_v24 = vmax.f32 %v4006_v18, %v4009_v19  ;;  %p4737_p5 = scmp.lt.s32.totalorder %s2841_s7, 63  ;;  %s2850_s19 = sshll.u32 %s231_s18, 9 }
  0x2a   : > { %v4021_v23 = vld [vmem:[%s3951_s5 + $0x68] sm:$0xff]  ;;  %v645_v25 = vmax.f32 %v4012_v20, %v4015_v21  ;;  %v4030_v27 = vld [vmem:[%s3951_s5 + $0xb0] sm:$0xff]  ;;  %v4033_v28 = vld [vmem:[%s3951_s5 + $0xb8] sm:$0xff]  ;;  %s5205_s22 = scalar_lea.vmem %s6394_s2, %s2850_s19 }
  0x2b   : > { %v642_v26 = vmax.f32 %v4018_v22, %v4021_v23  ;;  %v4036_v29 = vld [vmem:[%s3951_s5 + $0xa0] sm:$0xff]  ;;  %v4039_v30 = vld [vmem:[%s3951_s5 + $0xa8] sm:$0xff]  ;;  %v4042_v31 = vld [vmem:[%s3951_s5 + $0x90] sm:$0xff]  ;;  %v657_v33 = vmax.f32 %v4030_v27, %v4033_v28  ;;  %s6808_s7 = smov (!%p4737_p5, %s2841_s7), 63 }
  0x2c   : > { %v4045_v32 = vld [vmem:[%s3951_s5 + $0x98] sm:$0xff]  ;;  %v654_v34 = vmax.f32 %v4036_v29, %v4039_v30  ;;  %v4054_v36 = vld [vmem:[%s3951_s5 + $0xe0] sm:$0xff]  ;;  %v4057_v37 = vld [vmem:[%s3951_s5 + $0xe8] sm:$0xff]  ;;  %s2842_s9 = sshll.u32 %s6808_s7, 3 }
  0x2d   : > { %v651_v35 = vmax.f32 %v4042_v31, %v4045_v32  ;;  %v4060_v38 = vld [vmem:[%s3951_s5 + $0xd0] sm:$0xff]  ;;  %v4063_v39 = vld [vmem:[%s3951_s5 + $0xd8] sm:$0xff]  ;;  %v4066_v40 = vld [vmem:[%s3951_s5 + $0xc0] sm:$0xff]  ;;  %v666_v42 = vmax.f32 %v4054_v36, %v4057_v37  ;;  %s4756_s17 = scalar_lea.vmem %s6393_s1, %s2842_s9 }
  0x2e   : > { %v4069_v41 = vld [vmem:[%s3951_s5 + $0xc8] sm:$0xff]  ;;  %v663_v43 = vmax.f32 %v4060_v38, %v4063_v39  ;;  %v4078_v45 = vld [vmem:[%s3951_s5 + $0x110] sm:$0xff]  ;;  %v4081_v46 = vld [vmem:[%s3951_s5 + $0x118] sm:$0xff] }
  0x2f   : > { %640 = vmax.xlane.f32.xlu2 %v639_v15  ;;  %v660_v44 = vmax.f32 %v4066_v40, %v4069_v41  ;;  %6500 = vst [vmem:[#allocation5_spill] sm:$0xff] %v4078_v45  ;;  %v4084_v47 = vld [vmem:[%s3951_s5 + $0x100] sm:$0xff]  ;;  %v4087_v48 = vld [vmem:[%s3951_s5 + $0x108] sm:$0xff]  ;;  %v4090_v49 = vld [vmem:[%s3951_s5 + $0xf0] sm:$0xff]  ;;  %v675_v51 = vmax.f32 %v4078_v45, %v4081_v46 }
  0x30   : > { %634 = vmax.xlane.f32.xlu1 %v633_v16  ;;  %6501 = vst [vmem:[#allocation6_spill] sm:$0xff] %v4081_v46  ;;  %v4093_v50 = vld [vmem:[%s3951_s5 + $0xf8] sm:$0xff]  ;;  %v672_v52 = vmax.f32 %v4084_v47, %v4087_v48  ;;  %v4102_v54 = vld [vmem:[%s3951_s5 + $0x140] sm:$0xff]  ;;  %v4105_v55 = vld [vmem:[%s3951_s5 + $0x148] sm:$0xff] }
  0x31   : > { %628 = vmax.xlane.f32.xlu0 %v627_v17  ;;  %v669_v53 = vmax.f32 %v4090_v49, %v4093_v50  ;;  %6502 = vst [vmem:[#allocation7_spill] sm:$0xff] %v4102_v54  ;;  %v4108_v56 = vld [vmem:[%s3951_s5 + $0x130] sm:$0xff]  ;;  %v4111_v57 = vld [vmem:[%s3951_s5 + $0x138] sm:$0xff]  ;;  %v4114_v58 = vld [vmem:[%s3951_s5 + $0x120] sm:$0xff]  ;;  %v684_v60 = vmax.f32 %v4102_v54, %v4105_v55 }
  0x32   : > { %6503 = vst [vmem:[#allocation8_spill] sm:$0xff] %v4105_v55  ;;  %v4117_v59 = vld [vmem:[%s3951_s5 + $0x128] sm:$0xff]  ;;  %v681_v61 = vmax.f32 %v4108_v56, %v4111_v57  ;;  %v4126_v63 = vld [vmem:[%s3951_s5 + $0x170] sm:$0xff]  ;;  %v4129_v3 = vld [vmem:[%s3951_s5 + $0x178] sm:$0xff] }
  0x33   : > { %6504 = vst [vmem:[#allocation9_spill] sm:$0xff] %v4108_v56  ;;  %v678_v62 = vmax.f32 %v4114_v58, %v4117_v59  ;;  %v4132_v7 = vld [vmem:[%s3951_s5 + $0x160] sm:$0xff]  ;;  %v4135_v8 = vld [vmem:[%s3951_s5 + $0x168] sm:$0xff]  ;;  %v4138_v15 = vld [vmem:[%s3951_s5 + $0x150] sm:$0xff]  ;;  %v693_v17 = vmax.f32 %v4126_v63, %v4129_v3 }
  0x34   : > { %6505 = vst [vmem:[#allocation10_spill] sm:$0xff] %v4111_v57  ;;  %v4141_v16 = vld [vmem:[%s3951_s5 + $0x158] sm:$0xff]  ;;  %v412_v55 = vld [vmem:[%s3951_s5 + $0x360] sm:$0xff]  ;;  %v413_v54 = vld [vmem:[%s3951_s5 + $0x368] sm:$0xff] }
  0x35   : > { %6506 = vst [vmem:[#allocation11_spill] sm:$0xff] %v4114_v58  ;;  %v418_v58 = vld [vmem:[%s3951_s5 + $0x390] sm:$0xff]  ;;  %v419_v57 = vld [vmem:[%s3951_s5 + $0x398] sm:$0xff] }
  0x36   : > { %6507 = vst [vmem:[#allocation12_spill] sm:$0xff] %v4117_v59 }
  0x37   : > { %649 = vmax.xlane.f32.xlu2 %v648_v24  ;;  %6508 = vst [vmem:[#allocation13_spill] sm:$0xff] %v4126_v63  ;;  %v690_v24 = vmax.f32 %v4132_v7, %v4135_v8  ;;  %v401_v63 = vld [vmem:[%s3951_s5 + $0x308] sm:$0xff] }
  0x38   : > { %646 = vmax.xlane.f32.xlu1 %v645_v25  ;;  %6509 = vst [vmem:[#allocation14_spill] sm:$0xff] %v4129_v3  ;;  %v687_v25 = vmax.f32 %v4138_v15, %v4141_v16  ;;  %v400_v3 = vld [vmem:[%s3951_s5 + $0x300] sm:$0xff] }
  0x39   : > { %643 = vmax.xlane.f32.xlu0 %v642_v26  ;;  %6510 = vst [vmem:[#allocation15_spill] sm:$0xff] %v4132_v7  ;;  %v4150_v26 = vld [vmem:[%s3951_s5 + $0x1a0] sm:$0xff] }
  0x3a   : > { %6511 = vst [vmem:[#allocation16_spill] sm:$0xff] %v4135_v8  ;;  %v407_v8 = vld [vmem:[%s3951_s5 + $0x338] sm:$0xff] }
  0x3b   : > { %6512 = vst [vmem:[#allocation17_spill] sm:$0xff] %v4138_v15  ;;  %v406_v15 = vld [vmem:[%s3951_s5 + $0x330] sm:$0xff] }
  0x3c   : > { %6513 = vst [vmem:[#allocation18_spill] sm:$0xff] %v4141_v16 }
  0x3d   : > { %6514 = vst [vmem:[#allocation19_spill] sm:$0xff] %v4150_v26 }
  0x3f   : > { %658 = vmax.xlane.f32.xlu2 %v657_v33  ;;  %v4153_v33 = vld [vmem:[%s3951_s5 + $0x1a8] sm:$0xff] }
  0x40   : > { %655 = vmax.xlane.f32.xlu1 %v654_v34  ;;  %6515 = vst [vmem:[#allocation20_spill] sm:$0xff] %v4153_v33  ;;  %v4156_v34 = vld [vmem:[%s3951_s5 + $0x190] sm:$0xff] }
  0x41   : > { %652 = vmax.xlane.f32.xlu0 %v651_v35  ;;  %6516 = vst [vmem:[#allocation21_spill] sm:$0xff] %v4156_v34  ;;  %v4159_v35 = vld [vmem:[%s3951_s5 + $0x198] sm:$0xff] }
  0x42   : > { %6517 = vst [vmem:[#allocation22_spill] sm:$0xff] %v4159_v35 }
  0x47   : > { %667 = vmax.xlane.f32.xlu2 %v666_v42  ;;  %v4162_v42 = vld [vmem:[%s3951_s5 + $0x180] sm:$0xff] }
  0x48   : > { %664 = vmax.xlane.f32.xlu1 %v663_v43  ;;  %6518 = vst [vmem:[#allocation23_spill] sm:$0xff] %v4162_v42  ;;  %v4165_v43 = vld [vmem:[%s3951_s5 + $0x188] sm:$0xff] }
  0x49   : > { %661 = vmax.xlane.f32.xlu0 %v660_v44  ;;  %6519 = vst [vmem:[#allocation24_spill] sm:$0xff] %v4165_v43  ;;  %v702_v44 = vmax.f32 %v4150_v26, %v4153_v33  ;;  %v4201_v33 = vld [vmem:[%s3951_s5 + $0x208] sm:$0xff]  ;;  %v4248_v26 = vld [vmem:[%s3951_s5 + $0x250] sm:$0xff] }
  0x4a   : > { %6527 = vst [vmem:[#allocation32_spill] sm:$0xff] %v4201_v33 }
  0x4b   : > { %6538 = vst [vmem:[#allocation43_spill] sm:$0xff] %v4248_v26 }
  0x4f   : > { %676 = vmax.xlane.f32.xlu2 %v675_v51  ;;  %v699_v51 = vmax.f32 %v4156_v34, %v4159_v35  ;;  %v389_v35 = vld [vmem:[%s3951_s5 + $0x2a8] sm:$0xff] }
  0x50   : > { %673 = vmax.xlane.f32.xlu1 %v672_v52  ;;  %v696_v52 = vmax.f32 %v4162_v42, %v4165_v43  ;;  %v383_v43 = vld [vmem:[%s3951_s5 + $0x278] sm:$0xff]  ;;  %v388_v42 = vld [vmem:[%s3951_s5 + $0x2a0] sm:$0xff] }
  0x51   : > { %670 = vmax.xlane.f32.xlu0 %v669_v53  ;;  %v4174_v53 = vld [vmem:[%s3951_s5 + $0x1d0] sm:$0xff] }
  0x52   : > { %6520 = vst [vmem:[#allocation25_spill] sm:$0xff] %v4174_v53 }
  0x57   : > { %685 = vmax.xlane.f32.xlu2 %v684_v60  ;;  %v4177_v60 = vld [vmem:[%s3951_s5 + $0x1d8] sm:$0xff] }
  0x58   : > { %682 = vmax.xlane.f32.xlu1 %v681_v61  ;;  %6521 = vst [vmem:[#allocation26_spill] sm:$0xff] %v4177_v60  ;;  %v4180_v61 = vld [vmem:[%s3951_s5 + $0x1c0] sm:$0xff] }
  0x59   : > { %679 = vmax.xlane.f32.xlu0 %v678_v62  ;;  %6522 = vst [vmem:[#allocation27_spill] sm:$0xff] %v4180_v61  ;;  %v4183_v62 = vld [vmem:[%s3951_s5 + $0x1c8] sm:$0xff] }
  0x5a   : > { %6523 = vst [vmem:[#allocation28_spill] sm:$0xff] %v4183_v62 }
  0x5f   : > { %694 = vmax.xlane.f32.xlu2 %v693_v17  ;;  %v4186_v17 = vld [vmem:[%s3951_s5 + $0x1b0] sm:$0xff] }
  0x60   : > { %691 = vmax.xlane.f32.xlu1 %v690_v24  ;;  %6524 = vst [vmem:[#allocation29_spill] sm:$0xff] %v4186_v17  ;;  %v4189_v24 = vld [vmem:[%s3951_s5 + $0x1b8] sm:$0xff] }
  0x61   : > { %688 = vmax.xlane.f32.xlu0 %v687_v25  ;;  %6525 = vst [vmem:[#allocation30_spill] sm:$0xff] %v4189_v24  ;;  %v711_v25 = vmax.f32 %v4174_v53, %v4177_v60  ;;  %v4204_v60 = vld [vmem:[%s3951_s5 + $0x1f0] sm:$0xff]  ;;  %v4207_v53 = vld [vmem:[%s3951_s5 + $0x1f8] sm:$0xff] }
  0x62   : > { %6528 = vst [vmem:[#allocation33_spill] sm:$0xff] %v4204_v60 }
  0x63   : > { %6529 = vst [vmem:[#allocation34_spill] sm:$0xff] %v4207_v53 }
  0x67   : > { %703 = vmax.xlane.f32.xlu2 %v702_v44  ;;  %v708_v44 = vmax.f32 %v4180_v61, %v4183_v62  ;;  %v4210_v62 = vld [vmem:[%s3951_s5 + $0x1e0] sm:$0xff]  ;;  %v4225_v61 = vld [vmem:[%s3951_s5 + $0x238] sm:$0xff] }
  0x68   : > { %700 = vmax.xlane.f32.xlu1 %v699_v51  ;;  %v705_v51 = vmax.f32 %v4186_v17, %v4189_v24  ;;  %6530 = vst [vmem:[#allocation35_spill] sm:$0xff] %v4210_v62  ;;  %v4213_v24 = vld [vmem:[%s3951_s5 + $0x1e8] sm:$0xff]  ;;  %v4222_v17 = vld [vmem:[%s3951_s5 + $0x230] sm:$0xff] }
  0x69   : > { %697 = vmax.xlane.f32.xlu0 %v696_v52  ;;  %v4198_v52 = vld [vmem:[%s3951_s5 + $0x200] sm:$0xff]  ;;  %6531 = vst [vmem:[#allocation36_spill] sm:$0xff] %v4213_v24 }
  0x6a   : > { %6526 = vst [vmem:[#allocation31_spill] sm:$0xff] %v4198_v52 }
  0x6b   : > { %6532 = vst [vmem:[#allocation37_spill] sm:$0xff] %v4222_v17 }
  0x6c   : > { %6533 = vst [vmem:[#allocation38_spill] sm:$0xff] %v4225_v61 }
  0x6f   : > { %712 = vmax.xlane.f32.xlu2 %v711_v25  ;;  %v720_v25 = vmax.f32 %v4198_v52, %v4201_v33  ;;  %v4228_v33 = vld [vmem:[%s3951_s5 + $0x220] sm:$0xff]  ;;  %v4231_v52 = vld [vmem:[%s3951_s5 + $0x228] sm:$0xff] }
  0x70   : > { %709 = vmax.xlane.f32.xlu1 %v708_v44  ;;  %v717_v44 = vmax.f32 %v4204_v60, %v4207_v53  ;;  %6534 = vst [vmem:[#allocation39_spill] sm:$0xff] %v4228_v33  ;;  %v4234_v53 = vld [vmem:[%s3951_s5 + $0x210] sm:$0xff]  ;;  %v381_v60 = vld [vmem:[%s3951_s5 + $0x268] sm:$0xff] }
  0x71   : > { %706 = vmax.xlane.f32.xlu0 %v705_v51  ;;  %v714_v51 = vmax.f32 %v4210_v62, %v4213_v24  ;;  %6535 = vst [vmem:[#allocation40_spill] sm:$0xff] %v4231_v52  ;;  %v4237_v24 = vld [vmem:[%s3951_s5 + $0x218] sm:$0xff]  ;;  %v380_v62 = vld [vmem:[%s3951_s5 + $0x260] sm:$0xff] }
  0x72   : > { %6536 = vst [vmem:[#allocation41_spill] sm:$0xff] %v4234_v53 }
  0x73   : > { %6537 = vst [vmem:[#allocation42_spill] sm:$0xff] %v4237_v24 }
  0x77   : > { %721 = vmax.xlane.f32.xlu2 %v720_v25  ;;  %v729_v25 = vmax.f32 %v4222_v17, %v4225_v61  ;;  %v4251_v61 = vld [vmem:[%s3951_s5 + $0x258] sm:$0xff]  ;;  %v4254_v17 = vld [vmem:[%s3951_s5 + $0x240] sm:$0xff] }
  0x78   : > { %718 = vmax.xlane.f32.xlu1 %v717_v44  ;;  %v726_v44 = vmax.f32 %v4228_v33, %v4231_v52  ;;  %6539 = vst [vmem:[#allocation44_spill] sm:$0xff] %v4251_v61  ;;  %v4257_v52 = vld [vmem:[%s3951_s5 + $0x248] sm:$0xff]  ;;  %v4266_v33 = vld [vmem:[%s3951_s5 + $0x280] sm:$0xff] }
  0x79   : > { %715 = vmax.xlane.f32.xlu0 %v714_v51  ;;  %v723_v51 = vmax.f32 %v4234_v53, %v4237_v24  ;;  %6540 = vst [vmem:[#allocation45_spill] sm:$0xff] %v4254_v17  ;;  %v738_v24 = vmax.f32 %v380_v62, %v381_v60  ;;  %v387_v53 = vld [vmem:[%s3951_s5 + $0x298] sm:$0xff]  ;;  %v385_v60 = vld [vmem:[%s3951_s5 + $0x288] sm:$0xff]  ;;  %v382_v62 = vld [vmem:[%s3951_s5 + $0x270] sm:$0xff] }
  0x7a   : > { %6541 = vst [vmem:[#allocation46_spill] sm:$0xff] %v4257_v52 }
  0x7b   : > { %6542 = vst [vmem:[#allocation47_spill] sm:$0xff] %v4266_v33 }
  0x7f   : > { %730 = vmax.xlane.f32.xlu2 %v729_v25  ;;  %v735_v25 = vmax.f32 %v4248_v26, %v4251_v61  ;;  %v744_v26 = vmax.f32 %v4266_v33, %v385_v60  ;;  %v394_v60 = vld [vmem:[%s3951_s5 + $0x2d0] sm:$0xff] }
  0x80   : > { %727 = vmax.xlane.f32.xlu1 %v726_v44  ;;  %v732_v44 = vmax.f32 %v4254_v17, %v4257_v52  ;;  %v741_v52 = vmax.f32 %v382_v62, %v383_v43  ;;  %v391_v17 = vld [vmem:[%s3951_s5 + $0x2b8] sm:$0xff]  ;;  %v398_v43 = vld [vmem:[%s3951_s5 + $0x2f0] sm:$0xff] }
  0x81   : > { %724 = vmax.xlane.f32.xlu0 %v723_v51  ;;  %v386_v51 = vld [vmem:[%s3951_s5 + $0x290] sm:$0xff]  ;;  %v395_v62 = vld [vmem:[%s3951_s5 + $0x2d8] sm:$0xff] }
  0x82   : > { %v747_v61 = vmax.f32 %v386_v51, %v387_v53  ;;  %v750_v51 = vmax.f32 %v388_v42, %v389_v35 }
  0x87   : > { %739 = vmax.xlane.f32.xlu2 %v738_v24  ;;  %v392_v24 = vld [vmem:[%s3951_s5 + $0x2c0] sm:$0xff] }
  0x88   : > { %736 = vmax.xlane.f32.xlu1 %v735_v25  ;;  %v393_v25 = vld [vmem:[%s3951_s5 + $0x2c8] sm:$0xff] }
  0x89   : > { %733 = vmax.xlane.f32.xlu0 %v732_v44  ;;  %v390_v44 = vld [vmem:[%s3951_s5 + $0x2b0] sm:$0xff]  ;;  %v756_v34 = vmax.f32 %v392_v24, %v393_v25  ;;  %v404_v25 = vld [vmem:[%s3951_s5 + $0x320] sm:$0xff] }
  0x8a   : > { %v753_v53 = vmax.f32 %v390_v44, %v391_v17  ;;  %v759_v17 = vmax.f32 %v394_v60, %v395_v62  ;;  %v405_v44 = vld [vmem:[%s3951_s5 + $0x328] sm:$0xff]  ;;  %v768_v60 = vmax.f32 %v400_v3, %v401_v63  ;;  %v410_v62 = vld [vmem:[%s3951_s5 + $0x350] sm:$0xff] }
  0x8f   : > { %748 = vmax.xlane.f32.xlu2 %v747_v61  ;;  %v396_v61 = vld [vmem:[%s3951_s5 + $0x2e0] sm:$0xff] }
  0x90   : > { %745 = vmax.xlane.f32.xlu1 %v744_v26  ;;  %v399_v26 = vld [vmem:[%s3951_s5 + $0x2f8] sm:$0xff] }
  0x91   : > { %742 = vmax.xlane.f32.xlu0 %v741_v52  ;;  %v397_v52 = vld [vmem:[%s3951_s5 + $0x2e8] sm:$0xff] }
  0x92   : > { %v762_v42 = vmax.f32 %v396_v61, %v397_v52  ;;  %v774_v61 = vmax.f32 %v404_v25, %v405_v44 }
  0x97   : > { %757 = vmax.xlane.f32.xlu2 %v756_v34  ;;  %v765_v34 = vmax.f32 %v398_v43, %v399_v26 }
  0x98   : > { %754 = vmax.xlane.f32.xlu1 %v753_v53  ;;  %v402_v53 = vld [vmem:[%s3951_s5 + $0x310] sm:$0xff] }
  0x99   : > { %751 = vmax.xlane.f32.xlu0 %v750_v51  ;;  %v403_v51 = vld [vmem:[%s3951_s5 + $0x318] sm:$0xff] }
  0x9a   : > { %v4284_v33 = vpop.xlane.xlu2 %637  ;;  %v771_v52 = vmax.f32 %v402_v53, %v403_v51  ;;  %v777_v53 = vmax.f32 %v406_v15, %v407_v8  ;;  %v416_v51 = vld [vmem:[%s3951_s5 + $0x380] sm:$0xff] }
  0x9b   : > { %v4286_v24 = vpop.xlane.xlu1 %631 }
  0x9c   : > { %v4288_v35 = vpop.xlane.xlu0 %625 }
  0x9d   : > { %v816_v56 = vsub.f32 %v3972_v5, %v4288_v35  ;;  %v795_v5 = vmax.f32 %v418_v58, %v419_v57  ;;  %v427_v58 = vld [vmem:[%s3951_s5 + $0x3d8] sm:$0xff] }
  0x9f   : > { %766 = vmax.xlane.f32.xlu2 %v765_v34  ;;  %v411_v34 = vld [vmem:[%s3951_s5 + $0x358] sm:$0xff] }
  0xa0   : > { %763 = vmax.xlane.f32.xlu1 %v762_v42  ;;  %v408_v42 = vld [vmem:[%s3951_s5 + $0x340] sm:$0xff]  ;;  %v783_v3 = vmax.f32 %v410_v62, %v411_v34 }
  0xa1   : > { %760 = vmax.xlane.f32.xlu0 %v759_v17  ;;  %v409_v17 = vld [vmem:[%s3951_s5 + $0x348] sm:$0xff] }
  0xa2   : > { %v4296_v16 = vpop.xlane.xlu2 %640  ;;  %v780_v44 = vmax.f32 %v408_v42, %v409_v17  ;;  %v786_v42 = vmax.f32 %v412_v55, %v413_v54  ;;  %v422_v17 = vld [vmem:[%s3951_s5 + $0x3b0] sm:$0xff] }
  0xa3   : > { %6543 = vst [vmem:[#allocation48_spill] sm:$0xff] %v4296_v16  ;;  %v4298_v43 = vpop.xlane.xlu1 %634 }
  0xa4   : > { %v4300_v26 = vpop.xlane.xlu0 %628 }
  0xa5   : > { %6544 = vst [vmem:[#allocation49_spill] sm:$0xff] %v4300_v26 }
  0xa7   : > { %775 = vmax.xlane.f32.xlu2 %v774_v61  ;;  %v417_v61 = vld [vmem:[%s3951_s5 + $0x388] sm:$0xff] }
  0xa8   : > { %772 = vmax.xlane.f32.xlu1 %v771_v52  ;;  %v414_v52 = vld [vmem:[%s3951_s5 + $0x370] sm:$0xff]  ;;  %v792_v15 = vmax.f32 %v416_v51, %v417_v61  ;;  %v818_v51 = vsub.f32 %v3994_v13, %v4300_v26  ;;  %v824_v13 = vsub.f32 %v3958_v0, %v4284_v33 }
  0xa9   : > { %769 = vmax.xlane.f32.xlu0 %v768_v60  ;;  %v415_v60 = vld [vmem:[%s3951_s5 + $0x378] sm:$0xff] }
  0xaa   : > { %v4308_v7 = vpop.xlane.xlu2 %649  ;;  %v789_v34 = vmax.f32 %v414_v52, %v415_v60  ;;  %v819_v52 = vsub.f32 %v3997_v14, %v4300_v26  ;;  %v426_v14 = vld [vmem:[%s3951_s5 + $0x3d0] sm:$0xff]  ;;  %v425_v26 = vld [vmem:[%s3951_s5 + $0x3c8] sm:$0xff] }
  0xab   : > { %6545 = vst [vmem:[#allocation50_spill] sm:$0xff] %v4308_v7  ;;  %v4310_v25 = vpop.xlane.xlu1 %646 }
  0xac   : > { %v4312_v63 = vpop.xlane.xlu0 %643  ;;  %v950_v45 = vmul.f32 1.442695, %v819_v52 }
  0xad   : > { %6546 = vst [vmem:[#allocation51_spill] sm:$0xff] %v4312_v63 }
  0xaf   : > { %784 = vmax.xlane.f32.xlu2 %v783_v3  ;;  %v423_v3 = vld [vmem:[%s3951_s5 + $0x3b8] sm:$0xff] }
  0xb0   : > { %781 = vmax.xlane.f32.xlu1 %v780_v44  ;;  %v420_v44 = vld [vmem:[%s3951_s5 + $0x3a0] sm:$0xff]  ;;  %v801_v61 = vmax.f32 %v422_v17, %v423_v3  ;;  %v429_v3 = vld [vmem:[%s3951_s5 + $0x3e8] sm:$0xff] }
  0xb1   : > { %778 = vmax.xlane.f32.xlu0 %v777_v53  ;;  %v421_v53 = vld [vmem:[%s3951_s5 + $0x3a8] sm:$0xff]  ;;  %v428_v17 = vld [vmem:[%s3951_s5 + $0x3e0] sm:$0xff] }
  0xb2   : > { %v4320_v59 = vpop.xlane.xlu2 %658  ;;  %v798_v60 = vmax.f32 %v420_v44, %v421_v53  ;;  %v825_v44 = vsub.f32 %v3961_v1, %v4284_v33  ;;  %v424_v53 = vld [vmem:[%s3951_s5 + $0x3c0] sm:$0xff]  ;;  %v810_v1 = vmax.f32 %v428_v17, %v429_v3  ;;  %v826_v17 = vsub.f32 %v3982_v9, %v4296_v16 }
  0xb3   : > { %6547 = vst [vmem:[#allocation52_spill] sm:$0xff] %v4320_v59  ;;  %v4322_v62 = vpop.xlane.xlu1 %655  ;;  %v831_v9 = vsub.f32 %v4015_v21, %v4310_v25 }
  0xb4   : > { %6548 = vst [vmem:[#allocation53_spill] sm:$0xff] %v4322_v62  ;;  %v4324_v8 = vpop.xlane.xlu0 %652 }
  0xb5   : > { %6549 = vst [vmem:[#allocation54_spill] sm:$0xff] %v4324_v8 }
  0xb7   : > { %793 = vmax.xlane.f32.xlu2 %v792_v15  ;;  %v817_v15 = vsub.f32 %v3975_v6, %v4288_v35  ;;  %v820_v6 = vsub.f32 %v3964_v2, %v4286_v24  ;;  %v962_v2 = vmul.f32 1.442695, %v825_v44  ;;  %v431_v44 = vld [vmem:[%s3951_s5 + $0x3f8] sm:$0xff] }
  0xb8   : > { %790 = vmax.xlane.f32.xlu1 %v789_v34  ;;  %v944_v34 = vmul.f32 1.442695, %v816_v56  ;;  %v960_v56 = vmul.f32 1.442695, %v824_v13 }
  0xb9   : > { %787 = vmax.xlane.f32.xlu0 %v786_v42  ;;  %v948_v42 = vmul.f32 1.442695, %v818_v51  ;;  %v946_v57 = vmul.f32 1.442695, %v817_v15  ;;  %v821_v51 = vsub.f32 %v3969_v4, %v4286_v24  ;;  %v804_v15 = vmax.f32 %v424_v53, %v425_v26 }
  0xba   : > { %v4334_v46 = vpop.xlane.xlu2 %667  ;;  %3233 = vpow2.f32 %v944_v34  ;;  %v823_v34 = vsub.f32 %v3991_v12, %v4298_v43  ;;  %v952_v4 = vmul.f32 1.442695, %v820_v6 }
  0xbb   : > { %6550 = vst [vmem:[#allocation55_spill] sm:$0xff] %v4334_v46  ;;  %v4338_v54 = vpop.xlane.xlu1 %664  ;;  %3235 = vpow2.f32 %v948_v42  ;;  %v954_v13 = vmul.f32 1.442695, %v821_v51  ;;  %v828_v51 = vsub.f32 %v4018_v22, %v4312_v63 }
  0xbc   : > { %6551 = vst [vmem:[#allocation56_spill] sm:$0xff] %v4338_v54  ;;  %v4340_v55 = vpop.xlane.xlu0 %661  ;;  %3237 = vpow2.f32 %v950_v45  ;;  %v827_v45 = vsub.f32 %v3985_v10, %v4296_v16  ;;  %v958_v26 = vmul.f32 1.442695, %v823_v34  ;;  %v964_v10 = vmul.f32 1.442695, %v826_v17  ;;  %v3678_v16 = vld [vmem:[%s3951_s5 + $0x30] sm:$0xff] }
  0xbd   : > { %6552 = vst [vmem:[#allocation57_spill] sm:$0xff] %v4340_v55  ;;  %3239 = vpow2.f32 %v946_v57  ;;  %v830_v57 = vsub.f32 %v4012_v20, %v4310_v25  ;;  %v829_v20 = vsub.f32 %v4021_v23, %v4312_v63  ;;  %v832_v17 = vsub.f32 %v4006_v18, %v4308_v7 }
  0xbe   : > { %3241 = vpow2.f32 %v960_v56  ;;  %v833_v23 = vsub.f32 %v4009_v19, %v4308_v7  ;;  %v837_v18 = vsub.f32 %v4039_v30, %v4322_v62  ;;  %v834_v19 = vsub.f32 %v4042_v31, %v4324_v8 }
  0xbf   : > { %802 = vmax.xlane.f32.xlu2 %v801_v61  ;;  %3243 = vpow2.f32 %v962_v2  ;;  %v972_v2 = vmul.f32 1.442695, %v830_v57  ;;  %v976_v57 = vmul.f32 1.442695, %v832_v17 }
  0xc0   : > { %799 = vmax.xlane.f32.xlu1 %v798_v60  ;;  %v822_v60 = vsub.f32 %v3988_v11, %v4298_v43  ;;  %v3234_v42 = vpop.eup %3233  ;;  %3245 = vpow2.f32 %v952_v4  ;;  %v974_v4 = vmul.f32 1.442695, %v831_v9 }
  0xc1   : > { %796 = vmax.xlane.f32.xlu0 %v795_v5  ;;  %v807_v5 = vmax.f32 %v426_v14, %v427_v58  ;;  %v3236_v11 = vpop.eup %3235  ;;  %v430_v14 = vld [vmem:[%s3951_s5 + $0x3f0] sm:$0xff]  ;;  %3247 = vpow2.f32 %v954_v13 }
  0xc2   : > { %v4358_v0 = vpop.xlane.xlu2 %676  ;;  %v956_v3 = vmul.f32 1.442695, %v822_v60  ;;  %v3238_v12 = vpop.eup %3237  ;;  %v966_v60 = vmul.f32 1.442695, %v827_v45 }
  0xc3   : > { %6553 = vst [vmem:[#allocation58_spill] sm:$0xff] %v4358_v0  ;;  %v4362_v61 = vpop.xlane.xlu1 %673  ;;  %v3240_v53 = vpop.eup %3239 }
  0xc4   : > { %6554 = vst [vmem:[#allocation59_spill] sm:$0xff] %v4362_v61  ;;  %v4364_v52 = vpop.xlane.xlu0 %670  ;;  %3249 = vpow2.f32 %v956_v3  ;;  %v1200_v34 = vadd.f32 %v3240_v53, %v3234_v42  ;;  %v968_v3 = vmul.f32 1.442695, %v828_v51  ;;  %v836_v42 = vsub.f32 %v4036_v29, %v4322_v62  ;;  %v3677_v62 = vld [vmem:[%s3951_s5 + $0x28] sm:$0xff] }
  0xc5   : > { %6555 = vst [vmem:[#allocation60_spill] sm:$0xff] %v4364_v52  ;;  %3251 = vpow2.f32 %v958_v26  ;;  %v978_v53 = vmul.f32 1.442695, %v833_v23  ;;  %v835_v29 = vsub.f32 %v4045_v32, %v4324_v8  ;;  %v839_v32 = vsub.f32 %v4033_v28, %v4320_v59 }
  0xc6   : > { %3253 = vpow2.f32 %v964_v10  ;;  %v984_v51 = vmul.f32 1.442695, %v836_v42  ;;  %v840_v28 = vsub.f32 %v4066_v40, %v4340_v55 }
  0xc7   : > { %811 = vmax.xlane.f32.xlu2 %v810_v1  ;;  %v813_v1 = vmax.f32 %v430_v14, %v431_v44  ;;  %3255 = vpow2.f32 %v966_v60 }
  0xc8   : > { %808 = vmax.xlane.f32.xlu1 %v807_v5  ;;  %v1203_v5 = vadd.f32 %v3238_v12, %v3236_v11  ;;  %v970_v11 = vmul.f32 1.442695, %v829_v20  ;;  %3257 = vpow2.f32 %v972_v2  ;;  %v986_v20 = vmul.f32 1.442695, %v837_v18 }
  0xc9   : > { %805 = vmax.xlane.f32.xlu0 %v804_v15  ;;  %v3242_v15 = vpop.eup %3241  ;;  %3259 = vpow2.f32 %v974_v4  ;;  %v838_v2 = vsub.f32 %v4030_v27, %v4320_v59  ;;  %v842_v4 = vsub.f32 %v4060_v38, %v4338_v54  ;;  %v843_v27 = vsub.f32 %v4063_v39, %v4338_v54 }
  0xca   : > { %v4378_v58 = vpop.xlane.xlu2 %685  ;;  %v3244_v21 = vpop.eup %3243  ;;  %3261 = vpow2.f32 %v968_v3  ;;  %v841_v38 = vsub.f32 %v4069_v41, %v4340_v55  ;;  %v845_v41 = vsub.f32 %v4057_v37, %v4334_v46  ;;  %v846_v37 = vsub.f32 %v4090_v49, %v4364_v52 }
  0xcb   : > { %6556 = vst [vmem:[#allocation61_spill] sm:$0xff] %v4378_v58  ;;  %v4382_v6 = vpop.xlane.xlu1 %682  ;;  %v3246_v13 = vpop.eup %3245  ;;  %3263 = vpow2.f32 %v970_v11  ;;  %v1212_v9 = vadd.f32 %v3244_v21, %v3242_v15  ;;  %v982_v15 = vmul.f32 1.442695, %v835_v29  ;;  %v988_v23 = vmul.f32 1.442695, %v838_v2 }
  0xcc   : > { %6557 = vst [vmem:[#allocation62_spill] sm:$0xff] %v4382_v6  ;;  %v4384_v56 = vpop.xlane.xlu0 %679  ;;  %v3248_v22 = vpop.eup %3247  ;;  %3265 = vpow2.f32 %v976_v57  ;;  %v990_v11 = vmul.f32 1.442695, %v839_v32  ;;  %v844_v29 = vsub.f32 %v4054_v36, %v4334_v46  ;;  %v849_v36 = vsub.f32 %v4087_v48, %v4362_v61 }
  0xcd   : > { %6558 = vst [vmem:[#allocation63_spill] sm:$0xff] %v4384_v56  ;;  %v3250_v45 = vpop.eup %3249  ;;  %3267 = vpow2.f32 %v978_v53 }
  0xce   : > { %v3252_v14 = vpop.eup %3251  ;;  %3269 = vpow2.f32 %v984_v51  ;;  %v994_v51 = vmul.f32 1.442695, %v841_v38  ;;  %v1000_v2 = vmul.f32 1.442695, %v844_v29 }
  0xcf   : > { %1204 = vadd.xlane.f32.xlu2 %v1203_v5  ;;  %v3254_v10 = vpop.eup %3253  ;;  %v1209_v60 = vadd.f32 %v3252_v14, %v3250_v45  ;;  %3271 = vpow2.f32 %v986_v20  ;;  %v996_v14 = vmul.f32 1.442695, %v842_v4 }
  0xd0   : > { %1201 = vadd.xlane.f32.xlu1 %v1200_v34  ;;  %v3256_v30 = vpop.eup %3255  ;;  %v980_v34 = vmul.f32 1.442695, %v834_v19  ;;  %v998_v19 = vmul.f32 1.442695, %v843_v27 }
  0xd1   : > { %814 = vmax.xlane.f32.xlu0 %v813_v1  ;;  %v1206_v1 = vadd.f32 %v3248_v22, %v3246_v13  ;;  %v3258_v5 = vpop.eup %3257  ;;  %v1215_v18 = vadd.f32 %v3256_v30, %v3254_v10  ;;  %v848_v10 = vsub.f32 %v4084_v47, %v4362_v61  ;;  %v847_v47 = vsub.f32 %v4093_v50, %v4364_v52  ;;  %v6569_v50 = vld [vmem:[#allocation6_spill] sm:$0xff] }
  0xd2   : > { %v4396_v26 = vpop.xlane.xlu2 %694  ;;  %v3260_v31 = vpop.eup %3259  ;;  %3273 = vpow2.f32 %v980_v34  ;;  %v1002_v34 = vmul.f32 1.442695, %v845_v41  ;;  %v851_v38 = vsub.f32 %v6569_v50, %v4358_v0  ;;  %v6575_v41 = vld [vmem:[#allocation11_spill] sm:$0xff] }
  0xd3   : > { %6559 = vst [vmem:[#allocation64_spill] sm:$0xff] %v4396_v26  ;;  %v4400_v44 = vpop.xlane.xlu1 %691  ;;  %v3262_v21 = vpop.eup %3261  ;;  %3275 = vpow2.f32 %v982_v15  ;;  %v1221_v45 = vadd.f32 %v3260_v31, %v3258_v5  ;;  %v1008_v15 = vmul.f32 1.442695, %v848_v10  ;;  %v6576_v10 = vld [vmem:[#allocation12_spill] sm:$0xff] }
  0xd4   : > { %6560 = vst [vmem:[#allocation65_spill] sm:$0xff] %v4400_v44  ;;  %v4402_v12 = vpop.xlane.xlu0 %688  ;;  %v3264_v17 = vpop.eup %3263  ;;  %3277 = vpow2.f32 %v988_v23  ;;  %v6568_v23 = vld [vmem:[#allocation5_spill] sm:$0xff] }
  0xd5   : > { %6561 = vst [vmem:[#allocation66_spill] sm:$0xff] %v4402_v12  ;;  %v3266_v42 = vpop.eup %3265  ;;  %v1218_v57 = vadd.f32 %v3264_v17, %v3262_v21  ;;  %3279 = vpow2.f32 %v990_v11  ;;  %v1010_v17 = vmul.f32 1.442695, %v849_v36  ;;  %v1004_v11 = vmul.f32 1.442695, %v846_v37 }
  0xd6   : > { %v3268_v39 = vpop.eup %3267  ;;  %3281 = vpow2.f32 %v996_v14 }
  0xd7   : > { %1213 = vadd.xlane.f32.xlu2 %v1212_v9  ;;  %v3270_v53 = vpop.eup %3269  ;;  %v992_v9 = vmul.f32 1.442695, %v840_v28  ;;  %3283 = vpow2.f32 %v998_v19  ;;  %v1224_v21 = vadd.f32 %v3268_v39, %v3266_v42  ;;  %v850_v28 = vsub.f32 %v6568_v23, %v4358_v0  ;;  %v6570_v42 = vld [vmem:[#allocation9_spill] sm:$0xff]  ;;  %v6572_v19 = vld [vmem:[#allocation10_spill] sm:$0xff] }
  0xd8   : > { %1210 = vadd.xlane.f32.xlu1 %v1209_v60  ;;  %v3272_v40 = vpop.eup %3271 }
  0xd9   : > { %1207 = vadd.xlane.f32.xlu0 %v1206_v1  ;;  %v3274_v1 = vpop.eup %3273  ;;  %3285 = vpow2.f32 %v992_v9  ;;  %v1230_v31 = vadd.f32 %v3272_v40, %v3270_v53  ;;  %v855_v53 = vsub.f32 %v6572_v19, %v4382_v6  ;;  %v1012_v40 = vmul.f32 1.442695, %v850_v28 }
  0xda   : > { %v4414_v13 = vpop.xlane.xlu2 %703  ;;  %v3276_v30 = vpop.eup %3275  ;;  %3287 = vpow2.f32 %v994_v51  ;;  %v852_v51 = vsub.f32 %v6575_v41, %v4384_v56 }
  0xdb   : > { %6562 = vst [vmem:[#allocation67_spill] sm:$0xff] %v4414_v13  ;;  %v4418_v3 = vpop.xlane.xlu1 %700  ;;  %v3278_v32 = vpop.eup %3277  ;;  %v1227_v4 = vadd.f32 %v3276_v30, %v3274_v1  ;;  %3289 = vpow2.f32 %v1000_v2  ;;  %v1014_v1 = vmul.f32 1.442695, %v851_v38  ;;  %v853_v30 = vsub.f32 %v6576_v10, %v4384_v56 }
  0xdc   : > { %6563 = vst [vmem:[#allocation68_spill] sm:$0xff] %v4418_v3  ;;  %v4420_v22 = vpop.xlane.xlu0 %697  ;;  %v3280_v48 = vpop.eup %3279  ;;  %3291 = vpow2.f32 %v1002_v34  ;;  %v1016_v23 = vmul.f32 1.442695, %v852_v51  ;;  %v6585_v51 = vld [vmem:[#allocation18_spill] sm:$0xff] }
  0xdd   : > { %6564 = vst [vmem:[#allocation69_spill] sm:$0xff] %v4420_v22  ;;  %v3282_v27 = vpop.eup %3281  ;;  %3293 = vpow2.f32 %v1008_v15  ;;  %v1233_v34 = vadd.f32 %v3280_v48, %v3278_v32  ;;  %v1022_v15 = vmul.f32 1.442695, %v855_v53  ;;  %v6579_v32 = vld [vmem:[#allocation15_spill] sm:$0xff]  ;;  %v6584_v53 = vld [vmem:[#allocation17_spill] sm:$0xff] }
  0xde   : > { %v3284_v49 = vpop.eup %3283  ;;  %3295 = vpow2.f32 %v1010_v17  ;;  %v860_v48 = vsub.f32 %v6579_v32, %v4400_v44 }
  0xdf   : > { %1222 = vadd.xlane.f32.xlu2 %v1221_v45  ;;  %v1006_v45 = vmul.f32 1.442695, %v847_v47  ;;  %v3286_v14 = vpop.eup %3285  ;;  %3297 = vpow2.f32 %v1004_v11  ;;  %v1239_v36 = vadd.f32 %v3284_v49, %v3282_v27  ;;  %v6578_v11 = vld [vmem:[#allocation8_spill] sm:$0xff]  ;;  %v1018_v49 = vmul.f32 1.442695, %v853_v30 }
  0xe0   : > { %1219 = vadd.xlane.f32.xlu1 %v1218_v57  ;;  %v3288_v39 = vpop.eup %3287  ;;  %v857_v27 = vsub.f32 %v6578_v11, %v4378_v58 }
  0xe1   : > { %1216 = vadd.xlane.f32.xlu0 %v1215_v18  ;;  %v854_v18 = vsub.f32 %v6570_v42, %v4382_v6  ;;  %3299 = vpow2.f32 %v1006_v45  ;;  %v3290_v2 = vpop.eup %3289  ;;  %v1236_v47 = vadd.f32 %v3288_v39, %v3286_v14  ;;  %v6581_v14 = vld [vmem:[#allocation16_spill] sm:$0xff] }
  0xe2   : > { %v4432_v60 = vpop.xlane.xlu2 %712  ;;  %3301 = vpow2.f32 %v1012_v40  ;;  %v861_v42 = vsub.f32 %v6581_v14, %v4400_v44  ;;  %v858_v40 = vsub.f32 %v6584_v53, %v4402_v12  ;;  %v1026_v41 = vmul.f32 1.442695, %v857_v27 }
  0xe3   : > { %6565 = vst [vmem:[#allocation70_spill] sm:$0xff] %v4432_v60  ;;  %v4436_v20 = vpop.xlane.xlu1 %709  ;;  %v1020_v37 = vmul.f32 1.442695, %v854_v18  ;;  %3303 = vpow2.f32 %v1014_v1  ;;  %v859_v1 = vsub.f32 %v6585_v51, %v4402_v12 }
  0xe4   : > { %6566 = vst [vmem:[#allocation71_spill] sm:$0xff] %v4436_v20  ;;  %v4438_v5 = vpop.xlane.xlu0 %706  ;;  %v1028_v11 = vmul.f32 1.442695, %v858_v40  ;;  %v6593_v40 = vld [vmem:[#allocation23_spill] sm:$0xff] }
  0xe5   : > { %6567 = vst [vmem:[#allocation72_spill] sm:$0xff] %v4438_v5  ;;  %3305 = vpow2.f32 %v1020_v37 }
  0xe6   : > { %3307 = vpow2.f32 %v1022_v15  ;;  %v1034_v15 = vmul.f32 1.442695, %v861_v42 }
  0xe7   : > { %1231 = vadd.xlane.f32.xlu2 %v1230_v31  ;;  %v3292_v31 = vpop.eup %3291  ;;  %3309 = vpow2.f32 %v1016_v23 }
  0xe8   : > { %1228 = vadd.xlane.f32.xlu1 %v1227_v4  ;;  %v6577_v4 = vld [vmem:[#allocation7_spill] sm:$0xff]  ;;  %3311 = vpow2.f32 %v1018_v49  ;;  %v1242_v37 = vadd.f32 %v3292_v31, %v3290_v2  ;;  %v6587_v49 = vld [vmem:[#allocation14_spill] sm:$0xff]  ;;  %v6588_v2 = vld [vmem:[#allocation21_spill] sm:$0xff] }
  0xe9   : > { %1225 = vadd.xlane.f32.xlu0 %v1224_v21  ;;  %v3294_v21 = vpop.eup %3293  ;;  %v856_v17 = vsub.f32 %v6577_v4, %v4378_v58  ;;  %v866_v31 = vsub.f32 %v6588_v2, %v4418_v3 }
  0xea   : > { %v4450_v57 = vpop.xlane.xlu2 %721  ;;  %v3296_v28 = vpop.eup %3295 }
  0xeb   : > { %6571 = vst [vmem:[#allocation5_spill] sm:$0xff] %v4450_v57  ;;  %v4454_v29 = vpop.xlane.xlu1 %718  ;;  %v3298_v50 = vpop.eup %3297  ;;  %v1024_v19 = vmul.f32 1.442695, %v856_v17  ;;  %v1248_v10 = vadd.f32 %v3296_v28, %v3294_v21  ;;  %v6586_v17 = vld [vmem:[#allocation13_spill] sm:$0xff]  ;;  %v863_v21 = vsub.f32 %v6587_v49, %v4396_v26  ;;  %v1030_v28 = vmul.f32 1.442695, %v859_v1 }
  0xec   : > { %6573 = vst [vmem:[#allocation6_spill] sm:$0xff] %v4454_v29  ;;  %v4456_v9 = vpop.xlane.xlu0 %715  ;;  %v3300_v45 = vpop.eup %3299  ;;  %v862_v23 = vsub.f32 %v6586_v17, %v4396_v26  ;;  %v6594_v1 = vld [vmem:[#allocation24_spill] sm:$0xff]  ;;  %v438_v26 = vld [vmem:[%s4756_s17 + $0x30] sm:$0xff] }
  0xed   : > { %6574 = vst [vmem:[#allocation9_spill] sm:$0xff] %v4456_v9  ;;  %v3302_v30 = vpop.eup %3301  ;;  %3313 = vpow2.f32 %v1024_v19  ;;  %v1038_v51 = vmul.f32 1.442695, %v863_v21 }
  0xee   : > { %3315 = vpow2.f32 %v1026_v41  ;;  %v1036_v53 = vmul.f32 1.442695, %v862_v23  ;;  %v864_v41 = vsub.f32 %v6593_v40, %v4420_v22  ;;  %v6595_v23 = vld [vmem:[#allocation19_spill] sm:$0xff] }
  0xef   : > { %1240 = vadd.xlane.f32.xlu2 %v1239_v36  ;;  %v1032_v36 = vmul.f32 1.442695, %v860_v48 }
  0xf0   : > { %1237 = vadd.xlane.f32.xlu1 %v1236_v47  ;;  %v3304_v47 = vpop.eup %3303 }
  0xf1   : > { %1234 = vadd.xlane.f32.xlu0 %v1233_v34  ;;  %v1245_v34 = vadd.f32 %v3300_v45, %v3298_v50  ;;  %v3306_v4 = vpop.eup %3305  ;;  %3317 = vpow2.f32 %v1032_v36  ;;  %v6590_v45 = vld [vmem:[#allocation22_spill] sm:$0xff] }
  0xf2   : > { %v4468_v38 = vpop.xlane.xlu2 %730  ;;  %v3308_v27 = vpop.eup %3307  ;;  %3319 = vpow2.f32 %v1034_v15  ;;  %v867_v14 = vsub.f32 %v6590_v45, %v4418_v3  ;;  %v1251_v15 = vadd.f32 %v3304_v47, %v3302_v30  ;;  %v1040_v3 = vmul.f32 1.442695, %v864_v41  ;;  %v6597_v30 = vld [vmem:[#allocation27_spill] sm:$0xff] }
  0xf3   : > { %6580 = vst [vmem:[#allocation10_spill] sm:$0xff] %v4468_v38  ;;  %v4472_v18 = vpop.xlane.xlu1 %727  ;;  %v3310_v32 = vpop.eup %3309  ;;  %3321 = vpow2.f32 %v1028_v11  ;;  %v1257_v36 = vadd.f32 %v3308_v27, %v3306_v4  ;;  %v868_v11 = vsub.f32 %v6595_v23, %v4414_v13  ;;  %v872_v47 = vsub.f32 %v6597_v30, %v4436_v20 }
  0xf4   : > { %6582 = vst [vmem:[#allocation11_spill] sm:$0xff] %v4472_v18  ;;  %v4474_v39 = vpop.xlane.xlu0 %724  ;;  %v3312_v48 = vpop.eup %3311  ;;  %3323 = vpow2.f32 %v1030_v28  ;;  %v1046_v2 = vmul.f32 1.442695, %v867_v14  ;;  %v6596_v28 = vld [vmem:[#allocation20_spill] sm:$0xff] }
  0xf5   : > { %6583 = vst [vmem:[#allocation12_spill] sm:$0xff] %v4474_v39  ;;  %v1254_v17 = vadd.f32 %v3312_v48, %v3310_v32  ;;  %3325 = vpow2.f32 %v1036_v53  ;;  %v869_v4 = vsub.f32 %v6596_v28, %v4414_v13  ;;  %v6599_v14 = vld [vmem:[#allocation28_spill] sm:$0xff] }
  0xf6   : > { %3327 = vpow2.f32 %v1038_v51  ;;  %v873_v53 = vsub.f32 %v6599_v14, %v4436_v20  ;;  %v1048_v51 = vmul.f32 1.442695, %v868_v11 }
  0xf7   : > { %1249 = vadd.xlane.f32.xlu2 %v1248_v10  ;;  %v865_v10 = vsub.f32 %v6594_v1, %v4420_v22  ;;  %v6602_v1 = vld [vmem:[#allocation29_spill] sm:$0xff] }
  0xf8   : > { %1246 = vadd.xlane.f32.xlu1 %v1245_v34  ;;  %v1044_v34 = vmul.f32 1.442695, %v866_v31  ;;  %v1058_v20 = vmul.f32 1.442695, %v873_v53  ;;  %v6608_v53 = vld [vmem:[#allocation34_spill] sm:$0xff] }
  0xf9   : > { %1243 = vadd.xlane.f32.xlu0 %v1242_v37  ;;  %v3314_v37 = vpop.eup %3313  ;;  %v1042_v27 = vmul.f32 1.442695, %v865_v10  ;;  %v870_v10 = vsub.f32 %v6602_v1, %v4438_v5 }
  0xfa   : > { %v4486_v50 = vpop.xlane.xlu2 %739  ;;  %v3316_v49 = vpop.eup %3315  ;;  %3329 = vpow2.f32 %v1044_v34  ;;  %v6603_v34 = vld [vmem:[#allocation30_spill] sm:$0xff] }
  0xfb   : > { %6589 = vst [vmem:[#allocation7_spill] sm:$0xff] %v4486_v50  ;;  %v4490_v42 = vpop.xlane.xlu1 %736  ;;  %v3318_v45 = vpop.eup %3317  ;;  %3331 = vpow2.f32 %v1046_v2  ;;  %v1056_v2 = vmul.f32 1.442695, %v872_v47  ;;  %v1260_v28 = vadd.f32 %v3316_v49, %v3314_v37  ;;  %v1052_v44 = vmul.f32 1.442695, %v870_v10  ;;  %v6606_v37 = vld [vmem:[#allocation33_spill] sm:$0xff] }
  0xfc   : > { %6591 = vst [vmem:[#allocation8_spill] sm:$0xff] %v4490_v42  ;;  %v4492_v19 = vpop.xlane.xlu0 %733  ;;  %v3320_v21 = vpop.eup %3319  ;;  %3333 = vpow2.f32 %v1040_v3  ;;  %v6604_v3 = vld [vmem:[#allocation25_spill] sm:$0xff]  ;;  %v878_v49 = vsub.f32 %v6606_v37, %v4454_v29 }
  0xfd   : > { %6592 = vst [vmem:[#allocation15_spill] sm:$0xff] %v4492_v19  ;;  %v3322_v31 = vpop.eup %3321  ;;  %3335 = vpow2.f32 %v1042_v27  ;;  %v874_v11 = vsub.f32 %v6604_v3, %v4432_v60  ;;  %v6605_v27 = vld [vmem:[#allocation26_spill] sm:$0xff] }
  0xfe   : > { %v3324_v48 = vpop.eup %3323  ;;  %3337 = vpow2.f32 %v1048_v51  ;;  %v879_v51 = vsub.f32 %v6608_v53, %v4454_v29 }
  0xff   : > { %1258 = vadd.xlane.f32.xlu2 %v1257_v36  ;;  %v1050_v36 = vmul.f32 1.442695, %v869_v4  ;;  %v3326_v23 = vpop.eup %3325  ;;  %v1263_v30 = vadd.f32 %v3324_v48, %v3322_v31 }
 0x100   : > { %1255 = vadd.xlane.f32.xlu1 %v1254_v17  ;;  %v1266_v17 = vadd.f32 %v3320_v21, %v3318_v45  ;;  %v3328_v14 = vpop.eup %3327  ;;  %v875_v45 = vsub.f32 %v6605_v27, %v4432_v60  ;;  %v1070_v29 = vmul.f32 1.442695, %v879_v51  ;;  %v6617_v51 = vld [vmem:[#allocation40_spill] sm:$0xff] }
 0x101   : > { %1252 = vadd.xlane.f32.xlu0 %v1251_v15  ;;  %v871_v15 = vsub.f32 %v6603_v34, %v4438_v5  ;;  %v3330_v22 = vpop.eup %3329  ;;  %3339 = vpow2.f32 %v1050_v36  ;;  %v1060_v36 = vmul.f32 1.442695, %v874_v11  ;;  %v6611_v34 = vld [vmem:[#allocation35_spill] sm:$0xff]  ;;  %v1269_v27 = vadd.f32 %v3328_v14, %v3326_v23 }
 0x102   : > { %v4504_v32 = vpop.xlane.xlu2 %748  ;;  %v3332_v4 = vpop.eup %3331  ;;  %3341 = vpow2.f32 %v1056_v2  ;;  %v6612_v2 = vld [vmem:[#allocation36_spill] sm:$0xff]  ;;  %v6615_v23 = vld [vmem:[#allocation39_spill] sm:$0xff] }
 0x103   : > { %6598 = vst [vmem:[#allocation16_spill] sm:$0xff] %v4504_v32  ;;  %v4508_v40 = vpop.xlane.xlu1 %745  ;;  %v1054_v21 = vmul.f32 1.442695, %v871_v15  ;;  %v3334_v47 = vpop.eup %3333  ;;  %3343 = vpow2.f32 %v1058_v20  ;;  %v876_v15 = vsub.f32 %v6611_v34, %v4456_v9  ;;  %v1068_v20 = vmul.f32 1.442695, %v878_v49 }
 0x104   : > { %6600 = vst [vmem:[#allocation17_spill] sm:$0xff] %v4508_v40  ;;  %v4510_v41 = vpop.xlane.xlu0 %742  ;;  %v3336_v48 = vpop.eup %3335  ;;  %3345 = vpow2.f32 %v1052_v44  ;;  %v6613_v44 = vld [vmem:[#allocation31_spill] sm:$0xff]  ;;  %v884_v14 = vsub.f32 %v6615_v23, %v4472_v18 }
 0x105   : > { %6601 = vst [vmem:[#allocation18_spill] sm:$0xff] %v4510_v41  ;;  %3347 = vpow2.f32 %v1054_v21  ;;  %v3338_v3 = vpop.eup %3337  ;;  %v1272_v37 = vadd.f32 %v3336_v48, %v3334_v47  ;;  %v880_v11 = vsub.f32 %v6613_v44, %v4450_v57  ;;  %v1064_v60 = vmul.f32 1.442695, %v876_v15  ;;  %v6614_v21 = vld [vmem:[#allocation32_spill] sm:$0xff] }
 0x106   : > { %3349 = vpow2.f32 %v1060_v36  ;;  %v885_v36 = vsub.f32 %v6617_v51, %v4472_v18 }
 0x107   : > { %1267 = vadd.xlane.f32.xlu2 %v1266_v17  ;;  %v1062_v17 = vmul.f32 1.442695, %v875_v45  ;;  %v3340_v53 = vpop.eup %3339 }
 0x108   : > { %1264 = vadd.xlane.f32.xlu1 %v1263_v30  ;;  %v1275_v30 = vadd.f32 %v3332_v4, %v3330_v22  ;;  %v3342_v5 = vpop.eup %3341  ;;  %v881_v22 = vsub.f32 %v6614_v21, %v4450_v57  ;;  %v1278_v21 = vadd.f32 %v3340_v53, %v3338_v3  ;;  %v1082_v18 = vmul.f32 1.442695, %v885_v36  ;;  %v6624_v3 = vld [vmem:[#allocation43_spill] sm:$0xff]  ;;  %v6626_v36 = vld [vmem:[#allocation44_spill] sm:$0xff] }
 0x109   : > { %1261 = vadd.xlane.f32.xlu0 %v1260_v28  ;;  %v877_v28 = vsub.f32 %v6612_v2, %v4456_v9  ;;  %v3344_v45 = vpop.eup %3343  ;;  %3351 = vpow2.f32 %v1062_v17  ;;  %v1072_v17 = vmul.f32 1.442695, %v880_v11  ;;  %v6620_v2 = vld [vmem:[#allocation41_spill] sm:$0xff]  ;;  %v890_v53 = vsub.f32 %v6624_v3, %v4490_v42 }
 0x10a   : > { %v4522_v31 = vpop.xlane.xlu2 %757  ;;  %v3346_v49 = vpop.eup %3345  ;;  %3353 = vpow2.f32 %v1068_v20  ;;  %v6621_v20 = vld [vmem:[#allocation42_spill] sm:$0xff] }
 0x10b   : > { %6607 = vst [vmem:[#allocation13_spill] sm:$0xff] %v4522_v31  ;;  %v4526_v1 = vpop.xlane.xlu1 %754  ;;  %v1066_v4 = vmul.f32 1.442695, %v877_v28  ;;  %v3348_v48 = vpop.eup %3347  ;;  %3355 = vpow2.f32 %v1070_v29  ;;  %v882_v28 = vsub.f32 %v6620_v2, %v4474_v39  ;;  %v1080_v29 = vmul.f32 1.442695, %v884_v14 }
 0x10c   : > { %6609 = vst [vmem:[#allocation14_spill] sm:$0xff] %v4526_v1  ;;  %v4528_v10 = vpop.xlane.xlu0 %751  ;;  %3357 = vpow2.f32 %v1064_v60  ;;  %v3350_v44 = vpop.eup %3349  ;;  %v1281_v23 = vadd.f32 %v3348_v48, %v3346_v49  ;;  %v6622_v60 = vld [vmem:[#allocation37_spill] sm:$0xff] }
 0x10d   : > { %6610 = vst [vmem:[#allocation21_spill] sm:$0xff] %v4528_v10  ;;  %3359 = vpow2.f32 %v1066_v4  ;;  %v886_v11 = vsub.f32 %v6622_v60, %v4468_v38  ;;  %v1076_v57 = vmul.f32 1.442695, %v882_v28  ;;  %v6623_v4 = vld [vmem:[#allocation38_spill] sm:$0xff]  ;;  %v1092_v60 = vmul.f32 1.442695, %v890_v53 }
 0x10e   : > { %3361 = vpow2.f32 %v1072_v17  ;;  %v891_v17 = vsub.f32 %v6626_v36, %v4490_v42 }
 0x10f   : > { %1276 = vadd.xlane.f32.xlu2 %v1275_v30  ;;  %v1074_v30 = vmul.f32 1.442695, %v881_v22  ;;  %v3352_v51 = vpop.eup %3351 }
 0x110   : > { %1273 = vadd.xlane.f32.xlu1 %v1272_v37  ;;  %v1284_v37 = vadd.f32 %v3344_v45, %v3342_v5  ;;  %v3354_v9 = vpop.eup %3353  ;;  %v887_v5 = vsub.f32 %v6623_v4, %v4468_v38  ;;  %v1287_v4 = vadd.f32 %v3352_v51, %v3350_v44  ;;  %v1094_v42 = vmul.f32 1.442695, %v891_v17 }
 0x111   : > { %1270 = vadd.xlane.f32.xlu0 %v1269_v27  ;;  %v883_v27 = vsub.f32 %v6621_v20, %v4474_v39  ;;  %v3356_v22 = vpop.eup %3355  ;;  %3363 = vpow2.f32 %v1074_v30  ;;  %v1084_v30 = vmul.f32 1.442695, %v886_v11  ;;  %v6629_v20 = vld [vmem:[#allocation45_spill] sm:$0xff] }
 0x112   : > { %v4540_v47 = vpop.xlane.xlu2 %766  ;;  %v3358_v14 = vpop.eup %3357  ;;  %3365 = vpow2.f32 %v1080_v29  ;;  %v6630_v29 = vld [vmem:[#allocation46_spill] sm:$0xff] }
 0x113   : > { %6616 = vst [vmem:[#allocation22_spill] sm:$0xff] %v4540_v47  ;;  %v4544_v34 = vpop.xlane.xlu1 %763  ;;  %v1078_v45 = vmul.f32 1.442695, %v883_v27  ;;  %v3360_v48 = vpop.eup %3359  ;;  %3367 = vpow2.f32 %v1082_v18  ;;  %v888_v27 = vsub.f32 %v6629_v20, %v4492_v19 }
 0x114   : > { %6618 = vst [vmem:[#allocation23_spill] sm:$0xff] %v4544_v34  ;;  %v4546_v15 = vpop.xlane.xlu0 %760  ;;  %3369 = vpow2.f32 %v1076_v57  ;;  %v3362_v18 = vpop.eup %3361  ;;  %v1290_v3 = vadd.f32 %v3360_v48, %v3358_v14  ;;  %v3617_v57 = vld [vmem:[%s3951_s5 + $0x260] sm:$0xff]  ;;  %v6631_v14 = vld [vmem:[#allocation47_spill] sm:$0xff] }
 0x115   : > { %6619 = vst [vmem:[#allocation24_spill] sm:$0xff] %v4546_v15  ;;  %3371 = vpow2.f32 %v1078_v45  ;;  %v892_v20 = vsub.f32 %v3617_v57, %v4486_v50  ;;  %v896_v53 = vsub.f32 %v6631_v14, %v4508_v40 }
 0x116   : > { %3373 = vpow2.f32 %v1084_v30  ;;  %v3619_v30 = vld [vmem:[%s3951_s5 + $0x288] sm:$0xff] }
 0x117   : > { %1285 = vadd.xlane.f32.xlu2 %v1284_v37  ;;  %v1086_v37 = vmul.f32 1.442695, %v887_v5  ;;  %v3364_v36 = vpop.eup %3363  ;;  %v1088_v5 = vmul.f32 1.442695, %v888_v27  ;;  %v897_v27 = vsub.f32 %v3619_v30, %v4508_v40  ;;  %v1104_v14 = vmul.f32 1.442695, %v896_v53 }
 0x118   : > { %1282 = vadd.xlane.f32.xlu1 %v1281_v23  ;;  %v1293_v23 = vadd.f32 %v3356_v22, %v3354_v9  ;;  %v3366_v11 = vpop.eup %3365  ;;  %v3618_v9 = vld [vmem:[%s3951_s5 + $0x268] sm:$0xff]  ;;  %v1296_v30 = vadd.f32 %v3364_v36, %v3362_v18 }
 0x119   : > { %1279 = vadd.xlane.f32.xlu0 %v1278_v21  ;;  %v889_v21 = vsub.f32 %v6630_v29, %v4492_v19  ;;  %v3368_v45 = vpop.eup %3367  ;;  %3375 = vpow2.f32 %v1086_v37  ;;  %v893_v22 = vsub.f32 %v3618_v9, %v4486_v50  ;;  %v1106_v39 = vmul.f32 1.442695, %v897_v27 }
 0x11a   : > { %v4558_v49 = vpop.xlane.xlu2 %775  ;;  %v3370_v51 = vpop.eup %3369  ;;  %3377 = vpow2.f32 %v1092_v60  ;;  %v1302_v9 = vadd.f32 %v3368_v45, %v3366_v11  ;;  %v3623_v11 = vld [vmem:[%s3951_s5 + $0x298] sm:$0xff] }
 0x11b   : > { %6625 = vst [vmem:[#allocation19_spill] sm:$0xff] %v4558_v49  ;;  %v4562_v2 = vpop.xlane.xlu1 %772  ;;  %v1090_v44 = vmul.f32 1.442695, %v889_v21  ;;  %v3372_v17 = vpop.eup %3371  ;;  %3379 = vpow2.f32 %v1094_v42  ;;  %v3620_v21 = vld [vmem:[%s3951_s5 + $0x270] sm:$0xff]  ;;  %v899_v18 = vsub.f32 %v3623_v11, %v4504_v32 }
 0x11c   : > { %6627 = vst [vmem:[#allocation20_spill] sm:$0xff] %v4562_v2  ;;  %v4564_v28 = vpop.xlane.xlu0 %769  ;;  %3381 = vpow2.f32 %v1088_v5  ;;  %v894_v60 = vsub.f32 %v3620_v21, %v4510_v41  ;;  %v3374_v42 = vpop.eup %3373  ;;  %v1299_v40 = vadd.f32 %v3372_v17, %v3370_v51  ;;  %v3622_v5 = vld [vmem:[%s3951_s5 + $0x290] sm:$0xff] }
 0x11d   : > { %6628 = vst [vmem:[#allocation27_spill] sm:$0xff] %v4564_v28  ;;  %3383 = vpow2.f32 %v1090_v44  ;;  %v898_v21 = vsub.f32 %v3622_v5, %v4504_v32  ;;  %v3624_v51 = vld [vmem:[%s3951_s5 + $0x2b0] sm:$0xff] }
 0x11e   : > { %v902_v53 = vsub.f32 %v3624_v51, %v4526_v1 }
 0x11f   : > { %1294 = vadd.xlane.f32.xlu2 %v1293_v23  ;;  %v1096_v23 = vmul.f32 1.442695, %v892_v20  ;;  %v3376_v19 = vpop.eup %3375 }
 0x120   : > { %1291 = vadd.xlane.f32.xlu1 %v1290_v3  ;;  %v3621_v3 = vld [vmem:[%s3951_s5 + $0x278] sm:$0xff]  ;;  %v3378_v20 = vpop.eup %3377  ;;  %v1116_v51 = vmul.f32 1.442695, %v902_v53 }
 0x121   : > { %1288 = vadd.xlane.f32.xlu0 %v1287_v4  ;;  %v1098_v4 = vmul.f32 1.442695, %v893_v22  ;;  %v895_v57 = vsub.f32 %v3621_v3, %v4510_v41  ;;  %3385 = vpow2.f32 %v1096_v23  ;;  %v1100_v22 = vmul.f32 1.442695, %v894_v60  ;;  %v3380_v44 = vpop.eup %3379  ;;  %v3625_v23 = vld [vmem:[%s3951_s5 + $0x2b8] sm:$0xff] }
 0x122   : > { %v4576_v48 = vpop.xlane.xlu2 %784  ;;  %v3382_v45 = vpop.eup %3381  ;;  %v1108_v3 = vmul.f32 1.442695, %v898_v21  ;;  %v1311_v11 = vadd.f32 %v3380_v44, %v3378_v20  ;;  %v3629_v20 = vld [vmem:[%s3951_s5 + $0x2c8] sm:$0xff] }
 0x123   : > { %6632 = vst [vmem:[#allocation28_spill] sm:$0xff] %v4576_v48  ;;  %v4580_v29 = vpop.xlane.xlu1 %781  ;;  %3387 = vpow2.f32 %v1098_v4  ;;  %v1102_v36 = vmul.f32 1.442695, %v895_v57  ;;  %v3384_v27 = vpop.eup %3383  ;;  %v3626_v57 = vld [vmem:[%s3951_s5 + $0x2a0] sm:$0xff] }
 0x124   : > { %6633 = vst [vmem:[#allocation29_spill] sm:$0xff] %v4580_v29  ;;  %v4582_v37 = vpop.xlane.xlu0 %778  ;;  %3389 = vpow2.f32 %v1104_v14  ;;  %v1110_v14 = vmul.f32 1.442695, %v899_v18 }
 0x125   : > { %6634 = vst [vmem:[#allocation30_spill] sm:$0xff] %v4582_v37  ;;  %3391 = vpow2.f32 %v1106_v39 }
 0x126   : > { %3393 = vpow2.f32 %v1100_v22  ;;  %v3628_v22 = vld [vmem:[%s3951_s5 + $0x2c0] sm:$0xff] }
 0x127   : > { %1303 = vadd.xlane.f32.xlu2 %v1302_v9  ;;  %v900_v9 = vsub.f32 %v3626_v57, %v4528_v10  ;;  %3395 = vpow2.f32 %v1102_v36  ;;  %v3386_v39 = vpop.eup %3385  ;;  %v904_v57 = vsub.f32 %v3628_v22, %v4522_v31 }
 0x128   : > { %1300 = vadd.xlane.f32.xlu1 %v1299_v40  ;;  %v903_v40 = vsub.f32 %v3625_v23, %v4526_v1  ;;  %v1305_v23 = vadd.f32 %v3376_v19, %v3374_v42  ;;  %v1308_v1 = vadd.f32 %v3384_v27, %v3382_v45  ;;  %3397 = vpow2.f32 %v1108_v3  ;;  %v3630_v45 = vld [vmem:[%s3951_s5 + $0x2e0] sm:$0xff]  ;;  %v3631_v3 = vld [vmem:[%s3951_s5 + $0x2e8] sm:$0xff] }
 0x129   : > { %1297 = vadd.xlane.f32.xlu0 %v1296_v30  ;;  %v3627_v30 = vld [vmem:[%s3951_s5 + $0x2a8] sm:$0xff]  ;;  %v3388_v41 = vpop.eup %3387  ;;  %v1112_v18 = vmul.f32 1.442695, %v900_v9  ;;  %3399 = vpow2.f32 %v1110_v14  ;;  %v905_v19 = vsub.f32 %v3629_v20, %v4522_v31  ;;  %v908_v53 = vsub.f32 %v3630_v45, %v4544_v34 }
 0x12a   : > { %v4594_v17 = vpop.xlane.xlu2 %793  ;;  %v901_v5 = vsub.f32 %v3627_v30, %v4528_v10  ;;  %v1118_v32 = vmul.f32 1.442695, %v903_v40  ;;  %v3390_v21 = vpop.eup %3389  ;;  %3401 = vpow2.f32 %v1116_v51  ;;  %v1120_v30 = vmul.f32 1.442695, %v904_v57 }
 0x12b   : > { %6635 = vst [vmem:[#allocation25_spill] sm:$0xff] %v4594_v17  ;;  %v4598_v60 = vpop.xlane.xlu1 %790  ;;  %v3392_v36 = vpop.eup %3391  ;;  %v1122_v51 = vmul.f32 1.442695, %v905_v19  ;;  %v1128_v45 = vmul.f32 1.442695, %v908_v53 }
 0x12c   : > { %6636 = vst [vmem:[#allocation26_spill] sm:$0xff] %v4598_v60  ;;  %v4600_v4 = vpop.xlane.xlu0 %787  ;;  %v1114_v42 = vmul.f32 1.442695, %v901_v5  ;;  %v3394_v44 = vpop.eup %3393  ;;  %3403 = vpow2.f32 %v1118_v32  ;;  %v3632_v5 = vld [vmem:[%s3951_s5 + $0x2d0] sm:$0xff]  ;;  %v1320_v20 = vadd.f32 %v3392_v36, %v3390_v21  ;;  %v3635_v21 = vld [vmem:[%s3951_s5 + $0x2f8] sm:$0xff] }
 0x12d   : > { %6637 = vst [vmem:[#allocation33_spill] sm:$0xff] %v4600_v4  ;;  %v3396_v40 = vpop.eup %3395  ;;  %3405 = vpow2.f32 %v1112_v18  ;;  %v3634_v18 = vld [vmem:[%s3951_s5 + $0x2f0] sm:$0xff] }
 0x12e   : > { %3407 = vpow2.f32 %v1114_v42  ;;  %v3398_v32 = vpop.eup %3397 }
 0x12f   : > { %1312 = vadd.xlane.f32.xlu2 %v1311_v11  ;;  %v906_v11 = vsub.f32 %v3632_v5, %v4546_v15  ;;  %v3400_v10 = vpop.eup %3399  ;;  %3409 = vpow2.f32 %v1120_v30  ;;  %v910_v5 = vsub.f32 %v3634_v18, %v4540_v47  ;;  %v3637_v30 = vld [vmem:[%s3951_s5 + $0x318] sm:$0xff] }
 0x130   : > { %1309 = vadd.xlane.f32.xlu1 %v1308_v1  ;;  %v909_v1 = vsub.f32 %v3631_v3, %v4544_v34  ;;  %v1314_v3 = vadd.f32 %v3388_v41, %v3386_v39  ;;  %v1317_v34 = vadd.f32 %v3396_v40, %v3394_v44  ;;  %v3402_v57 = vpop.eup %3401  ;;  %3411 = vpow2.f32 %v1122_v51  ;;  %v3636_v44 = vld [vmem:[%s3951_s5 + $0x310] sm:$0xff] }
 0x131   : > { %1306 = vadd.xlane.f32.xlu0 %v1305_v23  ;;  %v3633_v23 = vld [vmem:[%s3951_s5 + $0x2d8] sm:$0xff]  ;;  %v1124_v19 = vmul.f32 1.442695, %v906_v11  ;;  %v911_v41 = vsub.f32 %v3635_v21, %v4540_v47  ;;  %3413 = vpow2.f32 %v1128_v45  ;;  %v914_v53 = vsub.f32 %v3636_v44, %v4562_v2 }
 0x132   : > { %v4612_v27 = vpop.xlane.xlu2 %802  ;;  %v907_v22 = vsub.f32 %v3633_v23, %v4546_v15  ;;  %v1130_v31 = vmul.f32 1.442695, %v909_v1  ;;  %v3404_v42 = vpop.eup %3403  ;;  %v1132_v23 = vmul.f32 1.442695, %v910_v5 }
 0x133   : > { %6638 = vst [vmem:[#allocation34_spill] sm:$0xff] %v4612_v27  ;;  %v4616_v9 = vpop.xlane.xlu1 %799  ;;  %v3406_v36 = vpop.eup %3405  ;;  %v1134_v45 = vmul.f32 1.442695, %v911_v41  ;;  %v1329_v21 = vadd.f32 %v3404_v42, %v3402_v57  ;;  %v1140_v44 = vmul.f32 1.442695, %v914_v53  ;;  %v3641_v57 = vld [vmem:[%s3951_s5 + $0x328] sm:$0xff] }
 0x134   : > { %6639 = vst [vmem:[#allocation35_spill] sm:$0xff] %v4616_v9  ;;  %v4618_v14 = vpop.xlane.xlu0 %796  ;;  %v1126_v39 = vmul.f32 1.442695, %v907_v22  ;;  %v3408_v1 = vpop.eup %3407  ;;  %3415 = vpow2.f32 %v1130_v31  ;;  %v3638_v22 = vld [vmem:[%s3951_s5 + $0x300] sm:$0xff] }
 0x135   : > { %6640 = vst [vmem:[#allocation36_spill] sm:$0xff] %v4618_v14  ;;  %3417 = vpow2.f32 %v1124_v19  ;;  %v3410_v31 = vpop.eup %3409  ;;  %v3640_v19 = vld [vmem:[%s3951_s5 + $0x320] sm:$0xff] }
 0x136   : > { %3419 = vpow2.f32 %v1126_v39  ;;  %v3412_v15 = vpop.eup %3411 }
 0x137   : > { %1321 = vadd.xlane.f32.xlu2 %v1320_v20  ;;  %v912_v20 = vsub.f32 %v3638_v22, %v4564_v28  ;;  %v3414_v5 = vpop.eup %3413  ;;  %3421 = vpow2.f32 %v1132_v23  ;;  %v916_v22 = vsub.f32 %v3640_v19, %v4558_v49  ;;  %v3643_v23 = vld [vmem:[%s3951_s5 + $0x348] sm:$0xff] }
 0x138   : > { %1318 = vadd.xlane.f32.xlu1 %v1317_v34  ;;  %v915_v34 = vsub.f32 %v3637_v30, %v4562_v2  ;;  %v1323_v30 = vadd.f32 %v3400_v10, %v3398_v32  ;;  %v1326_v2 = vadd.f32 %v3408_v1, %v3406_v36  ;;  %3423 = vpow2.f32 %v1134_v45  ;;  %v3642_v36 = vld [vmem:[%s3951_s5 + $0x340] sm:$0xff] }
 0x139   : > { %1315 = vadd.xlane.f32.xlu0 %v1314_v3  ;;  %v3639_v3 = vld [vmem:[%s3951_s5 + $0x308] sm:$0xff]  ;;  %v1136_v41 = vmul.f32 1.442695, %v912_v20  ;;  %v917_v10 = vsub.f32 %v3641_v57, %v4558_v49  ;;  %3425 = vpow2.f32 %v1140_v44  ;;  %v920_v53 = vsub.f32 %v3642_v36, %v4580_v29 }
 0x13a   : > { %v4630_v40 = vpop.xlane.xlu2 %811  ;;  %v913_v18 = vsub.f32 %v3639_v3, %v4564_v28  ;;  %v1142_v47 = vmul.f32 1.442695, %v915_v34  ;;  %v3416_v39 = vpop.eup %3415  ;;  %v1144_v3 = vmul.f32 1.442695, %v916_v22 }
 0x13b   : > { %6641 = vst [vmem:[#allocation31_spill] sm:$0xff] %v4630_v40  ;;  %v4634_v11 = vpop.xlane.xlu1 %808  ;;  %v3418_v42 = vpop.eup %3417  ;;  %v1146_v44 = vmul.f32 1.442695, %v917_v10  ;;  %v1338_v57 = vadd.f32 %v3416_v39, %v3414_v5  ;;  %v1152_v36 = vmul.f32 1.442695, %v920_v53  ;;  %v3647_v5 = vld [vmem:[%s3951_s5 + $0x358] sm:$0xff] }
 0x13c   : > { %6642 = vst [vmem:[#allocation32_spill] sm:$0xff] %v4634_v11  ;;  %v4636_v51 = vpop.xlane.xlu0 %805  ;;  %v1138_v32 = vmul.f32 1.442695, %v913_v18  ;;  %v3420_v34 = vpop.eup %3419  ;;  %3427 = vpow2.f32 %v1142_v47  ;;  %v3644_v18 = vld [vmem:[%s3951_s5 + $0x330] sm:$0xff] }
 0x13d   : > { %6643 = vst [vmem:[#allocation39_spill] sm:$0xff] %v4636_v51  ;;  %3429 = vpow2.f32 %v1136_v41  ;;  %v3422_v47 = vpop.eup %3421  ;;  %v3646_v41 = vld [vmem:[%s3951_s5 + $0x350] sm:$0xff] }
 0x13e   : > { %3431 = vpow2.f32 %v1138_v32  ;;  %v3424_v28 = vpop.eup %3423 }
 0x13f   : > { %1330 = vadd.xlane.f32.xlu2 %v1329_v21  ;;  %v918_v21 = vsub.f32 %v3644_v18, %v4582_v37  ;;  %v3426_v22 = vpop.eup %3425  ;;  %3433 = vpow2.f32 %v1144_v3  ;;  %v922_v18 = vsub.f32 %v3646_v41, %v4576_v48  ;;  %v3649_v3 = vld [vmem:[%s3951_s5 + $0x378] sm:$0xff] }
 0x140   : > { %1327 = vadd.xlane.f32.xlu1 %v1326_v2  ;;  %v921_v2 = vsub.f32 %v3643_v23, %v4580_v29  ;;  %v1332_v23 = vadd.f32 %v3412_v15, %v3410_v31  ;;  %v1335_v29 = vadd.f32 %v3420_v34, %v3418_v42  ;;  %3435 = vpow2.f32 %v1146_v44  ;;  %v3648_v42 = vld [vmem:[%s3951_s5 + $0x370] sm:$0xff] }
 0x141   : > { %1324 = vadd.xlane.f32.xlu0 %v1323_v30  ;;  %v3645_v30 = vld [vmem:[%s3951_s5 + $0x338] sm:$0xff]  ;;  %v1148_v10 = vmul.f32 1.442695, %v918_v21  ;;  %v923_v15 = vsub.f32 %v3647_v5, %v4576_v48  ;;  %3437 = vpow2.f32 %v1152_v36  ;;  %v926_v53 = vsub.f32 %v3648_v42, %v4598_v60 }
 0x142   : > { %v4648_v1 = vpop.xlane.xlu2 %1204  ;;  %v919_v19 = vsub.f32 %v3645_v30, %v4582_v37  ;;  %v1154_v49 = vmul.f32 1.442695, %v921_v2  ;;  %v3428_v32 = vpop.eup %3427  ;;  %v1156_v30 = vmul.f32 1.442695, %v922_v18 }
 0x143   : > { %v4652_v20 = vpop.xlane.xlu1 %1201  ;;  %v3430_v39 = vpop.eup %3429  ;;  %v1158_v36 = vmul.f32 1.442695, %v923_v15  ;;  %v1347_v5 = vadd.f32 %v3428_v32, %v3426_v22  ;;  %v1164_v42 = vmul.f32 1.442695, %v926_v53  ;;  %v3653_v22 = vld [vmem:[%s3951_s5 + $0x388] sm:$0xff] }
 0x144   : > { %v4654_v45 = vpop.xlane.xlu0 %814  ;;  %v1150_v31 = vmul.f32 1.442695, %v919_v19  ;;  %v3432_v2 = vpop.eup %3431  ;;  %3439 = vpow2.f32 %v1154_v49  ;;  %v3650_v19 = vld [vmem:[%s3951_s5 + $0x360] sm:$0xff] }
 0x145   : > { %6644 = vst [vmem:[#allocation40_spill] sm:$0xff] %v4654_v45  ;;  %3441 = vpow2.f32 %v1148_v10  ;;  %v3434_v49 = vpop.eup %3433  ;;  %v3652_v10 = vld [vmem:[%s3951_s5 + $0x380] sm:$0xff] }
 0x146   : > { %3443 = vpow2.f32 %v1150_v31  ;;  %v3436_v37 = vpop.eup %3435 }
 0x147   : > { %1339 = vadd.xlane.f32.xlu2 %v1338_v57  ;;  %v924_v57 = vsub.f32 %v3650_v19, %v4600_v4  ;;  %v3438_v18 = vpop.eup %3437  ;;  %3445 = vpow2.f32 %v1156_v30  ;;  %v928_v19 = vsub.f32 %v3652_v10, %v4594_v17  ;;  %v3655_v30 = vld [vmem:[%s3951_s5 + $0x3a8] sm:$0xff] }
 0x148   : > { %1336 = vadd.xlane.f32.xlu1 %v1335_v29  ;;  %v927_v29 = vsub.f32 %v3649_v3, %v4598_v60  ;;  %v1341_v3 = vadd.f32 %v3424_v28, %v3422_v47  ;;  %v1344_v60 = vadd.f32 %v3432_v2, %v3430_v39  ;;  %3447 = vpow2.f32 %v1158_v36  ;;  %v3654_v39 = vld [vmem:[%s3951_s5 + $0x3a0] sm:$0xff] }
 0x149   : > { %1333 = vadd.xlane.f32.xlu0 %v1332_v23  ;;  %v3651_v23 = vld [vmem:[%s3951_s5 + $0x368] sm:$0xff]  ;;  %v1160_v15 = vmul.f32 1.442695, %v924_v57  ;;  %v929_v28 = vsub.f32 %v3653_v22, %v4594_v17  ;;  %3449 = vpow2.f32 %v1164_v42  ;;  %v932_v53 = vsub.f32 %v3654_v39, %v4616_v9 }
 0x14a   : > { %v4666_v34 = vpop.xlane.xlu2 %1213  ;;  %v925_v41 = vsub.f32 %v3651_v23, %v4600_v4  ;;  %v1166_v48 = vmul.f32 1.442695, %v927_v29  ;;  %v3440_v31 = vpop.eup %3439  ;;  %v1168_v23 = vmul.f32 1.442695, %v928_v19 }
 0x14b   : > { %v4670_v21 = vpop.xlane.xlu1 %1210  ;;  %v3442_v32 = vpop.eup %3441  ;;  %v1170_v42 = vmul.f32 1.442695, %v929_v28  ;;  %v1356_v22 = vadd.f32 %v3440_v31, %v3438_v18  ;;  %v1176_v39 = vmul.f32 1.442695, %v932_v53  ;;  %v3659_v18 = vld [vmem:[%s3951_s5 + $0x3b8] sm:$0xff] }
 0x14c   : > { %v4672_v44 = vpop.xlane.xlu0 %1207  ;;  %v1162_v47 = vmul.f32 1.442695, %v925_v41  ;;  %v3444_v29 = vpop.eup %3443  ;;  %3451 = vpow2.f32 %v1166_v48  ;;  %v3656_v41 = vld [vmem:[%s3951_s5 + $0x390] sm:$0xff] }
 0x14d   : > { %3453 = vpow2.f32 %v1160_v15  ;;  %v3446_v48 = vpop.eup %3445  ;;  %v3658_v15 = vld [vmem:[%s3951_s5 + $0x3b0] sm:$0xff] }
 0x14e   : > { %3455 = vpow2.f32 %v1162_v47  ;;  %v3448_v4 = vpop.eup %3447 }
 0x14f   : > { %1348 = vadd.xlane.f32.xlu2 %v1347_v5  ;;  %v930_v5 = vsub.f32 %v3656_v41, %v4618_v14  ;;  %v3450_v19 = vpop.eup %3449  ;;  %3457 = vpow2.f32 %v1168_v23  ;;  %v934_v41 = vsub.f32 %v3658_v15, %v4612_v27  ;;  %v3661_v23 = vld [vmem:[%s3951_s5 + $0x3d8] sm:$0xff] }
 0x150   : > { %1345 = vadd.xlane.f32.xlu1 %v1344_v60  ;;  %v933_v60 = vsub.f32 %v3655_v30, %v4616_v9  ;;  %v1350_v30 = vadd.f32 %v3436_v37, %v3434_v49  ;;  %v1353_v9 = vadd.f32 %v3444_v29, %v3442_v32  ;;  %3459 = vpow2.f32 %v1170_v42  ;;  %v3660_v32 = vld [vmem:[%s3951_s5 + $0x3d0] sm:$0xff] }
 0x151   : > { %1342 = vadd.xlane.f32.xlu0 %v1341_v3  ;;  %v3657_v3 = vld [vmem:[%s3951_s5 + $0x398] sm:$0xff]  ;;  %v1172_v28 = vmul.f32 1.442695, %v930_v5  ;;  %v935_v37 = vsub.f32 %v3659_v18, %v4612_v27  ;;  %3461 = vpow2.f32 %v1176_v39  ;;  %v938_v53 = vsub.f32 %v3660_v32, %v4634_v11 }
 0x152   : > { %v4684_v2 = vpop.xlane.xlu2 %1222  ;;  %v931_v10 = vsub.f32 %v3657_v3, %v4618_v14  ;;  %v1178_v17 = vmul.f32 1.442695, %v933_v60  ;;  %v3452_v47 = vpop.eup %3451  ;;  %v1180_v3 = vmul.f32 1.442695, %v934_v41 }
 0x153   : > { %v4688_v57 = vpop.xlane.xlu1 %1219  ;;  %v3454_v31 = vpop.eup %3453  ;;  %v1182_v39 = vmul.f32 1.442695, %v935_v37  ;;  %v1365_v15 = vadd.f32 %v3452_v47, %v3450_v19  ;;  %v1188_v32 = vmul.f32 1.442695, %v938_v53  ;;  %v3665_v53 = vld [vmem:[%s3951_s5 + $0x3e8] sm:$0xff] }
 0x154   : > { %v4690_v36 = vpop.xlane.xlu0 %1216  ;;  %v1174_v49 = vmul.f32 1.442695, %v931_v10  ;;  %v3456_v60 = vpop.eup %3455  ;;  %3463 = vpow2.f32 %v1178_v17  ;;  %v3662_v10 = vld [vmem:[%s3951_s5 + $0x3c0] sm:$0xff] }
 0x155   : > { %3465 = vpow2.f32 %v1172_v28  ;;  %v3458_v18 = vpop.eup %3457 }
 0x156   : > { %3467 = vpow2.f32 %v1174_v49  ;;  %v3460_v14 = vpop.eup %3459 }
 0x157   : > { %1357 = vadd.xlane.f32.xlu2 %v1356_v22  ;;  %v936_v22 = vsub.f32 %v3662_v10, %v4636_v51  ;;  %v3462_v28 = vpop.eup %3461  ;;  %3469 = vpow2.f32 %v1180_v3  ;;  %v3666_v3 = vld [vmem:[%s3951_s5 + $0x3f0] sm:$0xff] }
 0x158   : > { %1354 = vadd.xlane.f32.xlu1 %v1353_v9  ;;  %v939_v9 = vsub.f32 %v3661_v23, %v4634_v11  ;;  %v1359_v23 = vadd.f32 %v3448_v4, %v3446_v48  ;;  %v1362_v11 = vadd.f32 %v3456_v60, %v3454_v31  ;;  %3471 = vpow2.f32 %v1182_v39  ;;  %v3664_v4 = vld [vmem:[%s3951_s5 + $0x3e0] sm:$0xff]  ;;  %v3667_v39 = vld [vmem:[%s3951_s5 + $0x3f8] sm:$0xff] }
 0x159   : > { %1351 = vadd.xlane.f32.xlu0 %v1350_v30  ;;  %v3663_v30 = vld [vmem:[%s3951_s5 + $0x3c8] sm:$0xff]  ;;  %v1184_v10 = vmul.f32 1.442695, %v936_v22  ;;  %v940_v48 = vsub.f32 %v3664_v4, %v4630_v40  ;;  %3473 = vpow2.f32 %v1188_v32  ;;  %v942_v22 = vsub.f32 %v3666_v3, %v4654_v45 }
 0x15a   : > { %v4702_v29 = vpop.xlane.xlu2 %1231  ;;  %v937_v17 = vsub.f32 %v3663_v30, %v4636_v51  ;;  %v1190_v41 = vmul.f32 1.442695, %v939_v9  ;;  %v3464_v37 = vpop.eup %3463  ;;  %v943_v30 = vsub.f32 %v3667_v39, %v4654_v45  ;;  %v435_v45 = vld [vmem:[%s4756_s17 + $0x18] sm:$0xff]  ;;  %v434_v51 = vld [vmem:[%s4756_s17 + $0x10] sm:$0xff] }
 0x15b   : > { %v4706_v5 = vpop.xlane.xlu1 %1228  ;;  %v3466_v47 = vpop.eup %3465  ;;  %v1192_v32 = vmul.f32 1.442695, %v940_v48  ;;  %v1196_v3 = vmul.f32 1.442695, %v942_v22 }
 0x15c   : > { %v4708_v42 = vpop.xlane.xlu0 %1225  ;;  %v1186_v19 = vmul.f32 1.442695, %v937_v17  ;;  %v3468_v31 = vpop.eup %3467  ;;  %3475 = vpow2.f32 %v1190_v41  ;;  %v1374_v17 = vadd.f32 %v3464_v37, %v3462_v28  ;;  %v1198_v28 = vmul.f32 1.442695, %v943_v30 }
 0x15d   : > { %3477 = vpow2.f32 %v1184_v10  ;;  %v1371_v4 = vadd.f32 %v3468_v31, %v3466_v47  ;;  %v3878_v37 = vmov 0  }
 0x15e   : > { %3479 = vpow2.f32 %v1186_v19  ;;  %3230 = vset.pattern.permute.xlu2 %v3878_v37  ;;  %3231 = vset.pattern.permute.xlu0 %v3878_v37 }
 0x15f   : > { %1366 = vadd.xlane.f32.xlu2 %v1365_v15  ;;  %v3470_v15 = vpop.eup %3469  ;;  %3481 = vpow2.f32 %v1192_v32  ;;  %3232 = vset.pattern.permute.xlu1 %v3878_v37  ;;  %v433_v37 = vld [vmem:[%s4756_s17 + $0x8] sm:$0xff] }
 0x160   : > { %1363 = vadd.xlane.f32.xlu1 %v1362_v11  ;;  %v941_v11 = vsub.f32 %v3665_v53, %v4630_v40  ;;  %v3472_v41 = vpop.eup %3471 }
 0x161   : > { %1360 = vadd.xlane.f32.xlu0 %v1359_v23  ;;  %v1368_v23 = vadd.f32 %v3460_v14, %v3458_v18  ;;  %v3474_v10 = vpop.eup %3473  ;;  %v1377_v22 = vadd.f32 %v3472_v41, %v3470_v15  ;;  %v432_v41 = vld [vmem:[%s4756_s17] sm:$0xff] }
 0x162   : > { %v4722_v49 = vpop.xlane.xlu2 %1240  ;;  %v1194_v53 = vmul.f32 1.442695, %v941_v11  ;;  %v3476_v19 = vpop.eup %3475 }
 0x163   : > { %v4726_v60 = vpop.xlane.xlu1 %1237  ;;  %v3478_v14 = vpop.eup %3477  ;;  %v1383_v11 = vadd.f32 %v3476_v19, %v3474_v10  ;;  %v496_v19 = vmul.f32 255.0, %v432_v41  ;;  %v498_v41 = vmul.f32 255.0, %v434_v51 }
 0x164   : > { %v4728_v9 = vpop.xlane.xlu0 %1234  ;;  %v3480_v47 = vpop.eup %3479  ;;  %3483 = vpow2.f32 %v1194_v53 }
 0x165   : > { %3485 = vpow2.f32 %v1196_v3  ;;  %v1380_v39 = vadd.f32 %v3480_v47, %v3478_v14  ;;  %v3482_v30 = vpop.eup %3481  ;;  %vm2851_vm0 = vcmp.lt.s32.totalorder %v496_v19, 0  ;;  %v2863_v12 = vfloor.f32 %v498_v41 }
 0x166   : > { %3487 = vpow2.f32 %v1198_v28  ;;  %vm2861_vm3 = vcmp.lt.s32.totalorder %v498_v41, 0 }
 0x167   : > { %1375 = vadd.xlane.f32.xlu2 %v1374_v17  ;;  %3489 = vlog2.f32 %v4652_v20  ;;  %v3730_v20 = vld [vmem:[%s3951_s5 + $0x1c0] sm:$0xff] }
 0x168   : > { %1372 = vadd.xlane.f32.xlu1 %v1371_v4  ;;  %3491 = vlog2.f32 %v4648_v1 }
 0x169   : > { %1369 = vadd.xlane.f32.xlu0 %v1368_v23  ;;  %3493 = vlog2.f32 %v4666_v34 }
 0x16a   : > { %v4741_v18 = vpop.xlane.xlu2 %1249  ;;  %v3484_v17 = vpop.eup %3483  ;;  %3495 = vlog2.f32 %v4670_v21 }
 0x16b   : > { %v4743_v48 = vpop.xlane.xlu1 %1246  ;;  %v3486_v32 = vpop.eup %3485  ;;  %v1386_v10 = vadd.f32 %v3484_v17, %v3482_v30  ;;  %v499_v30 = vmul.f32 255.0, %v435_v45  ;;  %v436_v45 = vld [vmem:[%s4756_s17 + $0x20] sm:$0xff]  ;;  %3497 = vlog2.f32 %v4672_v44 }
 0x16c   : > { %v4745_v31 = vpop.xlane.xlu0 %1243  ;;  %v3488_v4 = vpop.eup %3487  ;;  %v500_v6 = vmul.f32 255.0, %v436_v45  ;;  %3499 = vlog2.f32 %v4684_v2  ;;  %v3734_v2 = vld [vmem:[%s3951_s5 + $0x260] sm:$0xff] }
 0x16d   : > { %v1389_v3 = vadd.f32 %v3488_v4, %v3486_v32  ;;  %vm2866_vm2 = vcmp.lt.s32.totalorder %v499_v30, 0  ;;  %v3490_v21 = vpop.eup %3489  ;;  %3501 = vlog2.f32 %v4688_v57  ;;  %v3736_v57 = vld [vmem:[%s3951_s5 + $0x1f0] sm:$0xff] }
 0x16e   : > { %vm2871_vm5 = vcmp.lt.s32.totalorder %v500_v6, 0  ;;  %3503 = vlog2.f32 %v4690_v36 }
 0x16f   : > { %1384 = vadd.xlane.f32.xlu2 %v1383_v11  ;;  %v2852_v11 = vceil.f32 %v496_v19  ;;  %3505 = vlog2.f32 %v4702_v29 }
 0x170   : > { %1381 = vadd.xlane.f32.xlu1 %v1380_v39  ;;  %v497_v39 = vmul.f32 255.0, %v433_v37  ;;  %v2868_v37 = vfloor.f32 %v499_v30  ;;  %3507 = vlog2.f32 %v4706_v5 }
 0x171   : > { %1378 = vadd.xlane.f32.xlu0 %v1377_v22  ;;  %v2853_v22 = vfloor.f32 %v496_v19  ;;  %v2867_v19 = vceil.f32 %v499_v30  ;;  %v443_v30 = vld [vmem:[%s4756_s17 + $0x58] sm:$0xff]  ;;  %3509 = vlog2.f32 %v4708_v42 }
 0x172   : > { %v4751_v23 = vpop.xlane.xlu2 %1258  ;;  %v2857_v17 = vceil.f32 %v497_v39  ;;  %v2858_v32 = vfloor.f32 %v497_v39  ;;  %vm2856_vm1 = vcmp.lt.s32.totalorder %v497_v39, 0  ;;  %v437_v39 = vld [vmem:[%s4756_s17 + $0x28] sm:$0xff]  ;;  %v507_v45 = vmul.f32 255.0, %v443_v30 }
 0x173   : > { %6646 = vst [vmem:[#allocation41_spill] sm:$0xff] %v4751_v23  ;;  %v4758_v53 = vpop.xlane.xlu1 %1255  ;;  %v2854_v40 = vsel %vm2851_vm0, %v2852_v11, %v2853_v22  ;;  %v2862_v22 = vceil.f32 %v498_v41  ;;  %v2869_v51 = vsel %vm2866_vm2, %v2867_v19, %v2868_v37  ;;  %v2872_v41 = vceil.f32 %v500_v6  ;;  %v3671_v23 = vld [vmem:[%s3951_s5 + $0x58] sm:$0xff] }
 0x174   : > { %6647 = vst [vmem:[#allocation42_spill] sm:$0xff] %v4758_v53  ;;  %v4760_v15 = vpop.xlane.xlu0 %1252  ;;  %v2855_v50 = vcvt.f32.s32 %v2854_v40  ;;  %v2859_v38 = vsel %vm2856_vm1, %v2857_v17, %v2858_v32  ;;  %v501_v17 = vmul.f32 255.0, %v437_v39  ;;  %vm2906_vm7 = vcmp.lt.s32.totalorder %v507_v45, 0 }
 0x175   : > { %6648 = vst [vmem:[#allocation37_spill] sm:$0xff] %v4760_v15  ;;  %v2864_v40 = vsel %vm2861_vm3, %v2862_v22, %v2863_v12  ;;  %3511 = vlog2.f32 %v4722_v49 }
 0x176   : > { %v2865_v19 = vcvt.f32.s32 %v2864_v40  ;;  %v2878_v12 = vfloor.f32 %v501_v17  ;;  %vm2876_vm6 = vcmp.lt.s32.totalorder %v501_v17, 0  ;;  %3513 = vlog2.f32 %v4726_v60 }
 0x177   : > { %3515 = vlog2.f32 %v4728_v9 }
 0x178   : > { %1390 = vadd.xlane.f32.xlu1 %v1389_v3  ;;  %3517 = vlog2.f32 %v4741_v18 }
 0x179   : > { %1387 = vadd.xlane.f32.xlu0 %v1386_v10  ;;  %v440_v10 = vld [vmem:[%s4756_s17 + $0x40] sm:$0xff]  ;;  %3519 = vlog2.f32 %v4743_v48 }
 0x17a   : > { %v4763_v28 = vpop.xlane.xlu2 %1267  ;;  %v504_v11 = vmul.f32 255.0, %v440_v10  ;;  %3521 = vlog2.f32 %v4745_v31  ;;  %v3747_v31 = vld [vmem:[%s3951_s5 + $0x2c8] sm:$0xff] }
 0x17b   : > { %6649 = vst [vmem:[#allocation38_spill] sm:$0xff] %v4763_v28  ;;  %v4766_v14 = vpop.xlane.xlu1 %1264 }
 0x17c   : > { %6650 = vst [vmem:[#allocation43_spill] sm:$0xff] %v4766_v14  ;;  %v4768_v47 = vpop.xlane.xlu0 %1261  ;;  %v2892_v13 = vceil.f32 %v504_v11  ;;  %vm2891_vm4 = vcmp.lt.s32.totalorder %v504_v11, 0  ;;  %v2907_v14 = vceil.f32 %v507_v45 }
 0x17d   : > { %6651 = vst [vmem:[#allocation44_spill] sm:$0xff] %v4768_v47 }
 0x182   : > { %v4772_v4 = vpop.xlane.xlu2 %1276 }
 0x183   : > { %6652 = vst [vmem:[#allocation45_spill] sm:$0xff] %v4772_v4  ;;  %v4775_v3 = vpop.xlane.xlu1 %1273  ;;  %v2860_v4 = vcvt.f32.s32 %v2859_v38  ;;  %v2873_v38 = vfloor.f32 %v500_v6 }
 0x184   : > { %6653 = vst [vmem:[#allocation46_spill] sm:$0xff] %v4775_v3  ;;  %v4777_v27 = vpop.xlane.xlu0 %1270  ;;  %v2893_v3 = vfloor.f32 %v504_v11  ;;  %v439_v11 = vld [vmem:[%s4756_s17 + $0x38] sm:$0xff] }
 0x185   : > { %6654 = vst [vmem:[#allocation47_spill] sm:$0xff] %v4777_v27  ;;  %v2874_v39 = vsel %vm2871_vm5, %v2872_v41, %v2873_v38  ;;  %v503_v6 = vmul.f32 255.0, %v439_v11 }
 0x186   : > { %v2894_v37 = vsel %vm2891_vm4, %v2892_v13, %v2893_v3  ;;  %v446_v13 = vld [vmem:[%s4756_s17 + $0x70] sm:$0xff] }
 0x187   : > { %1588 = vperm.xlu2 %3230, %v2855_v50   ;;  %v2870_v50 = vcvt.f32.s32 %v2869_v51  ;;  %v2895_v22 = vcvt.f32.s32 %v2894_v37  ;;  %v2908_v51 = vfloor.f32 %v507_v45  ;;  %v441_v37 = vld [vmem:[%s4756_s17 + $0x48] sm:$0xff]  ;;  %vm2886_vm9 = vcmp.lt.s32.totalorder %v503_v6, 0  ;;  %v442_v45 = vld [vmem:[%s4756_s17 + $0x50] sm:$0xff] }
 0x189   : > { %v2909_v38 = vsel %vm2906_vm7, %v2907_v14, %v2908_v51  ;;  %v506_v14 = vmul.f32 255.0, %v442_v45 }
 0x18a   : > { %v4781_v56 = vpop.xlane.xlu2 %1285 }
 0x18b   : > { %6655 = vst [vmem:[#allocation73_spill] sm:$0xff] %v4781_v56  ;;  %v4784_v32 = vpop.xlane.xlu1 %1282  ;;  %v2877_v56 = vceil.f32 %v501_v17  ;;  %v2875_v17 = vcvt.f32.s32 %v2874_v39  ;;  %vm2901_vm12 = vcmp.lt.s32.totalorder %v506_v14, 0 }
 0x18c   : > { %6656 = vst [vmem:[#allocation74_spill] sm:$0xff] %v4784_v32  ;;  %v4786_v10 = vpop.xlane.xlu0 %1279  ;;  %v502_v32 = vmul.f32 255.0, %v438_v26 }
 0x18d   : > { %6657 = vst [vmem:[#allocation75_spill] sm:$0xff] %v4786_v10  ;;  %1591 = vperm.xlu0 %3231, %v2860_v4   ;;  %v2879_v40 = vsel %vm2876_vm6, %v2877_v56, %v2878_v12  ;;  %v2888_v56 = vfloor.f32 %v503_v6  ;;  %v2910_v12 = vcvt.f32.s32 %v2909_v38 }
 0x18e   : > { %v2883_v41 = vfloor.f32 %v502_v32  ;;  %v2880_v26 = vcvt.f32.s32 %v2879_v40  ;;  %vm2881_vm8 = vcmp.lt.s32.totalorder %v502_v32, 0 }
 0x18f   : > { %1597 = vperm.xlu2 %3230, %v2870_v50   ;;  %v2882_v50 = vceil.f32 %v502_v32  ;;  %v449_v32 = vld [vmem:[%s4756_s17 + $0x88] sm:$0xff] }
 0x190   : > { %v513_v38 = vmul.f32 255.0, %v449_v32 }
 0x191   : > { %1594 = vperm.xlu1 %3232, %v2865_v19   ;;  %v510_v19 = vmul.f32 255.0, %v446_v13  ;;  %v2884_v11 = vsel %vm2881_vm8, %v2882_v50, %v2883_v41 }
 0x192   : > { %v4790_v4 = vpop.xlane.xlu2 %1294  ;;  %vm2936_vm13 = vcmp.lt.s32.totalorder %v513_v38, 0 }
 0x193   : > { %6658 = vst [vmem:[#allocation76_spill] sm:$0xff] %v4790_v4  ;;  %v4793_v3 = vpop.xlane.xlu1 %1291  ;;  %v2887_v4 = vceil.f32 %v503_v6  ;;  %v2923_v39 = vfloor.f32 %v510_v19  ;;  %vm2921_vm10 = vcmp.lt.s32.totalorder %v510_v19, 0  ;;  %v2885_v6 = vcvt.f32.s32 %v2884_v11 }
 0x194   : > { %6659 = vst [vmem:[#allocation77_spill] sm:$0xff] %v4793_v3  ;;  %v4795_v30 = vpop.xlane.xlu0 %1288  ;;  %v505_v3 = vmul.f32 255.0, %v441_v37  ;;  %v444_v37 = vld [vmem:[%s4756_s17 + $0x60] sm:$0xff]  ;;  %v2938_v11 = vfloor.f32 %v513_v38 }
 0x195   : > { %6660 = vst [vmem:[#allocation78_spill] sm:$0xff] %v4795_v30  ;;  %1612 = vperm.xlu0 %3231, %v2895_v22   ;;  %v2922_v30 = vceil.f32 %v510_v19  ;;  %v2889_v40 = vsel %vm2886_vm9, %v2887_v4, %v2888_v56  ;;  %v2903_v4 = vfloor.f32 %v506_v14  ;;  %v445_v19 = vld [vmem:[%s4756_s17 + $0x68] sm:$0xff] }
 0x196   : > { %v2898_v50 = vfloor.f32 %v505_v3  ;;  %v2890_v41 = vcvt.f32.s32 %v2889_v40  ;;  %vm2896_vm11 = vcmp.lt.s32.totalorder %v505_v3, 0 }
 0x197   : > { %1600 = vperm.xlu2 %3230, %v2875_v17   ;;  %v2897_v17 = vceil.f32 %v505_v3  ;;  %v509_v3 = vmul.f32 255.0, %v445_v19 }
 0x199   : > { %1603 = vperm.xlu1 %3232, %v2880_v26   ;;  %v2924_v26 = vsel %vm2921_vm10, %v2922_v30, %v2923_v39  ;;  %v2899_v45 = vsel %vm2896_vm11, %v2897_v17, %v2898_v50  ;;  %v452_v30 = vld [vmem:[%s4756_s17 + $0xa0] sm:$0xff]  ;;  %vm2916_vm15 = vcmp.lt.s32.totalorder %v509_v3, 0 }
 0x19a   : > { %v4799_v22 = vpop.xlane.xlu2 %1303  ;;  %v2925_v56 = vcvt.f32.s32 %v2924_v26  ;;  %v516_v26 = vmul.f32 255.0, %v452_v30 }
 0x19b   : > { %6661 = vst [vmem:[#allocation79_spill] sm:$0xff] %v4799_v22  ;;  %v4802_v51 = vpop.xlane.xlu1 %1300  ;;  %v2902_v22 = vceil.f32 %v506_v14  ;;  %v2900_v14 = vcvt.f32.s32 %v2899_v45 }
 0x19c   : > { %6662 = vst [vmem:[#allocation80_spill] sm:$0xff] %v4802_v51  ;;  %v4804_v13 = vpop.xlane.xlu0 %1297  ;;  %v508_v51 = vmul.f32 255.0, %v444_v37  ;;  %v447_v37 = vld [vmem:[%s4756_s17 + $0x78] sm:$0xff]  ;;  %v2953_v45 = vfloor.f32 %v516_v26  ;;  %vm2951_vm0 = vcmp.lt.s32.totalorder %v516_v26, 0 }
 0x19d   : > { %6663 = vst [vmem:[#allocation81_spill] sm:$0xff] %v4804_v13  ;;  %1621 = vperm.xlu0 %3231, %v2910_v12   ;;  %v2937_v13 = vceil.f32 %v513_v38  ;;  %v2904_v40 = vsel %vm2901_vm12, %v2902_v22, %v2903_v4  ;;  %v2918_v22 = vfloor.f32 %v509_v3  ;;  %v448_v38 = vld [vmem:[%s4756_s17 + $0x80] sm:$0xff] }
 0x19e   : > { %v2913_v17 = vfloor.f32 %v508_v51  ;;  %v2905_v50 = vcvt.f32.s32 %v2904_v40  ;;  %vm2911_vm14 = vcmp.lt.s32.totalorder %v508_v51, 0 }
 0x19f   : > { %1606 = vperm.xlu2 %3230, %v2885_v6   ;;  %v2912_v6 = vceil.f32 %v508_v51  ;;  %v512_v51 = vmul.f32 255.0, %v448_v38 }
 0x1a1   : > { %1609 = vperm.xlu1 %3232, %v2890_v41   ;;  %v2939_v41 = vsel %vm2936_vm13, %v2937_v13, %v2938_v11  ;;  %v2914_v19 = vsel %vm2911_vm14, %v2912_v6, %v2913_v17  ;;  %v455_v13 = vld [vmem:[%s4756_s17 + $0xb8] sm:$0xff]  ;;  %vm2931_vm2 = vcmp.lt.s32.totalorder %v512_v51, 0 }
 0x1a2   : > { %v4808_v12 = vpop.xlane.xlu2 %1312  ;;  %v2940_v4 = vcvt.f32.s32 %v2939_v41  ;;  %v519_v41 = vmul.f32 255.0, %v455_v13 }
 0x1a3   : > { %6664 = vst [vmem:[#allocation82_spill] sm:$0xff] %v4808_v12  ;;  %v4811_v39 = vpop.xlane.xlu1 %1309  ;;  %v2917_v12 = vceil.f32 %v509_v3  ;;  %v2915_v3 = vcvt.f32.s32 %v2914_v19 }
 0x1a4   : > { %6665 = vst [vmem:[#allocation83_spill] sm:$0xff] %v4811_v39  ;;  %v4813_v32 = vpop.xlane.xlu0 %1306  ;;  %v511_v39 = vmul.f32 255.0, %v447_v37  ;;  %v450_v37 = vld [vmem:[%s4756_s17 + $0x90] sm:$0xff]  ;;  %v2968_v19 = vfloor.f32 %v519_v41  ;;  %vm2966_vm3 = vcmp.lt.s32.totalorder %v519_v41, 0 }
 0x1a5   : > { %6666 = vst [vmem:[#allocation84_spill] sm:$0xff] %v4813_v32  ;;  %1630 = vperm.xlu0 %3231, %v2925_v56   ;;  %v2952_v32 = vceil.f32 %v516_v26  ;;  %v2919_v40 = vsel %vm2916_vm15, %v2917_v12, %v2918_v22  ;;  %v2933_v12 = vfloor.f32 %v512_v51  ;;  %v451_v26 = vld [vmem:[%s4756_s17 + $0x98] sm:$0xff] }
 0x1a6   : > { %v2928_v6 = vfloor.f32 %v511_v39  ;;  %v2920_v17 = vcvt.f32.s32 %v2919_v40  ;;  %vm2926_vm1 = vcmp.lt.s32.totalorder %v511_v39, 0 }
 0x1a7   : > { %1615 = vperm.xlu2 %3230, %v2900_v14   ;;  %v2927_v14 = vceil.f32 %v511_v39  ;;  %v515_v39 = vmul.f32 255.0, %v451_v26 }
 0x1a9   : > { %1618 = vperm.xlu1 %3232, %v2905_v50   ;;  %v2954_v50 = vsel %vm2951_vm0, %v2952_v32, %v2953_v45  ;;  %v2929_v38 = vsel %vm2926_vm1, %v2927_v14, %v2928_v6  ;;  %v458_v32 = vld [vmem:[%s4756_s17 + $0xd0] sm:$0xff]  ;;  %vm2946_vm5 = vcmp.lt.s32.totalorder %v515_v39, 0 }
 0x1aa   : > { %v4817_v56 = vpop.xlane.xlu2 %1321  ;;  %v2955_v22 = vcvt.f32.s32 %v2954_v50  ;;  %v2930_v13 = vcvt.f32.s32 %v2929_v38 }
 0x1ab   : > { %6667 = vst [vmem:[#allocation85_spill] sm:$0xff] %v4817_v56  ;;  %v4820_v11 = vpop.xlane.xlu1 %1318  ;;  %v2932_v56 = vceil.f32 %v512_v51 }
 0x1ac   : > { %6668 = vst [vmem:[#allocation86_spill] sm:$0xff] %v4820_v11  ;;  %v4822_v30 = vpop.xlane.xlu0 %1315  ;;  %v514_v11 = vmul.f32 255.0, %v450_v37  ;;  %v453_v37 = vld [vmem:[%s4756_s17 + $0xa8] sm:$0xff] }
 0x1ad   : > { %6669 = vst [vmem:[#allocation87_spill] sm:$0xff] %v4822_v30  ;;  %1639 = vperm.xlu0 %3231, %v2940_v4   ;;  %v2967_v30 = vceil.f32 %v519_v41  ;;  %v2934_v40 = vsel %vm2931_vm2, %v2932_v56, %v2933_v12  ;;  %v2948_v56 = vfloor.f32 %v515_v39  ;;  %v454_v41 = vld [vmem:[%s4756_s17 + $0xb0] sm:$0xff] }
 0x1ae   : > { %v2942_v51 = vceil.f32 %v514_v11  ;;  %v2935_v14 = vcvt.f32.s32 %v2934_v40  ;;  %vm2941_vm4 = vcmp.lt.s32.totalorder %v514_v11, 0 }
 0x1af   : > { %1624 = vperm.xlu2 %3230, %v2915_v3   ;;  %v2943_v3 = vfloor.f32 %v514_v11  ;;  %v2969_v6 = vsel %vm2966_vm3, %v2967_v30, %v2968_v19  ;;  %v518_v11 = vmul.f32 255.0, %v454_v41  ;;  %v461_v30 = vld [vmem:[%s4756_s17 + $0xe8] sm:$0xff] }
 0x1b0   : > { %v2970_v12 = vcvt.f32.s32 %v2969_v6 }
 0x1b1   : > { %1627 = vperm.xlu1 %3232, %v2920_v17   ;;  %v522_v17 = vmul.f32 255.0, %v458_v32  ;;  %v2944_v26 = vsel %vm2941_vm4, %v2942_v51, %v2943_v3  ;;  %v525_v3 = vmul.f32 255.0, %v461_v30  ;;  %vm2961_vm8 = vcmp.lt.s32.totalorder %v518_v11, 0 }
 0x1b2   : > { %v4826_v4 = vpop.xlane.xlu2 %1330  ;;  %v2945_v32 = vcvt.f32.s32 %v2944_v26 }
 0x1b3   : > { %6670 = vst [vmem:[#allocation88_spill] sm:$0xff] %v4826_v4  ;;  %v4831_v50 = vpop.xlane.xlu1 %1327  ;;  %v2947_v4 = vceil.f32 %v515_v39  ;;  %v2983_v38 = vfloor.f32 %v522_v17  ;;  %vm2981_vm6 = vcmp.lt.s32.totalorder %v522_v17, 0  ;;  %v2998_v26 = vfloor.f32 %v525_v3 }
 0x1b4   : > { %v4829_v45 = vpop.xlane.xlu0 %1324  ;;  %6672 = vst [vmem:[#allocation90_spill] sm:$0xff] %v4831_v50  ;;  %v2963_v50 = vfloor.f32 %v518_v11  ;;  %vm2996_vm9 = vcmp.lt.s32.totalorder %v525_v3, 0 }
 0x1b5   : > { %6671 = vst [vmem:[#allocation89_spill] sm:$0xff] %v4829_v45  ;;  %1648 = vperm.xlu0 %3231, %v2955_v22   ;;  %v517_v45 = vmul.f32 255.0, %v453_v37  ;;  %v2982_v22 = vceil.f32 %v522_v17  ;;  %v2949_v40 = vsel %vm2946_vm5, %v2947_v4, %v2948_v56  ;;  %v2962_v37 = vceil.f32 %v518_v11  ;;  %v457_v4 = vld [vmem:[%s4756_s17 + $0xc8] sm:$0xff] }
 0x1b6   : > { %v2950_v6 = vcvt.f32.s32 %v2949_v40 }
 0x1b7   : > { %1633 = vperm.xlu2 %3230, %v2930_v13   ;;  %v2957_v39 = vceil.f32 %v517_v45  ;;  %v2958_v13 = vfloor.f32 %v517_v45  ;;  %v2984_v51 = vsel %vm2981_vm6, %v2982_v22, %v2983_v38  ;;  %vm2956_vm7 = vcmp.lt.s32.totalorder %v517_v45, 0  ;;  %v464_v38 = vld [vmem:[%s4756_s17 + $0x100] sm:$0xff] }
 0x1b8   : > { %v2985_v17 = vcvt.f32.s32 %v2984_v51  ;;  %v2964_v45 = vsel %vm2961_vm8, %v2962_v37, %v2963_v50  ;;  %v521_v22 = vmul.f32 255.0, %v457_v4  ;;  %v460_v50 = vld [vmem:[%s4756_s17 + $0xe0] sm:$0xff] }
 0x1b9   : > { %1636 = vperm.xlu1 %3232, %v2935_v14   ;;  %v456_v14 = vld [vmem:[%s4756_s17 + $0xc0] sm:$0xff]  ;;  %v2959_v56 = vsel %vm2956_vm7, %v2957_v39, %v2958_v13  ;;  %v2965_v51 = vcvt.f32.s32 %v2964_v45  ;;  %v528_v13 = vmul.f32 255.0, %v464_v38 }
 0x1ba   : > { %v4835_v10 = vpop.xlane.xlu2 %1339  ;;  %v520_v41 = vmul.f32 255.0, %v456_v14  ;;  %v2960_v30 = vcvt.f32.s32 %v2959_v56  ;;  %v2977_v14 = vceil.f32 %v521_v22  ;;  %vm2976_vm11 = vcmp.lt.s32.totalorder %v521_v22, 0 }
 0x1bb   : > { %6673 = vst [vmem:[#allocation91_spill] sm:$0xff] %v4835_v10  ;;  %v4841_v10 = vpop.xlane.xlu1 %1336  ;;  %vm3011_vm12 = vcmp.lt.s32.totalorder %v528_v13, 0 }
 0x1bc   : > { %v4838_v19 = vpop.xlane.xlu0 %1333  ;;  %6675 = vst [vmem:[#allocation93_spill] sm:$0xff] %v4841_v10  ;;  %v2972_v11 = vceil.f32 %v520_v41  ;;  %vm2971_vm10 = vcmp.lt.s32.totalorder %v520_v41, 0  ;;  %v2978_v10 = vfloor.f32 %v521_v22 }
 0x1bd   : > { %6674 = vst [vmem:[#allocation92_spill] sm:$0xff] %v4838_v19  ;;  %1657 = vperm.xlu0 %3231, %v2970_v12   ;;  %v2997_v12 = vceil.f32 %v525_v3 }
 0x1bf   : > { %1642 = vperm.xlu2 %3230, %v2945_v32   ;;  %v2973_v32 = vfloor.f32 %v520_v41  ;;  %v2999_v39 = vsel %vm2996_vm9, %v2997_v12, %v2998_v26  ;;  %v2979_v41 = vsel %vm2976_vm11, %v2977_v14, %v2978_v10  ;;  %v524_v12 = vmul.f32 255.0, %v460_v50  ;;  %v467_v26 = vld [vmem:[%s4756_s17 + $0x118] sm:$0xff] }
 0x1c0   : > { %v3000_v3 = vcvt.f32.s32 %v2999_v39  ;;  %v2980_v39 = vcvt.f32.s32 %v2979_v41  ;;  %v463_v10 = vld [vmem:[%s4756_s17 + $0xf8] sm:$0xff] }
 0x1c1   : > { %1645 = vperm.xlu1 %3232, %v2950_v6   ;;  %v459_v6 = vld [vmem:[%s4756_s17 + $0xd8] sm:$0xff]  ;;  %v2974_v37 = vsel %vm2971_vm10, %v2972_v11, %v2973_v32  ;;  %v531_v32 = vmul.f32 255.0, %v467_v26  ;;  %vm2991_vm14 = vcmp.lt.s32.totalorder %v524_v12, 0 }
 0x1c2   : > { %v4844_v40 = vpop.xlane.xlu2 %1348  ;;  %v523_v4 = vmul.f32 255.0, %v459_v6  ;;  %v2975_v38 = vcvt.f32.s32 %v2974_v37  ;;  %v462_v6 = vld [vmem:[%s4756_s17 + $0xf0] sm:$0xff] }
 0x1c3   : > { %6676 = vst [vmem:[#allocation94_spill] sm:$0xff] %v4844_v40  ;;  %v4851_v56 = vpop.xlane.xlu1 %1345  ;;  %v3013_v40 = vfloor.f32 %v528_v13  ;;  %v526_v50 = vmul.f32 255.0, %v462_v6  ;;  %v3028_v37 = vfloor.f32 %v531_v32  ;;  %vm3026_vm15 = vcmp.lt.s32.totalorder %v531_v32, 0 }
 0x1c4   : > { %v4847_v19 = vpop.xlane.xlu0 %1342  ;;  %6678 = vst [vmem:[#allocation96_spill] sm:$0xff] %v4851_v56  ;;  %v2987_v22 = vceil.f32 %v523_v4  ;;  %vm2986_vm13 = vcmp.lt.s32.totalorder %v523_v4, 0  ;;  %v2992_v56 = vceil.f32 %v524_v12 }
 0x1c5   : > { %6677 = vst [vmem:[#allocation95_spill] sm:$0xff] %v4847_v19  ;;  %1666 = vperm.xlu0 %3231, %v2985_v17   ;;  %v3012_v17 = vceil.f32 %v528_v13  ;;  %v2993_v19 = vfloor.f32 %v524_v12  ;;  %v3002_v12 = vceil.f32 %v526_v50  ;;  %vm3001_vm0 = vcmp.lt.s32.totalorder %v526_v50, 0 }
 0x1c7   : > { %1651 = vperm.xlu2 %3230, %v2960_v30   ;;  %v2988_v30 = vfloor.f32 %v523_v4  ;;  %v3014_v11 = vsel %vm3011_vm12, %v3012_v17, %v3013_v40  ;;  %v2994_v40 = vsel %vm2991_vm14, %v2992_v56, %v2993_v19  ;;  %v527_v4 = vmul.f32 255.0, %v463_v10  ;;  %v470_v17 = vld [vmem:[%s4756_s17 + $0x130] sm:$0xff] }
 0x1c8   : > { %v3015_v13 = vcvt.f32.s32 %v3014_v11  ;;  %v2995_v11 = vcvt.f32.s32 %v2994_v40  ;;  %v466_v19 = vld [vmem:[%s4756_s17 + $0x110] sm:$0xff] }
 0x1c9   : > { %1654 = vperm.xlu1 %3232, %v2965_v51   ;;  %v2989_v14 = vsel %vm2986_vm13, %v2987_v22, %v2988_v30  ;;  %v534_v30 = vmul.f32 255.0, %v470_v17  ;;  %v3007_v6 = vceil.f32 %v527_v4  ;;  %vm3006_vm1 = vcmp.lt.s32.totalorder %v527_v4, 0 }
 0x1ca   : > { %v4853_v45 = vpop.xlane.xlu2 %1357 }
 0x1cb   : > { %6679 = vst [vmem:[#allocation97_spill] sm:$0xff] %v4853_v45  ;;  %v4863_v26 = vpop.xlane.xlu1 %1354  ;;  %v2990_v45 = vcvt.f32.s32 %v2989_v14  ;;  %v3043_v14 = vfloor.f32 %v534_v30  ;;  %vm3041_vm2 = vcmp.lt.s32.totalorder %v534_v30, 0 }
 0x1cc   : > { %v4857_v51 = vpop.xlane.xlu0 %1351  ;;  %6682 = vst [vmem:[#allocation100_spill] sm:$0xff] %v4863_v26 }
 0x1cd   : > { %1675 = vperm.xlu0 %3231, %v3000_v3   ;;  %6680 = vst [vmem:[#allocation98_spill] sm:$0xff] %v4857_v51  ;;  %v3027_v3 = vceil.f32 %v531_v32  ;;  %v3008_v51 = vfloor.f32 %v527_v4 }
 0x1cf   : > { %1660 = vperm.xlu2 %3230, %v2975_v38   ;;  %v3003_v38 = vfloor.f32 %v526_v50  ;;  %v3029_v22 = vsel %vm3026_vm15, %v3027_v3, %v3028_v37  ;;  %v3009_v40 = vsel %vm3006_vm1, %v3007_v6, %v3008_v51  ;;  %v530_v50 = vmul.f32 255.0, %v466_v19  ;;  %v473_v3 = vld [vmem:[%s4756_s17 + $0x148] sm:$0xff] }
 0x1d0   : > { %v3030_v32 = vcvt.f32.s32 %v3029_v22  ;;  %v3010_v22 = vcvt.f32.s32 %v3009_v40 }
 0x1d1   : > { %1663 = vperm.xlu1 %3232, %v2980_v39   ;;  %v465_v39 = vld [vmem:[%s4756_s17 + $0x108] sm:$0xff]  ;;  %v3004_v10 = vsel %vm3001_vm0, %v3002_v12, %v3003_v38  ;;  %v537_v38 = vmul.f32 255.0, %v473_v3  ;;  %v3023_v51 = vfloor.f32 %v530_v50  ;;  %vm3021_vm4 = vcmp.lt.s32.totalorder %v530_v50, 0 }
 0x1d2   : > { %v4860_v41 = vpop.xlane.xlu2 %1366  ;;  %v3005_v17 = vcvt.f32.s32 %v3004_v10 }
 0x1d3   : > { %6681 = vst [vmem:[#allocation99_spill] sm:$0xff] %v4860_v41  ;;  %v529_v41 = vmul.f32 255.0, %v465_v39  ;;  %v4872_v26 = vpop.xlane.xlu1 %1363  ;;  %v3022_v39 = vceil.f32 %v530_v50  ;;  %v3058_v10 = vfloor.f32 %v537_v38  ;;  %vm3056_vm5 = vcmp.lt.s32.totalorder %v537_v38, 0 }
 0x1d4   : > { %v4867_v56 = vpop.xlane.xlu0 %1360  ;;  %6685 = vst [vmem:[#allocation103_spill] sm:$0xff] %v4872_v26 }
 0x1d5   : > { %1684 = vperm.xlu0 %3231, %v3015_v13   ;;  %6683 = vst [vmem:[#allocation101_spill] sm:$0xff] %v4867_v56  ;;  %v3042_v13 = vceil.f32 %v534_v30  ;;  %v3018_v4 = vfloor.f32 %v529_v41  ;;  %vm3016_vm3 = vcmp.lt.s32.totalorder %v529_v41, 0  ;;  %v469_v30 = vld [vmem:[%s4756_s17 + $0x128] sm:$0xff]  ;;  %v3024_v40 = vsel %vm3021_vm4, %v3022_v39, %v3023_v51 }
 0x1d7   : > { %1669 = vperm.xlu2 %3230, %v2990_v45   ;;  %v3017_v45 = vceil.f32 %v529_v41  ;;  %v3044_v12 = vsel %vm3041_vm2, %v3042_v13, %v3043_v14  ;;  %v533_v41 = vmul.f32 255.0, %v469_v30  ;;  %v476_v13 = vld [vmem:[%s4756_s17 + $0x160] sm:$0xff] }
 0x1d8   : > { %v3045_v6 = vcvt.f32.s32 %v3044_v12  ;;  %v3025_v12 = vcvt.f32.s32 %v3024_v40 }
 0x1d9   : > { %1672 = vperm.xlu1 %3232, %v2995_v11   ;;  %v468_v11 = vld [vmem:[%s4756_s17 + $0x120] sm:$0xff]  ;;  %v3019_v19 = vsel %vm3016_vm3, %v3017_v45, %v3018_v4  ;;  %v540_v4 = vmul.f32 255.0, %v476_v13  ;;  %v3038_v26 = vfloor.f32 %v533_v41  ;;  %vm3036_vm7 = vcmp.lt.s32.totalorder %v533_v41, 0 }
 0x1da   : > { %v4870_v37 = vpop.xlane.xlu2 %1375  ;;  %v3020_v14 = vcvt.f32.s32 %v3019_v19 }
 0x1db   : > { %6684 = vst [vmem:[#allocation102_spill] sm:$0xff] %v4870_v37  ;;  %v532_v37 = vmul.f32 255.0, %v468_v11  ;;  %v3037_v11 = vceil.f32 %v533_v41  ;;  %v3073_v19 = vfloor.f32 %v540_v4  ;;  %vm3071_vm8 = vcmp.lt.s32.totalorder %v540_v4, 0 }
 0x1dc   : > { %v4876_v56 = vpop.xlane.xlu0 %1369 }
 0x1dd   : > { %1693 = vperm.xlu0 %3231, %v3030_v32   ;;  %v3057_v32 = vceil.f32 %v537_v38  ;;  %6686 = vst [vmem:[#allocation104_spill] sm:$0xff] %v4876_v56  ;;  %v3032_v3 = vceil.f32 %v532_v37  ;;  %vm3031_vm6 = vcmp.lt.s32.totalorder %v532_v37, 0  ;;  %v4882_v56 = vpop.xlane.xlu1 %1372  ;;  %v472_v38 = vld [vmem:[%s4756_s17 + $0x140] sm:$0xff]  ;;  %v3039_v40 = vsel %vm3036_vm7, %v3037_v11, %v3038_v26  ;;  %v475_v26 = vld [vmem:[%s4756_s17 + $0x158] sm:$0xff] }
 0x1de   : > { %6688 = vst [vmem:[#allocation106_spill] sm:$0xff] %v4882_v56  ;;  %v3040_v41 = vcvt.f32.s32 %v3039_v40  ;;  %v482_v40 = vld [vmem:[%s4756_s17 + $0x190] sm:$0xff] }
 0x1df   : > { %1678 = vperm.xlu2 %3230, %v3005_v17   ;;  %v3033_v17 = vfloor.f32 %v532_v37  ;;  %v3059_v45 = vsel %vm3056_vm5, %v3057_v32, %v3058_v10  ;;  %v536_v37 = vmul.f32 255.0, %v472_v38  ;;  %v479_v32 = vld [vmem:[%s4756_s17 + $0x178] sm:$0xff] }
 0x1e0   : > { %v3060_v39 = vcvt.f32.s32 %v3059_v45 }
 0x1e1   : > { %1681 = vperm.xlu1 %3232, %v3010_v22   ;;  %v471_v22 = vld [vmem:[%s4756_s17 + $0x138] sm:$0xff]  ;;  %v3034_v51 = vsel %vm3031_vm6, %v3032_v3, %v3033_v17  ;;  %v543_v3 = vmul.f32 255.0, %v479_v32  ;;  %v474_v17 = vld [vmem:[%s4756_s17 + $0x150] sm:$0xff]  ;;  %v3053_v45 = vfloor.f32 %v536_v37  ;;  %vm3051_vm10 = vcmp.lt.s32.totalorder %v536_v37, 0 }
 0x1e2   : > { %v4879_v50 = vpop.xlane.xlu2 %1384  ;;  %v535_v30 = vmul.f32 255.0, %v471_v22  ;;  %v3035_v10 = vcvt.f32.s32 %v3034_v51  ;;  %v538_v38 = vmul.f32 255.0, %v474_v17 }
 0x1e3   : > { %6687 = vst [vmem:[#allocation105_spill] sm:$0xff] %v4879_v50  ;;  %vm3086_vm11 = vcmp.lt.s32.totalorder %v543_v3, 0 }
 0x1e4   : > { %v4886_v13 = vpop.xlane.xlu0 %1378  ;;  %v3047_v50 = vceil.f32 %v535_v30  ;;  %vm3046_vm9 = vcmp.lt.s32.totalorder %v535_v30, 0  ;;  %vm3061_vm12 = vcmp.lt.s32.totalorder %v538_v38, 0 }
 0x1e5   : > { %1702 = vperm.xlu0 %3231, %v3045_v6   ;;  %v3072_v6 = vceil.f32 %v540_v4  ;;  %6689 = vst [vmem:[#allocation107_spill] sm:$0xff] %v4886_v13  ;;  %v4892_v51 = vpop.xlane.xlu1 %1381  ;;  %v3062_v13 = vceil.f32 %v538_v38 }
 0x1e6   : > { %6690 = vst [vmem:[#allocation108_spill] sm:$0xff] %v4892_v51 }
 0x1e7   : > { %1687 = vperm.xlu2 %3230, %v3020_v14   ;;  %v3048_v14 = vfloor.f32 %v535_v30  ;;  %v3074_v56 = vsel %vm3071_vm8, %v3072_v6, %v3073_v19  ;;  %v3088_v6 = vfloor.f32 %v543_v3  ;;  %v539_v19 = vmul.f32 255.0, %v475_v26 }
 0x1e8   : > { %v3075_v4 = vcvt.f32.s32 %v3074_v56  ;;  %v546_v56 = vmul.f32 255.0, %v482_v40 }
 0x1e9   : > { %1690 = vperm.xlu1 %3232, %v3025_v12   ;;  %v3052_v12 = vceil.f32 %v536_v37  ;;  %v3049_v11 = vsel %vm3046_vm9, %v3047_v50, %v3048_v14  ;;  %v477_v50 = vld [vmem:[%s4756_s17 + $0x168] sm:$0xff]  ;;  %v3068_v17 = vfloor.f32 %v539_v19  ;;  %vm3066_vm13 = vcmp.lt.s32.totalorder %v539_v19, 0 }
 0x1ea   : > { %v4889_v22 = vpop.permute.xlu2 %1588  ;;  %v3050_v32 = vcvt.f32.s32 %v3049_v11  ;;  %v541_v26 = vmul.f32 255.0, %v477_v50  ;;  %vm3101_vm14 = vcmp.lt.s32.totalorder %v546_v56, 0  ;;  %v480_v50 = vld [vmem:[%s4756_s17 + $0x180] sm:$0xff] }
 0x1eb   : > { %v3054_v30 = vsel %vm3051_vm10, %v3052_v12, %v3053_v45 }
 0x1ec   : > { %v3055_v37 = vcvt.f32.s32 %v3054_v30  ;;  %v4896_v14 = vpop.xlane.xlu0 %1387  ;;  %v485_v30 = vld [vmem:[%s4756_s17 + $0x1a8] sm:$0xff]  ;;  %vm3076_vm15 = vcmp.lt.s32.totalorder %v541_v26, 0 }
 0x1ed   : > { %1711 = vperm.xlu0 %3231, %v3060_v39   ;;  %v3087_v39 = vceil.f32 %v543_v3  ;;  %6691 = vst [vmem:[#allocation109_spill] sm:$0xff] %v4896_v14  ;;  %v478_v3 = vld [vmem:[%s4756_s17 + $0x170] sm:$0xff]  ;;  %v4902_v40 = vpop.xlane.xlu1 %1390 }
 0x1ee   : > { %6692 = vst [vmem:[#allocation110_spill] sm:$0xff] %v4902_v40  ;;  %v544_v40 = vmul.f32 255.0, %v480_v50 }
 0x1ef   : > { %1696 = vperm.xlu2 %3230, %v3035_v10   ;;  %v3063_v10 = vfloor.f32 %v538_v38  ;;  %v3089_v58 = vsel %vm3086_vm11, %v3087_v39, %v3088_v6  ;;  %v3103_v39 = vfloor.f32 %v546_v56  ;;  %v542_v6 = vmul.f32 255.0, %v478_v3 }
 0x1f0   : > { %v3090_v12 = vcvt.f32.s32 %v3089_v58  ;;  %vm3091_vm2 = vcmp.lt.s32.totalorder %v544_v40, 0 }
 0x1f1   : > { %1699 = vperm.xlu1 %3232, %v3040_v41   ;;  %v3067_v41 = vceil.f32 %v539_v19  ;;  %v3064_v45 = vsel %vm3061_vm12, %v3062_v13, %v3063_v10  ;;  %v3077_v19 = vceil.f32 %v541_v26  ;;  %v549_v10 = vmul.f32 255.0, %v485_v30 }
 0x1f2   : > { %v4899_v11 = vpop.permute.xlu2 %1597  ;;  %v3065_v51 = vcvt.f32.s32 %v3064_v45  ;;  %v3082_v14 = vceil.f32 %v542_v6  ;;  %vm3081_vm0 = vcmp.lt.s32.totalorder %v542_v6, 0 }
 0x1f3   : > { %v3069_v38 = vsel %vm3066_vm13, %v3067_v41, %v3068_v17  ;;  %v3083_v41 = vfloor.f32 %v542_v6  ;;  %v3118_v45 = vfloor.f32 %v549_v10  ;;  %vm3116_vm1 = vcmp.lt.s32.totalorder %v549_v10, 0 }
 0x1f4   : > { %v3070_v58 = vcvt.f32.s32 %v3069_v38  ;;  %v3093_v6 = vfloor.f32 %v544_v40 }
 0x1f5   : > { %1720 = vperm.xlu0 %3231, %v3075_v4   ;;  %v3102_v4 = vceil.f32 %v546_v56  ;;  %v481_v56 = vld [vmem:[%s4756_s17 + $0x188] sm:$0xff]  ;;  %v3084_v38 = vsel %vm3081_vm0, %v3082_v14, %v3083_v41  ;;  %v484_v41 = vld [vmem:[%s4756_s17 + $0x1a0] sm:$0xff] }
 0x1f7   : > { %1705 = vperm.xlu2 %3230, %v3050_v32   ;;  %v3078_v32 = vfloor.f32 %v541_v26  ;;  %v3104_v13 = vsel %vm3101_vm14, %v3102_v4, %v3103_v39  ;;  %v545_v26 = vmul.f32 255.0, %v481_v56  ;;  %v488_v4 = vld [vmem:[%s4756_s17 + $0x1c0] sm:$0xff] }
 0x1f8   : > { %v3105_v17 = vcvt.f32.s32 %v3104_v13  ;;  %v3085_v13 = vcvt.f32.s32 %v3084_v38 }
 0x1f9   : > { %1708 = vperm.xlu1 %3232, %v3055_v37   ;;  %v3079_v3 = vsel %vm3076_vm15, %v3077_v19, %v3078_v32  ;;  %v552_v32 = vmul.f32 255.0, %v488_v4  ;;  %v3097_v14 = vceil.f32 %v545_v26  ;;  %vm3096_vm3 = vcmp.lt.s32.totalorder %v545_v26, 0 }
 0x1fa   : > { %v4909_v39 = vpop.permute.xlu2 %1600  ;;  %v3080_v27 = vcvt.f32.s32 %v3079_v3 }
 0x1fb   : > { %v3133_v3 = vfloor.f32 %v552_v32  ;;  %vm3131_vm4 = vcmp.lt.s32.totalorder %v552_v32, 0 }
 0x1fd   : > { %1729 = vperm.xlu0 %3231, %v3090_v12   ;;  %v3117_v12 = vceil.f32 %v549_v10  ;;  %v3098_v10 = vfloor.f32 %v545_v26 }
 0x1ff   : > { %v4905_v37 = vpop.permute.xlu0 %1591  ;;  %1714 = vperm.xlu2 %3230, %v3065_v51   ;;  %v3092_v51 = vceil.f32 %v544_v40  ;;  %v3119_v19 = vsel %vm3116_vm1, %v3117_v12, %v3118_v45  ;;  %v3099_v38 = vsel %vm3096_vm3, %v3097_v14, %v3098_v10  ;;  %v548_v40 = vmul.f32 255.0, %v484_v41  ;;  %v491_v12 = vld [vmem:[%s4756_s17 + $0x1d8] sm:$0xff] }
 0x200   : > { %v3120_v56 = vcvt.f32.s32 %v3119_v19  ;;  %v3100_v19 = vcvt.f32.s32 %v3099_v38  ;;  %v487_v10 = vld [vmem:[%s4756_s17 + $0x1b8] sm:$0xff] }
 0x201   : > { %1717 = vperm.xlu1 %3232, %v3070_v58   ;;  %v483_v58 = vld [vmem:[%s4756_s17 + $0x198] sm:$0xff]  ;;  %v3094_v0 = vsel %vm3091_vm2, %v3092_v51, %v3093_v6  ;;  %v555_v6 = vmul.f32 255.0, %v491_v12  ;;  %v3113_v14 = vfloor.f32 %v548_v40  ;;  %vm3111_vm6 = vcmp.lt.s32.totalorder %v548_v40, 0 }
 0x202   : > { %v547_v28 = vmul.f32 255.0, %v483_v58  ;;  %v3095_v4 = vcvt.f32.s32 %v3094_v0  ;;  %v4920_v26 = vpop.permute.xlu2 %1606  ;;  %v3112_v58 = vceil.f32 %v548_v40 }
 0x203   : > { %v4911_v30 = vpop.permute.xlu1 %1594  ;;  %v3147_v46 = vceil.f32 %v555_v6  ;;  %v3148_v52 = vfloor.f32 %v555_v6  ;;  %vm3146_vm7 = vcmp.lt.s32.totalorder %v555_v6, 0  ;;  %v490_v6 = vld [vmem:[%s4756_s17 + $0x1d0] sm:$0xff] }
 0x204   : > { %v3107_v61 = vceil.f32 %v547_v28  ;;  %vm3106_vm5 = vcmp.lt.s32.totalorder %v547_v28, 0  ;;  %v3114_v38 = vsel %vm3111_vm6, %v3112_v58, %v3113_v14 }
 0x205   : > { %1738 = vperm.xlu0 %3231, %v3105_v17   ;;  %v3132_v17 = vceil.f32 %v552_v32  ;;  %v3115_v40 = vcvt.f32.s32 %v3114_v38  ;;  %v3149_v47 = vsel %vm3146_vm7, %v3147_v46, %v3148_v52  ;;  %v554_v52 = vmul.f32 255.0, %v490_v6 }
 0x206   : > { %v3150_v58 = vcvt.f32.s32 %v3149_v47 }
 0x207   : > { %v4914_v50 = vpop.permute.xlu0 %1612  ;;  %1723 = vperm.xlu2 %3230, %v3080_v27   ;;  %v3108_v27 = vfloor.f32 %v547_v28  ;;  %v3134_v51 = vsel %vm3131_vm4, %v3132_v17, %v3133_v3  ;;  %v551_v28 = vmul.f32 255.0, %v487_v10  ;;  %v494_v17 = vld [vmem:[%s4756_s17 + $0x1f0] sm:$0xff]  ;;  %vm3141_vm12 = vcmp.lt.s32.totalorder %v554_v52, 0 }
 0x208   : > { %v3135_v41 = vcvt.f32.s32 %v3134_v51 }
 0x209   : > { %1726 = vperm.xlu1 %3232, %v3085_v13   ;;  %v486_v13 = vld [vmem:[%s4756_s17 + $0x1b0] sm:$0xff]  ;;  %v3109_v0 = vsel %vm3106_vm5, %v3107_v61, %v3108_v27  ;;  %v558_v61 = vmul.f32 255.0, %v494_v17  ;;  %v489_v27 = vld [vmem:[%s4756_s17 + $0x1c8] sm:$0xff]  ;;  %v3128_v51 = vfloor.f32 %v551_v28  ;;  %vm3126_vm9 = vcmp.lt.s32.totalorder %v551_v28, 0 }
 0x20a   : > { %v3110_v12 = vcvt.f32.s32 %v3109_v0  ;;  %v553_v10 = vmul.f32 255.0, %v489_v27  ;;  %v3143_v27 = vfloor.f32 %v554_v52 }
 0x20b   : > { %v4918_v45 = vpop.permute.xlu1 %1603  ;;  %v3163_v38 = vfloor.f32 %v558_v61  ;;  %vm3161_vm10 = vcmp.lt.s32.totalorder %v558_v61, 0 }
 0x20c   : > { %vm3136_vm11 = vcmp.lt.s32.totalorder %v553_v10, 0 }
 0x20d   : > { %1747 = vperm.xlu0 %3231, %v3120_v56   ;;  %v550_v56 = vmul.f32 255.0, %v486_v13  ;;  %v4930_v13 = vpop.permute.xlu2 %1615 }
 0x20f   : > { %v4923_v32 = vpop.permute.xlu0 %1621  ;;  %1732 = vperm.xlu2 %3230, %v3095_v4   ;;  %v3122_v53 = vceil.f32 %v550_v56  ;;  %v3123_v4 = vfloor.f32 %v550_v56  ;;  %vm3121_vm8 = vcmp.lt.s32.totalorder %v550_v56, 0 }
 0x211   : > { %1735 = vperm.xlu1 %3232, %v3100_v19   ;;  %v3127_v19 = vceil.f32 %v551_v28  ;;  %v3124_v14 = vsel %vm3121_vm8, %v3122_v53, %v3123_v4  ;;  %v3138_v28 = vfloor.f32 %v553_v10  ;;  %v492_v53 = vld [vmem:[%s4756_s17 + $0x1e0] sm:$0xff]  ;;  %v3142_v4 = vceil.f32 %v554_v52 }
 0x212   : > { %v3125_v56 = vcvt.f32.s32 %v3124_v14 }
 0x213   : > { %v4927_v3 = vpop.permute.xlu1 %1609  ;;  %v3129_v46 = vsel %vm3126_vm9, %v3127_v19, %v3128_v51  ;;  %v3144_v14 = vsel %vm3141_vm12, %v3142_v4, %v3143_v27 }
 0x214   : > { %v3130_v54 = vcvt.f32.s32 %v3129_v46 }
 0x215   : > { %1756 = vperm.xlu0 %3231, %v3135_v41   ;;  %v3162_v41 = vceil.f32 %v558_v61  ;;  %v556_v61 = vmul.f32 255.0, %v492_v53  ;;  %v4939_v6 = vpop.permute.xlu2 %1624 }
 0x217   : > { %1741 = vperm.xlu2 %3230, %v3110_v12   ;;  %v4933_v0 = vpop.permute.xlu0 %1630  ;;  %v3137_v12 = vceil.f32 %v553_v10  ;;  %v3164_v47 = vsel %vm3161_vm10, %v3162_v41, %v3163_v38  ;;  %v3152_v10 = vceil.f32 %v556_v61  ;;  %v3153_v41 = vfloor.f32 %v556_v61 }
 0x218   : > { %v3165_v19 = vcvt.f32.s32 %v3164_v47  ;;  %v3145_v38 = vcvt.f32.s32 %v3144_v14  ;;  %vm3151_vm13 = vcmp.lt.s32.totalorder %v556_v61, 0 }
 0x219   : > { %1744 = vperm.xlu1 %3232, %v3115_v40   ;;  %v493_v40 = vld [vmem:[%s4756_s17 + $0x1e8] sm:$0xff]  ;;  %v3139_v51 = vsel %vm3136_vm11, %v3137_v12, %v3138_v28  ;;  %v3154_v12 = vsel %vm3151_vm13, %v3152_v10, %v3153_v41  ;;  %v6492_v41 = vlaneseq }
 0x21a   : > { %v3140_v46 = vcvt.f32.s32 %v3139_v51  ;;  %v3155_v4 = vcvt.f32.s32 %v3154_v12 }
 0x21b   : > { %v4935_v17 = vpop.permute.xlu1 %1618 }
 0x21d   : > { %1765 = vperm.xlu0 %3231, %v3150_v58   ;;  %v557_v58 = vmul.f32 255.0, %v493_v40  ;;  %v4946_v53 = vpop.permute.xlu2 %1633 }
 0x21f   : > { %1750 = vperm.xlu2 %3230, %v3125_v56   ;;  %v4941_v55 = vpop.permute.xlu0 %1639  ;;  %v495_v56 = vld [vmem:[%s4756_s17 + $0x1f8] sm:$0xff]  ;;  %v3157_v59 = vceil.f32 %v557_v58  ;;  %v3158_v47 = vfloor.f32 %v557_v58  ;;  %vm3156_vm14 = vcmp.lt.s32.totalorder %v557_v58, 0 }
 0x220   : > { %v559_v28 = vmul.f32 255.0, %v495_v56  ;;  %v4961_v56 = vand.u32 127, %v6492_v41 }
 0x221   : > { %1753 = vperm.xlu1 %3232, %v3130_v54   ;;  %v3159_v54 = vsel %vm3156_vm14, %v3157_v59, %v3158_v47 }
 0x222   : > { %v3167_v27 = vceil.f32 %v559_v28  ;;  %v3168_v40 = vfloor.f32 %v559_v28  ;;  %v3160_v51 = vcvt.f32.s32 %v3159_v54  ;;  %vm3166_vm15 = vcmp.lt.s32.totalorder %v559_v28, 0  ;;  %v3668_v54 = vld [vmem:[%s3951_s5 + $0x10] sm:$0xff] }
 0x223   : > { %v4944_v52 = vpop.permute.xlu1 %1627  ;;  %v4966_v12 = vadd.s32 128, %v4961_v56  ;;  %vm1781_vm0 = vcmp.eq.s32.totalorder %v4961_v56, %v4905_v37  ;;  %vm1789_vm2 = vcmp.eq.s32.totalorder %v4961_v56, %v4918_v45  ;;  %vm1779_vm4 = vcmp.eq.s32.totalorder %v4961_v56, %v4889_v22 }
 0x224   : > { %v3169_v14 = vsel %vm3166_vm15, %v3167_v27, %v3168_v40  ;;  %v3669_v27 = vld [vmem:[%s3951_s5 + $0x18] sm:$0xff]  ;;  %vm1795_vm6 = vcmp.eq.s32.totalorder %v4961_v56, %v4914_v50  ;;  %vm1783_vm8 = vcmp.eq.s32.totalorder %v4961_v56, %v4911_v30  ;;  %vm1785_vm10 = vcmp.eq.s32.totalorder %v4961_v56, %v4899_v11 }
 0x225   : > { %1774 = vperm.xlu0 %3231, %v3165_v19   ;;  %v3170_v58 = vcvt.f32.s32 %v3169_v14  ;;  %vm1782_vm1 = vcmp.eq.s32.totalorder %v4966_v12, %v4905_v37  ;;  %vm1790_vm3 = vcmp.eq.s32.totalorder %v4966_v12, %v4918_v45  ;;  %v3670_v37 = vld [vmem:[%s3951_s5 + $0x50] sm:$0xff]  ;;  %vm1780_vm5 = vcmp.eq.s32.totalorder %v4966_v12, %v4889_v22  ;;  %v3672_v45 = vld [vmem:[%s3951_s5] sm:$0xff] }
 0x226   : > { %v1910_v40 = vsel %vm1782_vm1, %v3669_v27, 0.0  ;;  %v1918_v27 = vsel %vm1790_vm3, %v3671_v23, 0.0  ;;  %v1907_v7 = vsel %vm1779_vm4, %v3672_v45, 0.0  ;;  %vm1796_vm7 = vcmp.eq.s32.totalorder %v4966_v12, %v4914_v50  ;;  %v3675_v45 = vld [vmem:[%s3951_s5 + $0x88] sm:$0xff]  ;;  %v3676_v50 = vld [vmem:[%s3951_s5 + $0x20] sm:$0xff] }
 0x227   : > { %1759 = vperm.xlu2 %3230, %v3140_v46   ;;  %v4948_v19 = vpop.permute.xlu0 %1648  ;;  %v4952_v46 = vpop.permute.xlu2 %1642  ;;  %vm1784_vm9 = vcmp.eq.s32.totalorder %v4966_v12, %v4911_v30  ;;  %vm1786_vm11 = vcmp.eq.s32.totalorder %v4966_v12, %v4899_v11  ;;  %vm1801_vm12 = vcmp.eq.s32.totalorder %v4961_v56, %v4923_v32  ;;  %vm1802_vm13 = vcmp.eq.s32.totalorder %v4966_v12, %v4923_v32  ;;  %v3680_v11 = vld [vmem:[%s3951_s5 + $0xb0] sm:$0xff]  ;;  %v3683_v32 = vld [vmem:[%s3951_s5 + $0x48] sm:$0xff] }
 0x228   : > { %v1912_v63 = vsel %vm1784_vm9, %v3677_v62, 0.0  ;;  %vm1787_vm14 = vcmp.eq.s32.totalorder %v4961_v56, %v4909_v39  ;;  %vm1788_vm15 = vcmp.eq.s32.totalorder %v4966_v12, %v4909_v39  ;;  %vm1792_vm1 = vcmp.eq.s32.totalorder %v4966_v12, %v4920_v26 }
 0x229   : > { %1762 = vperm.xlu1 %3232, %v3145_v38   ;;  %vm1808_vm3 = vcmp.eq.s32.totalorder %v4966_v12, %v4933_v0  ;;  %vm1793_vm4 = vcmp.eq.s32.totalorder %v4961_v56, %v4927_v3  ;;  %vm1814_vm9 = vcmp.eq.s32.totalorder %v4966_v12, %v4941_v55 }
 0x22b   : > { %v4950_v61 = vpop.permute.xlu1 %1636 }
 0x22f   : > { %1768 = vperm.xlu2 %3230, %v3155_v4   ;;  %v4954_v59 = vpop.permute.xlu0 %1657  ;;  %v4958_v38 = vpop.permute.xlu2 %1651  ;;  %v1909_v4 = vsel %vm1781_vm0, %v3668_v54, 0.0  ;;  %v1917_v54 = vsel %vm1789_vm2, %v3670_v37, 0.0  ;;  %vm1791_vm0 = vcmp.eq.s32.totalorder %v4961_v56, %v4920_v26  ;;  %vm1807_vm2 = vcmp.eq.s32.totalorder %v4961_v56, %v4933_v0  ;;  %v3688_v0 = vld [vmem:[%s3951_s5 + $0x70] sm:$0xff] }
 0x231   : > { %1771 = vperm.xlu1 %3232, %v3160_v51  }
 0x233   : > { %v4956_v10 = vpop.permute.xlu1 %1645 }
 0x237   : > { %1777 = vperm.xlu2 %3230, %v3170_v58   ;;  %v4963_v47 = vpop.permute.xlu0 %1666  ;;  %v4976_v51 = vpop.permute.xlu2 %1660  ;;  %v2038_v58 = vadd.f32 %v1910_v40, %v1909_v4  ;;  %v2050_v40 = vadd.f32 %v1918_v27, %v1917_v54  ;;  %v3674_v54 = vld [vmem:[%s3951_s5 + $0x80] sm:$0xff] }
 0x238   : > { %v1923_v27 = vsel %vm1795_vm6, %v3674_v54, 0.0  ;;  %v3679_v54 = vld [vmem:[%s3951_s5 + $0x38] sm:$0xff]  ;;  %vm1797_vm6 = vcmp.eq.s32.totalorder %v4961_v56, %v4930_v13 }
 0x23b   : > { %v4968_v28 = vpop.permute.xlu1 %1654 }
 0x23f   : > { %v4978_v14 = vpop.permute.xlu0 %1675  ;;  %v4992_v4 = vpop.permute.xlu2 %1669 }
 0x243   : > { %v4984_v41 = vpop.permute.xlu1 %1663 }
 0x247   : > { %v4994_v8 = vpop.permute.xlu0 %1684 }
 0x24b   : > { %v5006_v23 = vpop.permute.xlu1 %1672 }
 0x24f   : > { %2039 = vadd.xlane.f32.xlu0 %v2038_v58  ;;  %v3673_v58 = vld [vmem:[%s3951_s5 + $0x8] sm:$0xff] }
 0x250   : > { %v1908_v37 = vsel %vm1780_vm5, %v3673_v58, 0.0  ;;  %v1924_v58 = vsel %vm1796_vm7, %v3675_v45, 0.0  ;;  %v1914_v45 = vsel %vm1786_vm11, %v3679_v54, 0.0  ;;  %vm1794_vm5 = vcmp.eq.s32.totalorder %v4966_v12, %v4927_v3 }
 0x251   : > { %v2035_v22 = vadd.f32 %v1908_v37, %v1907_v7  ;;  %v2059_v30 = vadd.f32 %v1924_v58, %v1923_v27  ;;  %v1913_v7 = vsel %vm1785_vm10, %v3678_v16, 0.0  ;;  %v5017_v37 = vpop.permute.xlu2 %1678  ;;  %v5028_v16 = vpop.permute.xlu0 %1693  ;;  %v3682_v58 = vld [vmem:[%s3951_s5 + $0x40] sm:$0xff]  ;;  %vm1798_vm7 = vcmp.eq.s32.totalorder %v4966_v12, %v4930_v13 }
 0x252   : > { %v2044_v62 = vadd.f32 %v1914_v45, %v1913_v7  ;;  %v3684_v7 = vld [vmem:[%s3951_s5 + $0x60] sm:$0xff]  ;;  %v3685_v45 = vld [vmem:[%s3951_s5 + $0x68] sm:$0xff]  ;;  %vm1799_vm10 = vcmp.eq.s32.totalorder %v4961_v56, %v4935_v17  ;;  %vm1800_vm11 = vcmp.eq.s32.totalorder %v4966_v12, %v4935_v17 }
 0x253   : > { %v1919_v54 = vsel %vm1791_vm0, %v3684_v7, 0.0  ;;  %v3690_v7 = vld [vmem:[%s3951_s5 + $0x90] sm:$0xff]  ;;  %vm1805_vm0 = vcmp.eq.s32.totalorder %v4961_v56, %v4944_v52 }
 0x257   : > { %2051 = vadd.xlane.f32.xlu0 %v2050_v40  ;;  %v1911_v40 = vsel %vm1783_vm8, %v3676_v50, 0.0  ;;  %v1915_v50 = vsel %vm1787_vm14, %v3682_v58, 0.0  ;;  %vm1813_vm8 = vcmp.eq.s32.totalorder %v4961_v56, %v4941_v55  ;;  %v3694_v55 = vld [vmem:[%s3951_s5 + $0xa0] sm:$0xff]  ;;  %vm1819_vm14 = vcmp.eq.s32.totalorder %v4961_v56, %v4948_v19 }
 0x258   : > { %v2041_v15 = vadd.f32 %v1912_v63, %v1911_v40  ;;  %v1929_v63 = vsel %vm1801_vm12, %v3680_v11, 0.0  ;;  %v1916_v40 = vsel %vm1788_vm15, %v3683_v32, 0.0  ;;  %v1920_v11 = vsel %vm1792_vm1, %v3685_v45, 0.0  ;;  %v3691_v45 = vld [vmem:[%s3951_s5 + $0x98] sm:$0xff] }
 0x259   : > { %v2047_v39 = vadd.f32 %v1916_v40, %v1915_v50  ;;  %v2053_v26 = vadd.f32 %v1920_v11, %v1919_v54  ;;  %v5054_v50 = vpop.permute.xlu0 %1702  ;;  %v1921_v32 = vsel %vm1793_vm4, %v3688_v0, 0.0  ;;  %v3689_v40 = vld [vmem:[%s3951_s5 + $0x78] sm:$0xff]  ;;  %v1925_v54 = vsel %vm1797_vm6, %v3690_v7, 0.0  ;;  %v3696_v7 = vld [vmem:[%s3951_s5 + $0xc0] sm:$0xff] }
 0x25a   : > { %v1922_v3 = vsel %vm1794_vm5, %v3689_v40, 0.0  ;;  %v1926_v11 = vsel %vm1798_vm7, %v3691_v45, 0.0  ;;  %vm1803_vm12 = vcmp.eq.s32.totalorder %v4961_v56, %v4939_v6  ;;  %v3695_v40 = vld [vmem:[%s3951_s5 + $0xa8] sm:$0xff]  ;;  %vm1820_vm15 = vcmp.eq.s32.totalorder %v4966_v12, %v4948_v19  ;;  %v3700_v19 = vld [vmem:[%s3951_s5 + $0xd0] sm:$0xff] }
 0x25b   : > { %2036 = vadd.xlane.f32.xlu1 %v2035_v22  ;;  %v3681_v22 = vld [vmem:[%s3951_s5 + $0xb8] sm:$0xff]  ;;  %v2062_v13 = vadd.f32 %v1926_v11, %v1925_v54  ;;  %v1928_v17 = vsel %vm1800_vm11, %v3695_v40, 0.0  ;;  %v1931_v54 = vsel %vm1803_vm12, %v3696_v7, 0.0  ;;  %v3697_v45 = vld [vmem:[%s3951_s5 + $0xc8] sm:$0xff]  ;;  %vm1806_vm1 = vcmp.eq.s32.totalorder %v4966_v12, %v4944_v52 }
 0x25c   : > { %v1930_v27 = vsel %vm1802_vm13, %v3681_v22, 0.0  ;;  %v5046_v22 = vpop.permute.xlu2 %1687  ;;  %vm1804_vm13 = vcmp.eq.s32.totalorder %v4966_v12, %v4939_v6  ;;  %vm1825_vm4 = vcmp.eq.s32.totalorder %v4961_v56, %v4954_v59  ;;  %vm1826_vm5 = vcmp.eq.s32.totalorder %v4966_v12, %v4954_v59  ;;  %v3706_v59 = vld [vmem:[%s3951_s5 + $0x100] sm:$0xff] }
 0x25d   : > { %v1932_v11 = vsel %vm1804_vm13, %v3697_v45, 0.0  ;;  %v3703_v45 = vld [vmem:[%s3951_s5 + $0xf8] sm:$0xff]  ;;  %vm1811_vm6 = vcmp.eq.s32.totalorder %v4961_v56, %v4950_v61  ;;  %vm1812_vm7 = vcmp.eq.s32.totalorder %v4966_v12, %v4950_v61  ;;  %vm1832_vm11 = vcmp.eq.s32.totalorder %v4966_v12, %v4963_v47 }
 0x25e   : > { %vm1817_vm12 = vcmp.eq.s32.totalorder %v4961_v56, %v4956_v10  ;;  %vm1818_vm13 = vcmp.eq.s32.totalorder %v4966_v12, %v4956_v10 }
 0x25f   : > { %2060 = vadd.xlane.f32.xlu0 %v2059_v30  ;;  %v5034_v30 = vpop.permute.xlu1 %1681 }
 0x260   : > { %2042 = vadd.xlane.f32.xlu2 %v2041_v15  ;;  %v2068_v15 = vadd.f32 %v1930_v27, %v1929_v63  ;;  %v3687_v27 = vld [vmem:[%s3951_s5 + $0xe8] sm:$0xff] }
 0x261   : > { %v1936_v58 = vsel %vm1808_vm3, %v3687_v27, 0.0  ;;  %v3693_v27 = vld [vmem:[%s3951_s5 + $0x118] sm:$0xff]  ;;  %vm1810_vm3 = vcmp.eq.s32.totalorder %v4966_v12, %v4946_v53 }
 0x263   : > { %2045 = vadd.xlane.f32.xlu1 %v2044_v62  ;;  %v3686_v62 = vld [vmem:[%s3951_s5 + $0xe0] sm:$0xff] }
 0x264   : > { %v1935_v63 = vsel %vm1807_vm2, %v3686_v62, 0.0  ;;  %v2056_v62 = vadd.f32 %v1922_v3, %v1921_v32  ;;  %v5076_v0 = vpop.permute.xlu2 %1696  ;;  %v1927_v32 = vsel %vm1799_vm10, %v3694_v55, 0.0  ;;  %v5084_v3 = vpop.permute.xlu0 %1711  ;;  %vm1809_vm2 = vcmp.eq.s32.totalorder %v4961_v56, %v4946_v53 }
 0x265   : > { %v1933_v55 = vsel %vm1805_vm0, %v3700_v19, 0.0  ;;  %v1939_v19 = vsel %vm1811_vm6, %v3706_v59, 0.0  ;;  %vm1831_vm10 = vcmp.eq.s32.totalorder %v4961_v56, %v4963_v47  ;;  %vm1837_vm0 = vcmp.eq.s32.totalorder %v4961_v56, %v4978_v14 }
 0x266   : > { %vm1843_vm6 = vcmp.eq.s32.totalorder %v4961_v56, %v4994_v8 }
 0x267   : > { %2069 = vadd.xlane.f32.xlu0 %v2068_v15  ;;  %v2077_v15 = vadd.f32 %v1936_v58, %v1935_v63  ;;  %v1942_v58 = vsel %vm1814_vm9, %v3693_v27, 0.0  ;;  %v3699_v27 = vld [vmem:[%s3951_s5 + $0x148] sm:$0xff]  ;;  %vm1816_vm9 = vcmp.eq.s32.totalorder %v4966_v12, %v4952_v46 }
 0x268   : > { %2048 = vadd.xlane.f32.xlu2 %v2047_v39  ;;  %v5062_v39 = vpop.permute.xlu1 %1690 }
 0x26b   : > { %2054 = vadd.xlane.f32.xlu1 %v2053_v26  ;;  %v3692_v26 = vld [vmem:[%s3951_s5 + $0x110] sm:$0xff] }
 0x26c   : > { %v1941_v63 = vsel %vm1813_vm8, %v3692_v26, 0.0  ;;  %v3698_v26 = vld [vmem:[%s3951_s5 + $0x140] sm:$0xff]  ;;  %vm1815_vm8 = vcmp.eq.s32.totalorder %v4961_v56, %v4952_v46 }
 0x26f   : > { %2078 = vadd.xlane.f32.xlu0 %v2077_v15  ;;  %v2086_v15 = vadd.f32 %v1942_v58, %v1941_v63  ;;  %v1947_v63 = vsel %vm1819_vm14, %v3698_v26, 0.0  ;;  %v1948_v58 = vsel %vm1820_vm15, %v3699_v27, 0.0  ;;  %v3704_v26 = vld [vmem:[%s3951_s5 + $0x170] sm:$0xff]  ;;  %v3705_v27 = vld [vmem:[%s3951_s5 + $0x178] sm:$0xff]  ;;  %vm1821_vm14 = vcmp.eq.s32.totalorder %v4961_v56, %v4958_v38 }
 0x270   : > { %2057 = vadd.xlane.f32.xlu2 %v2056_v62  ;;  %v2065_v62 = vadd.f32 %v1928_v17, %v1927_v32  ;;  %v5092_v6 = vpop.permute.xlu1 %1699  ;;  %v3701_v32 = vld [vmem:[%s3951_s5 + $0xd8] sm:$0xff]  ;;  %v5106_v17 = vpop.permute.xlu2 %1705  ;;  %v2095_v52 = vadd.f32 %v1948_v58, %v1947_v63  ;;  %v1953_v63 = vsel %vm1825_vm4, %v3704_v26, 0.0  ;;  %v1954_v58 = vsel %vm1826_vm5, %v3705_v27, 0.0 }
 0x271   : > { %v1934_v40 = vsel %vm1806_vm1, %v3701_v32, 0.0  ;;  %v2104_v32 = vadd.f32 %v1954_v58, %v1953_v63  ;;  %v3711_v63 = vld [vmem:[%s3951_s5 + $0x1a8] sm:$0xff]  ;;  %vm1822_vm15 = vcmp.eq.s32.totalorder %v4966_v12, %v4958_v38  ;;  %v3712_v58 = vld [vmem:[%s3951_s5 + $0x130] sm:$0xff]  ;;  %vm1838_vm1 = vcmp.eq.s32.totalorder %v4966_v12, %v4978_v14 }
 0x272   : > { %v1960_v27 = vsel %vm1832_vm11, %v3711_v63, 0.0  ;;  %v1945_v59 = vsel %vm1817_vm12, %v3712_v58, 0.0  ;;  %vm1827_vm4 = vcmp.eq.s32.totalorder %v4961_v56, %v4976_v51  ;;  %vm1828_vm5 = vcmp.eq.s32.totalorder %v4966_v12, %v4976_v51  ;;  %v3718_v63 = vld [vmem:[%s3951_s5 + $0x160] sm:$0xff] }
 0x273   : > { %2063 = vadd.xlane.f32.xlu1 %v2062_v13  ;;  %v2071_v13 = vadd.f32 %v1932_v11, %v1931_v54  ;;  %v5109_v54 = vpop.permute.xlu0 %1720  ;;  %v1938_v11 = vsel %vm1810_vm3, %v3703_v45, 0.0  ;;  %vm1824_vm3 = vcmp.eq.s32.totalorder %v4966_v12, %v4968_v28  ;;  %vm1834_vm11 = vcmp.eq.s32.totalorder %v4966_v12, %v4992_v4 }
 0x274   : > { %vm1849_vm12 = vcmp.eq.s32.totalorder %v4961_v56, %v5028_v16 }
 0x277   : > { %2087 = vadd.xlane.f32.xlu0 %v2086_v15  ;;  %v3702_v15 = vld [vmem:[%s3951_s5 + $0xf0] sm:$0xff] }
 0x278   : > { %2066 = vadd.xlane.f32.xlu2 %v2065_v62  ;;  %v1937_v7 = vsel %vm1809_vm2, %v3702_v15, 0.0  ;;  %v2074_v62 = vadd.f32 %v1934_v40, %v1933_v55  ;;  %v5120_v53 = vpop.permute.xlu1 %1708  ;;  %v3707_v55 = vld [vmem:[%s3951_s5 + $0x108] sm:$0xff]  ;;  %v3708_v40 = vld [vmem:[%s3951_s5 + $0x120] sm:$0xff]  ;;  %v5131_v15 = vpop.permute.xlu2 %1714  ;;  %vm1823_vm2 = vcmp.eq.s32.totalorder %v4961_v56, %v4968_v28 }
 0x279   : > { %v1940_v61 = vsel %vm1812_vm7, %v3707_v55, 0.0  ;;  %v1951_v28 = vsel %vm1823_vm2, %v3718_v63, 0.0  ;;  %vm1844_vm7 = vcmp.eq.s32.totalorder %v4966_v12, %v4994_v8  ;;  %v3724_v8 = vld [vmem:[%s3951_s5 + $0x190] sm:$0xff]  ;;  %vm1840_vm2 = vcmp.eq.s32.totalorder %v4966_v12, %v5017_v37 }
 0x27b   : > { %2072 = vadd.xlane.f32.xlu1 %v2071_v13  ;;  %v2080_v13 = vadd.f32 %v1938_v11, %v1937_v7  ;;  %v3709_v7 = vld [vmem:[%s3951_s5 + $0x128] sm:$0xff]  ;;  %v2083_v11 = vadd.f32 %v1940_v61, %v1939_v19  ;;  %v5138_v46 = vpop.permute.xlu0 %1729  ;;  %v3713_v19 = vld [vmem:[%s3951_s5 + $0x138] sm:$0xff]  ;;  %v3714_v61 = vld [vmem:[%s3951_s5 + $0x150] sm:$0xff] }
 0x27c   : > { %v1944_v45 = vsel %vm1816_vm9, %v3709_v7, 0.0  ;;  %v1946_v10 = vsel %vm1818_vm13, %v3713_v19, 0.0  ;;  %vm1830_vm9 = vcmp.eq.s32.totalorder %v4966_v12, %v4984_v41  ;;  %vm1850_vm13 = vcmp.eq.s32.totalorder %v4966_v12, %v5028_v16 }
 0x27d   : > { %v2092_v7 = vadd.f32 %v1946_v10, %v1945_v59  ;;  %v3720_v10 = vld [vmem:[%s3951_s5 + $0x180] sm:$0xff] }
 0x27f   : > { %2096 = vadd.xlane.f32.xlu0 %v2095_v52  ;;  %v1943_v52 = vsel %vm1815_vm8, %v3708_v40, 0.0  ;;  %v3715_v40 = vld [vmem:[%s3951_s5 + $0x158] sm:$0xff]  ;;  %vm1829_vm8 = vcmp.eq.s32.totalorder %v4961_v56, %v4984_v41 }
 0x280   : > { %2075 = vadd.xlane.f32.xlu2 %v2074_v62  ;;  %v2089_v62 = vadd.f32 %v1944_v45, %v1943_v52  ;;  %v5148_v47 = vpop.permute.xlu1 %1717  ;;  %v1950_v52 = vsel %vm1822_vm15, %v3715_v40, 0.0  ;;  %v5160_v38 = vpop.permute.xlu2 %1723  ;;  %v3725_v41 = vld [vmem:[%s3951_s5 + $0x198] sm:$0xff]  ;;  %vm1835_vm15 = vcmp.eq.s32.totalorder %v4961_v56, %v5006_v23 }
 0x283   : > { %2081 = vadd.xlane.f32.xlu1 %v2080_v13  ;;  %v3710_v13 = vld [vmem:[%s3951_s5 + $0x1a0] sm:$0xff]  ;;  %v5168_v14 = vpop.permute.xlu0 %1738 }
 0x284   : > { %v1959_v26 = vsel %vm1831_vm10, %v3710_v13, 0.0  ;;  %v3717_v13 = vld [vmem:[%s3951_s5 + $0x1d8] sm:$0xff]  ;;  %vm1833_vm10 = vcmp.eq.s32.totalorder %v4961_v56, %v4992_v4 }
 0x285   : > { %v2113_v55 = vadd.f32 %v1960_v27, %v1959_v26  ;;  %v1966_v26 = vsel %vm1838_vm1, %v3717_v13, 0.0  ;;  %v3719_v27 = vld [vmem:[%s3951_s5 + $0x168] sm:$0xff]  ;;  %v1957_v13 = vsel %vm1829_vm8, %v3724_v8, 0.0  ;;  %vm1839_vm1 = vcmp.eq.s32.totalorder %v4961_v56, %v5017_v37  ;;  %v3732_v8 = vld [vmem:[%s3951_s5 + $0x1e0] sm:$0xff]  ;;  %v3492_v37 = vpop.eup %3491 }
 0x286   : > { %v1952_v58 = vsel %vm1824_vm3, %v3719_v27, 0.0  ;;  %v3726_v27 = vld [vmem:[%s3951_s5 + $0x1b0] sm:$0xff]  ;;  %vm1855_vm3 = vcmp.eq.s32.totalorder %v4961_v56, %v5054_v50  ;;  %v3494_v44 = vpop.eup %3493  ;;  %vm1846_vm8 = vcmp.eq.s32.totalorder %v4966_v12, %v5046_v22  ;;  %v1395_v29 = vmul.f32 0.6931472, %v3492_v37  ;;  %v3741_v37 = vld [vmem:[%s3951_s5 + $0x298] sm:$0xff] }
 0x287   : > { %2105 = vadd.xlane.f32.xlu0 %v2104_v32  ;;  %v1949_v32 = vsel %vm1821_vm14, %v3714_v61, 0.0  ;;  %v3721_v61 = vld [vmem:[%s3951_s5 + $0x188] sm:$0xff]  ;;  %v2101_v40 = vadd.f32 %v1952_v58, %v1951_v28  ;;  %v1961_v58 = vsel %vm1833_vm10, %v3726_v27, 0.0  ;;  %vm239_vm14 = vcmask 7168  }
 0x288   : > { %2084 = vadd.xlane.f32.xlu2 %v2083_v11  ;;  %v2098_v45 = vadd.f32 %v1950_v52, %v1949_v32  ;;  %v3716_v11 = vld [vmem:[%s3951_s5 + $0x1d0] sm:$0xff]  ;;  %v5177_v19 = vpop.permute.xlu1 %1726  ;;  %v1956_v32 = vsel %vm1828_vm5, %v3721_v61, 0.0  ;;  %v3722_v52 = vld [vmem:[%s3951_s5 + $0x200] sm:$0xff]  ;;  %v3879_v61 = vmov 0.0   ;;  %vm1841_vm5 = vcmp.eq.s32.totalorder %v4961_v56, %v5034_v30 }
 0x289   : > { %241 = vst.msk [vmem:[%s5205_s22 + $0x8] sm:$0xff] %vm239_vm14, %v3879_v61  ;;  %vm1862_vm10 = vcmp.eq.s32.totalorder %v4966_v12, %v5084_v3 }
 0x28a   : > { %240 = vst.msk [vmem:[%s5205_s22] sm:$0xff] %vm239_vm14, %v3879_v61 }
 0x28b   : > { %2090 = vadd.xlane.f32.xlu1 %v2089_v62  ;;  %v1965_v62 = vsel %vm1837_vm0, %v3716_v11, 0.0  ;;  %v5200_v63 = vpop.permute.xlu0 %1747  ;;  %vm1836_vm0 = vcmp.eq.s32.totalorder %v4966_v12, %v5006_v23  ;;  %242 = vst.msk [vmem:[%s5205_s22 + $0x10] sm:$0xff] %vm239_vm14, %v3879_v61  ;;  %v3733_v23 = vld [vmem:[%s3951_s5 + $0x1e8] sm:$0xff] }
 0x28c   : > { %v2122_v59 = vadd.f32 %v1966_v26, %v1965_v62  ;;  %v5192_v62 = vpop.permute.xlu2 %1732  ;;  %v1958_v26 = vsel %vm1830_vm9, %v3725_v41, 0.0  ;;  %243 = vst.msk [vmem:[%s5205_s22 + $0x18] sm:$0xff] %vm239_vm14, %v3879_v61  ;;  %vm1861_vm9 = vcmp.eq.s32.totalorder %v4961_v56, %v5084_v3 }
 0x28d   : > { %244 = vst.msk [vmem:[%s5205_s22 + $0x20] sm:$0xff] %vm239_vm14, %v3879_v61 }
 0x28e   : > { %245 = vst.msk [vmem:[%s5205_s22 + $0x28] sm:$0xff] %vm239_vm14, %v3879_v61 }
 0x28f   : > { %2114 = vadd.xlane.f32.xlu0 %v2113_v55  ;;  %v1955_v55 = vsel %vm1827_vm4, %v3720_v10, 0.0  ;;  %v2110_v10 = vadd.f32 %v1958_v26, %v1957_v13  ;;  %v1967_v13 = vsel %vm1839_vm1, %v3732_v8, 0.0  ;;  %246 = vst.msk [vmem:[%s5205_s22 + $0x30] sm:$0xff] %vm239_vm14, %v3879_v61  ;;  %v1968_v26 = vsel %vm1840_vm2, %v3733_v23, 0.0 }
 0x290   : > { %2093 = vadd.xlane.f32.xlu2 %v2092_v7  ;;  %v2107_v51 = vadd.f32 %v1956_v32, %v1955_v55  ;;  %v1971_v7 = vsel %vm1843_vm6, %v3722_v52, 0.0  ;;  %v5213_v55 = vpop.permute.xlu1 %1735  ;;  %v3728_v32 = vld [vmem:[%s3951_s5 + $0x230] sm:$0xff]  ;;  %vm1856_vm4 = vcmp.eq.s32.totalorder %v4966_v12, %v5054_v50  ;;  %247 = vst.msk [vmem:[%s5205_s22 + $0x38] sm:$0xff] %vm239_vm14, %v3879_v61  ;;  %vm1842_vm6 = vcmp.eq.s32.totalorder %v4966_v12, %v5034_v30 }
 0x291   : > { %248 = vst.msk [vmem:[%s5205_s22 + $0x40] sm:$0xff] %vm239_vm14, %v3879_v61  ;;  %v1969_v50 = vsel %vm1841_vm5, %v3736_v57, 0.0  ;;  %v3738_v30 = vld [vmem:[%s3951_s5 + $0x210] sm:$0xff]  ;;  %vm1868_vm1 = vcmp.eq.s32.totalorder %v4966_v12, %v5109_v54  ;;  %vm1853_vm2 = vcmp.eq.s32.totalorder %v4961_v56, %v5092_v6  ;;  %vm1858_vm5 = vcmp.eq.s32.totalorder %v4966_v12, %v5106_v17 }
 0x292   : > { %249 = vst.msk [vmem:[%s5205_s22 + $0x48] sm:$0xff] %vm239_vm14, %v3879_v61 }
 0x293   : > { %2099 = vadd.xlane.f32.xlu1 %v2098_v45  ;;  %v3723_v45 = vld [vmem:[%s3951_s5 + $0x208] sm:$0xff]  ;;  %v5258_v41 = vpop.permute.xlu0 %1756  ;;  %250 = vst.msk [vmem:[%s5205_s22 + $0x50] sm:$0xff] %vm239_vm14, %v3879_v61 }
 0x294   : > { %v1972_v11 = vsel %vm1844_vm7, %v3723_v45, 0.0  ;;  %v3731_v45 = vld [vmem:[%s3951_s5 + $0x1c8] sm:$0xff]  ;;  %vm1845_vm7 = vcmp.eq.s32.totalorder %v4961_v56, %v5046_v22  ;;  %251 = vst.msk [vmem:[%s5205_s22 + $0x58] sm:$0xff] %vm239_vm14, %v3879_v61 }
 0x295   : > { %v2131_v28 = vadd.f32 %v1972_v11, %v1971_v7  ;;  %v1963_v7 = vsel %vm1835_vm15, %v3730_v20, 0.0  ;;  %v1964_v1 = vsel %vm1836_vm0, %v3731_v45, 0.0  ;;  %v5248_v11 = vpop.permute.xlu2 %1741  ;;  %252 = vst.msk [vmem:[%s5205_s22 + $0x60] sm:$0xff] %vm239_vm14, %v3879_v61  ;;  %v1973_v45 = vsel %vm1845_vm7, %v3738_v30, 0.0 }
 0x296   : > { %253 = vst.msk [vmem:[%s5205_s22 + $0x68] sm:$0xff] %vm239_vm14, %v3879_v61  ;;  %vm1852_vm15 = vcmp.eq.s32.totalorder %v4966_v12, %v5076_v0  ;;  %vm1867_vm0 = vcmp.eq.s32.totalorder %v4961_v56, %v5109_v54  ;;  %vm1874_vm7 = vcmp.eq.s32.totalorder %v4966_v12, %v5138_v46 }
 0x297   : > { %2123 = vadd.xlane.f32.xlu0 %v2122_v59  ;;  %v3727_v59 = vld [vmem:[%s3951_s5 + $0x1b8] sm:$0xff]  ;;  %254 = vst.msk [vmem:[%s5205_s22 + $0x70] sm:$0xff] %vm239_vm14, %v3879_v61 }
 0x298   : > { %2102 = vadd.xlane.f32.xlu2 %v2101_v40  ;;  %v1962_v4 = vsel %vm1834_vm11, %v3727_v59, 0.0  ;;  %v1977_v40 = vsel %vm1849_vm12, %v3728_v32, 0.0  ;;  %v5283_v27 = vpop.permute.xlu1 %1744  ;;  %v1983_v59 = vsel %vm1855_vm3, %v3734_v2, 0.0  ;;  %v1393_v32 = vmul.f32 0.6931472, %v3490_v21  ;;  %255 = vst.msk [vmem:[%s5205_s22 + $0x78] sm:$0xff] %vm239_vm14, %v3879_v61 }
 0x299   : > { %v2116_v16 = vadd.f32 %v1962_v4, %v1961_v58  ;;  %v2125_v58 = vadd.f32 %v1968_v26, %v1967_v13  ;;  %v3735_v4 = vld [vmem:[%s3951_s5 + $0x268] sm:$0xff]  ;;  %256 = vst.msk [vmem:[%s5205_s22 + $0x80] sm:$0xff] %vm239_vm14, %v3879_v61  ;;  %vm1847_vm11 = vcmp.eq.s32.totalorder %v4961_v56, %v5062_v39  ;;  %vm1848_vm12 = vcmp.eq.s32.totalorder %v4966_v12, %v5062_v39  ;;  %v3740_v21 = vld [vmem:[%s3951_s5 + $0x290] sm:$0xff]  ;;  %v6693_v2 = vld [vmem:[#allocation49_spill] sm:$0xff] }
 0x29a   : > { %v5352_v22 = vadd.f32 %v1393_v32, %v4288_v35  ;;  %257 = vst.msk [vmem:[%s5205_s22 + $0x88] sm:$0xff] %vm239_vm14, %v3879_v61  ;;  %v1989_v60 = vsel %vm1861_vm9, %v3740_v21, 0.0  ;;  %v3742_v32 = vld [vmem:[%s3951_s5 + $0x220] sm:$0xff]  ;;  %vm1854_vm3 = vcmp.eq.s32.totalorder %v4966_v12, %v5092_v6  ;;  %vm1860_vm9 = vcmp.eq.s32.totalorder %v4966_v12, %v5120_v53 }
 0x29b   : > { %2108 = vadd.xlane.f32.xlu1 %v2107_v51  ;;  %v3729_v51 = vld [vmem:[%s3951_s5 + $0x238] sm:$0xff]  ;;  %v5346_v23 = vpop.permute.xlu0 %1765  ;;  %258 = vst.msk [vmem:[%s5205_s22 + $0x90] sm:$0xff] %vm239_vm14, %v3879_v61  ;;  %v1975_v57 = vsel %vm1847_vm11, %v3742_v32, 0.0  ;;  %v3744_v39 = vld [vmem:[%s3951_s5 + $0x240] sm:$0xff]  ;;  %vm1863_vm11 = vcmp.eq.s32.totalorder %v4961_v56, %v5131_v15 }
 0x29c   : > { %v1978_v52 = vsel %vm1850_vm13, %v3729_v51, 0.0  ;;  %vm1851_vm13 = vcmp.eq.s32.totalorder %v4961_v56, %v5076_v0  ;;  %259 = vst.msk [vmem:[%s5205_s22 + $0x98] sm:$0xff] %vm239_vm14, %v3879_v61 }
 0x29d   : > { %v2140_v34 = vadd.f32 %v1978_v52, %v1977_v40  ;;  %v3737_v40 = vld [vmem:[%s3951_s5 + $0x1f8] sm:$0xff]  ;;  %260 = vst.msk [vmem:[%s5205_s22 + $0xa0] sm:$0xff] %vm239_vm14, %v3879_v61 }
 0x29e   : > { %v1970_v36 = vsel %vm1842_vm6, %v3737_v40, 0.0  ;;  %261 = vst.msk [vmem:[%s5205_s22 + $0xa8] sm:$0xff] %vm239_vm14, %v3879_v61  ;;  %vm1873_vm6 = vcmp.eq.s32.totalorder %v4961_v56, %v5138_v46  ;;  %v2552_v46 = vld [vmem:[%s5205_s22 + $0x8] sm:$0xff] }
 0x29f   : > { %2132 = vadd.xlane.f32.xlu0 %v2131_v28  ;;  %v2119_v28 = vadd.f32 %v1964_v1, %v1963_v7  ;;  %v1401_v7 = vmul.f32 0.6931472, %v3494_v44  ;;  %v5329_v1 = vpop.permute.xlu2 %1750  ;;  %v2128_v13 = vadd.f32 %v1970_v36, %v1969_v50  ;;  %v1990_v44 = vsel %vm1862_vm10, %v3741_v37, 0.0  ;;  %v3743_v50 = vld [vmem:[%s3951_s5 + $0x228] sm:$0xff]  ;;  %262 = vst.msk [vmem:[%s5205_s22 + $0xb0] sm:$0xff] %vm239_vm14, %v3879_v61 }
 0x2a0   : > { %2111 = vadd.xlane.f32.xlu2 %v2110_v10  ;;  %v1984_v10 = vsel %vm1856_vm4, %v3735_v4, 0.0  ;;  %v5376_v9 = vpop.permute.xlu1 %1753  ;;  %v2158_v36 = vadd.f32 %v1990_v44, %v1989_v60  ;;  %263 = vst.msk [vmem:[%s5205_s22 + $0xb8] sm:$0xff] %vm239_vm14, %v3879_v61  ;;  %vm1857_vm4 = vcmp.eq.s32.totalorder %v4961_v56, %v5106_v17  ;;  %v5465_v44 = vstv %s2845_s23  ;;  %v6702_v17 = vld [vmem:[#allocation52_spill] sm:$0xff] }
 0x2a1   : > { %v2149_v51 = vadd.f32 %v1984_v10, %v1983_v59  ;;  %v5379_v59 = vadd.f32 %v1395_v29, %v6693_v2  ;;  %v5388_v4 = vadd.f32 %v1401_v7, %v4284_v33  ;;  %v6694_v7 = vlaneseq  ;;  %264 = vst.msk [vmem:[%s5205_s22 + $0xc0] sm:$0xff] %vm239_vm14, %v3879_v61  ;;  %v3748_v2 = vld [vmem:[%s3951_s5 + $0x250] sm:$0xff] }
 0x2a2   : > { %265 = vst.msk [vmem:[%s5205_s22 + $0xc8] sm:$0xff] %vm239_vm14, %v3879_v61 }
 0x2a3   : > { %2117 = vadd.xlane.f32.xlu1 %v2116_v16  ;;  %v3496_v16 = vpop.eup %3495  ;;  %v5415_v30 = vshrl.u32 %v6694_v7, 7  ;;  %266 = vst.msk [vmem:[%s5205_s22 + $0xd0] sm:$0xff] %vm239_vm14, %v3879_v61 }
 0x2a4   : > { %v3498_v52 = vpop.eup %3497  ;;  %v1399_v20 = vmul.f32 0.6931472, %v3496_v16  ;;  %267 = vst.msk [vmem:[%s5205_s22 + $0xd8] sm:$0xff] %vm239_vm14, %v3879_v61 }
 0x2a5   : > { %v3500_v5 = vpop.eup %3499  ;;  %v2231_v21 = vadd.s32 8, %v5415_v30  ;;  %268 = vst.msk [vmem:[%s5205_s22 + $0xe0] sm:$0xff] %vm239_vm14, %v3879_v61 }
 0x2a6   : > { %v3502_v42 = vpop.eup %3501  ;;  %v5385_v3 = vadd.f32 %v1399_v20, %v4298_v43  ;;  %v1407_v16 = vmul.f32 0.6931472, %v3500_v5  ;;  %v1976_v43 = vsel %vm1848_vm12, %v3743_v50, 0.0  ;;  %v1979_v20 = vsel %vm1851_vm13, %v3744_v39, 0.0  ;;  %269 = vst.msk [vmem:[%s5205_s22 + $0xe8] sm:$0xff] %vm239_vm14, %v3879_v61 }
 0x2a7   : > { %2141 = vadd.xlane.f32.xlu0 %v2140_v34  ;;  %v3739_v34 = vld [vmem:[%s3951_s5 + $0x218] sm:$0xff]  ;;  %v3504_v26 = vpop.eup %3503  ;;  %v1405_v33 = vmul.f32 0.6931472, %v3502_v42  ;;  %v2137_v18 = vadd.f32 %v1976_v43, %v1975_v57  ;;  %v5432_v0 = vpop.permute.xlu2 %1759  ;;  %270 = vst.msk [vmem:[%s5205_s22 + $0xf0] sm:$0xff] %vm239_vm14, %v3879_v61  ;;  %vm1864_vm12 = vcmp.eq.s32.totalorder %v4966_v12, %v5131_v15  ;;  %vm1869_vm13 = vcmp.eq.s32.totalorder %v4961_v56, %v5160_v38  ;;  %v6708_v15 = vld [vmem:[#allocation55_spill] sm:$0xff] }
 0x2a8   : > { %2120 = vadd.xlane.f32.xlu2 %v2119_v28  ;;  %v1974_v8 = vsel %vm1846_vm8, %v3739_v34, 0.0  ;;  %v1397_v28 = vmul.f32 0.6931472, %v3498_v52  ;;  %v3506_v49 = vpop.eup %3505  ;;  %v1403_v40 = vmul.f32 0.6931472, %v3504_v26  ;;  %v5439_v42 = vadd.f32 %v1407_v16, %v4310_v25  ;;  %v3749_v16 = vld [vmem:[%s3951_s5 + $0x258] sm:$0xff]  ;;  %v5484_v50 = vpop.permute.xlu1 %1762 }
 0x2a9   : > { %v2134_v35 = vadd.f32 %v1974_v8, %v1973_v45  ;;  %v1413_v52 = vmul.f32 0.6931472, %v3506_v49  ;;  %v1996_v49 = vsel %vm1868_vm1, %v3747_v31, 0.0  ;;  %v1982_v32 = vsel %vm1854_vm3, %v3749_v16, 0.0  ;;  %v6696_v43 = vld [vmem:[#allocation48_spill] sm:$0xff]  ;;  %271 = vst.msk [vmem:[%s5205_s22 + $0xf8] sm:$0xff] %vm239_vm14, %v3879_v61 }
 0x2aa   : > { %v5407_v29 = vadd.f32 %v1397_v28, %v4286_v24  ;;  %v3745_v24 = vld [vmem:[%s3951_s5 + $0x248] sm:$0xff]  ;;  %v3746_v28 = vld [vmem:[%s3951_s5 + $0x2c0] sm:$0xff]  ;;  %272 = vst.msk [vmem:[%s5205_s22 + $0x100] sm:$0xff] %vm239_vm14, %v3879_v61  ;;  %vm1859_vm8 = vcmp.eq.s32.totalorder %v4961_v56, %v5120_v53  ;;  %v3752_v16 = vld [vmem:[%s3951_s5 + $0x2f0] sm:$0xff]  ;;  %vm1880_vm1 = vcmp.eq.s32.totalorder %v4966_v12, %v5168_v14  ;;  %vm1866_vm3 = vcmp.eq.s32.totalorder %v4966_v12, %v5148_v47 }
 0x2ab   : > { %2126 = vadd.xlane.f32.xlu1 %v2125_v58  ;;  %v3508_v58 = vpop.eup %3507  ;;  %v1980_v5 = vsel %vm1852_vm15, %v3745_v24, 0.0  ;;  %v1995_v25 = vsel %vm1867_vm0, %v3746_v28, 0.0  ;;  %v6703_v31 = vld [vmem:[#allocation57_spill] sm:$0xff]  ;;  %273 = vst.msk [vmem:[%s5205_s22 + $0x108] sm:$0xff] %vm239_vm14, %v3879_v61  ;;  %vm1870_vm15 = vcmp.eq.s32.totalorder %v4966_v12, %v5160_v38  ;;  %vm1879_vm0 = vcmp.eq.s32.totalorder %v4961_v56, %v5168_v14 }
 0x2ac   : > { %v3510_v10 = vpop.eup %3509  ;;  %v1411_v8 = vmul.f32 0.6931472, %v3508_v58  ;;  %v2143_v48 = vadd.f32 %v1980_v5, %v1979_v20  ;;  %v6695_v58 = vld [vmem:[#allocation37_spill] sm:$0xff]  ;;  %v2167_v57 = vadd.f32 %v1996_v49, %v1995_v25  ;;  %v2296_v5 = vadd.s32 %v5465_v44, %v2231_v21  ;;  %v6704_v21 = vld [vmem:[#allocation56_spill] sm:$0xff]  ;;  %274 = vst.msk [vmem:[%s5205_s22 + $0x110] sm:$0xff] %vm239_vm14, %v3879_v61 }
 0x2ad   : > { %3523 = vlog2.f32 %v6695_v58  ;;  %v6698_v20 = vld [vmem:[#allocation53_spill] sm:$0xff]  ;;  %275 = vst.msk [vmem:[%s5205_s22 + $0x118] sm:$0xff] %vm239_vm14, %v3879_v61 }
 0x2ae   : > { %v5496_v6 = vadd.f32 %v1413_v52, %v6698_v20  ;;  %vm2360_vm10 = vcmp.lt.s32.totalorder %v2296_v5, 512  ;;  %v6705_v20 = vld [vmem:[#allocation44_spill] sm:$0xff]  ;;  %276 = vst.msk [vmem:[%s5205_s22 + $0x120] sm:$0xff] %vm239_vm14, %v3879_v61 }
 0x2af   : > { %2150 = vadd.xlane.f32.xlu0 %v2149_v51  ;;  %v3512_v51 = vpop.eup %3511  ;;  %277 = vst.msk [vmem:[%s5205_s22 + $0x128] sm:$0xff] %vm239_vm14, %v3879_v61 }
 0x2b0   : > { %2129 = vadd.xlane.f32.xlu2 %v2128_v13  ;;  %v3514_v45 = vpop.eup %3513  ;;  %v1409_v13 = vmul.f32 0.6931472, %v3510_v10  ;;  %v1419_v26 = vmul.f32 0.6931472, %v3512_v51  ;;  %v1981_v10 = vsel %vm1853_vm2, %v3748_v2, 0.0  ;;  %v6697_v51 = vld [vmem:[#allocation51_spill] sm:$0xff]  ;;  %vm1865_vm2 = vcmp.eq.s32.totalorder %v4961_v56, %v5148_v47 }
 0x2b1   : > { %v3516_v34 = vpop.eup %3515  ;;  %v1417_v60 = vmul.f32 0.6931472, %v3514_v45  ;;  %v5493_v39 = vadd.f32 %v1405_v33, %v6697_v51  ;;  %v3750_v45 = vld [vmem:[%s3951_s5 + $0x270] sm:$0xff]  ;;  %v6700_v33 = vld [vmem:[#allocation54_spill] sm:$0xff]  ;;  %v2146_v25 = vadd.f32 %v1982_v32, %v1981_v10  ;;  %278 = vst.msk [vmem:[%s5205_s22 + $0x130] sm:$0xff] %vm239_vm14, %v3879_v61 }
 0x2b2   : > { %v1415_v37 = vmul.f32 0.6931472, %v3516_v34  ;;  %v3518_v54 = vpop.eup %3517  ;;  %v1985_v24 = vsel %vm1857_vm4, %v3750_v45, 0.0  ;;  %v5510_v34 = vadd.f32 %v1411_v8, %v6700_v33  ;;  %v6701_v8 = vld [vmem:[#allocation41_spill] sm:$0xff]  ;;  %v5534_v58 = vadd.f32 %v1419_v26, %v6704_v21  ;;  %v6706_v45 = vld [vmem:[#allocation42_spill] sm:$0xff]  ;;  %279 = vst.msk [vmem:[%s5205_s22 + $0x138] sm:$0xff] %vm239_vm14, %v3879_v61 }
 0x2b3   : > { %2135 = vadd.xlane.f32.xlu1 %v2134_v35  ;;  %v5457_v35 = vpop.permute.xlu0 %1774  ;;  %v3520_v7 = vpop.eup %3519  ;;  %3525 = vlog2.f32 %v6701_v8  ;;  %v5531_v49 = vadd.f32 %v1417_v60, %v6703_v31  ;;  %v1425_v2 = vmul.f32 0.6931472, %v3518_v54  ;;  %v2001_v26 = vsel %vm1873_vm6, %v3752_v16, 0.0  ;;  %v3753_v54 = vld [vmem:[%s3951_s5 + $0x2f8] sm:$0xff]  ;;  %v3755_v33 = vld [vmem:[%s3951_s5 + $0x288] sm:$0xff]  ;;  %v3756_v31 = vld [vmem:[%s3951_s5 + $0x2a0] sm:$0xff] }
 0x2b4   : > { %v3522_v52 = vpop.eup %3521  ;;  %v1423_v10 = vmul.f32 0.6931472, %v3520_v7  ;;  %v2002_v32 = vsel %vm1874_vm7, %v3753_v54, 0.0  ;;  %3527 = vlog2.f32 %v6705_v20  ;;  %v1991_v53 = vsel %vm1863_vm11, %v3756_v31, 0.0  ;;  %v3757_v21 = vld [vmem:[%s3951_s5 + $0x2a8] sm:$0xff]  ;;  %v3758_v20 = vld [vmem:[%s3951_s5 + $0x2d0] sm:$0xff] }
 0x2b5   : > { %v3524_v60 = vpop.eup %3523  ;;  %v1421_v51 = vmul.f32 0.6931472, %v3522_v52  ;;  %3529 = vlog2.f32 %v6706_v45  ;;  %vm1875_vm4 = vcmp.eq.s32.totalorder %v4961_v56, %v5192_v62  ;;  %280 = vst.msk [vmem:[%s5205_s22 + $0x140] sm:$0xff] %vm239_vm14, %v3879_v61  ;;  %v6711_v31 = vld [vmem:[#allocation58_spill] sm:$0xff]  ;;  %vm1881_vm6 = vcmp.eq.s32.totalorder %v4961_v56, %v5248_v11 }
 0x2b6   : > { %v1427_v52 = vmul.f32 0.6931472, %v3524_v60  ;;  %281 = vst.msk [vmem:[%s5205_s22 + $0x148] sm:$0xff] %vm239_vm14, %v3879_v61  ;;  %vm1882_vm7 = vcmp.eq.s32.totalorder %v4966_v12, %v5248_v11  ;;  %vm1886_vm11 = vcmp.eq.s32.totalorder %v4966_v12, %v5200_v63 }
 0x2b7   : > { %2159 = vadd.xlane.f32.xlu0 %v2158_v36  ;;  %v5490_v36 = vadd.f32 %v1403_v40, %v6696_v43  ;;  %v6699_v40 = vld [vmem:[#allocation50_spill] sm:$0xff]  ;;  %v5616_v16 = vadd.f32 %v1421_v51, %v6708_v15  ;;  %282 = vst.msk [vmem:[%s5205_s22 + $0x150] sm:$0xff] %vm239_vm14, %v3879_v61 }
 0x2b8   : > { %2138 = vadd.xlane.f32.xlu2 %v2137_v18  ;;  %v5507_v18 = vadd.f32 %v1409_v13, %v6699_v40  ;;  %v5528_v13 = vadd.f32 %v1415_v37, %v6702_v17  ;;  %283 = vst.msk [vmem:[%s5205_s22 + $0x158] sm:$0xff] %vm239_vm14, %v3879_v61 }
 0x2b9   : > { %v3526_v17 = vpop.eup %3525  ;;  %284 = vst.msk [vmem:[%s5205_s22 + $0x160] sm:$0xff] %vm239_vm14, %v3879_v61 }
 0x2ba   : > { %285 = vst.msk [vmem:[%s5205_s22 + $0x168] sm:$0xff] %vm239_vm14, %v3879_v61 }
 0x2bb   : > { %2144 = vadd.xlane.f32.xlu1 %v2143_v48  ;;  %v3751_v48 = vld [vmem:[%s3951_s5 + $0x278] sm:$0xff]  ;;  %286 = vst.msk [vmem:[%s5205_s22 + $0x170] sm:$0xff] %vm239_vm14, %v3879_v61 }
 0x2bc   : > { %v1986_v28 = vsel %vm1858_vm5, %v3751_v48, 0.0  ;;  %v2176_v48 = vadd.f32 %v2002_v32, %v2001_v26  ;;  %v6709_v26 = vld [vmem:[#allocation59_spill] sm:$0xff]  ;;  %v3528_v32 = vpop.eup %3527  ;;  %vm1876_vm5 = vcmp.eq.s32.totalorder %v4966_v12, %v5192_v62  ;;  %v2235_v62 = vadd.s32 40, %v5415_v30  ;;  %287 = vst.msk [vmem:[%s5205_s22 + $0x178] sm:$0xff] %vm239_vm14, %v3879_v61 }
 0x2bd   : > { %v2152_v37 = vadd.f32 %v1986_v28, %v1985_v24  ;;  %v3754_v24 = vld [vmem:[%s3951_s5 + $0x280] sm:$0xff]  ;;  %v5619_v54 = vadd.f32 %v1425_v2, %v6709_v26  ;;  %v5636_v2 = vpop.eup %3529  ;;  %288 = vst.msk [vmem:[%s5205_s22 + $0x180] sm:$0xff] %vm239_vm14, %v3879_v61 }
 0x2be   : > { %v1987_v40 = vsel %vm1859_vm8, %v3754_v24, 0.0  ;;  %v3760_v24 = vld [vmem:[%s3951_s5 + $0x320] sm:$0xff]  ;;  %vm1871_vm8 = vcmp.eq.s32.totalorder %v4961_v56, %v5177_v19  ;;  %289 = vst.msk [vmem:[%s5205_s22 + $0x188] sm:$0xff] %vm239_vm14, %v3879_v61 }
 0x2bf   : > { %2168 = vadd.xlane.f32.xlu0 %v2167_v57  ;;  %v5551_v57 = vpop.permute.xlu2 %1768  ;;  %v2007_v38 = vsel %vm1879_vm0, %v3760_v24, 0.0  ;;  %vm1892_vm0 = vcmp.eq.s32.totalorder %v4966_v12, %v5258_v41  ;;  %290 = vst.msk [vmem:[%s5205_s22 + $0x190] sm:$0xff] %vm239_vm14, %v3879_v61 }
 0x2c0   : > { %2147 = vadd.xlane.f32.xlu2 %v2146_v25  ;;  %v6707_v25 = vld [vmem:[#allocation60_spill] sm:$0xff]  ;;  %291 = vst.msk [vmem:[%s5205_s22 + $0x198] sm:$0xff] %vm239_vm14, %v3879_v61 }
 0x2c1   : > { %v5583_v8 = vadd.f32 %v1423_v10, %v6707_v25  ;;  %v1992_v10 = vsel %vm1864_vm12, %v3757_v21, 0.0  ;;  %v6712_v21 = vld [vmem:[#allocation47_spill] sm:$0xff]  ;;  %vm1877_vm12 = vcmp.eq.s32.totalorder %v4961_v56, %v5213_v55  ;;  %292 = vst.msk [vmem:[%s5205_s22 + $0x1a0] sm:$0xff] %vm239_vm14, %v3879_v61 }
 0x2c2   : > { %v2040_v43 = vpop.xlane.xlu0 %2039  ;;  %v2161_v45 = vadd.f32 %v1992_v10, %v1991_v53  ;;  %v5666_v53 = vadd.f32 %v1427_v52, %v6711_v31  ;;  %v3765_v52 = vld [vmem:[%s3951_s5 + $0x308] sm:$0xff]  ;;  %v3771_v31 = vld [vmem:[%s3951_s5 + $0x358] sm:$0xff]  ;;  %293 = vst.msk [vmem:[%s5205_s22 + $0x1a8] sm:$0xff] %vm239_vm14, %v3879_v61 }
 0x2c3   : > { %v2424_v7 = vsub.f32 %v5379_v59, %v2040_v43  ;;  %v1988_v59 = vsel %vm1860_vm9, %v3755_v33, 0.0  ;;  %2153 = vadd.xlane.f32.xlu1 %v2152_v37  ;;  %v5604_v37 = vpop.permute.xlu1 %1771  ;;  %v5621_v43 = vmul.f32 0.6931472, %v3526_v17  ;;  %v3763_v17 = vld [vmem:[%s3951_s5 + $0x2b8] sm:$0xff]  ;;  %v2004_v26 = vsel %vm1876_vm5, %v3765_v52, 0.0  ;;  %294 = vst.msk [vmem:[%s5205_s22 + $0x1b0] sm:$0xff] %vm239_vm14, %v3879_v61 }
 0x2c4   : > { %v2155_v60 = vadd.f32 %v1988_v59, %v1987_v40  ;;  %v3761_v40 = vld [vmem:[%s3951_s5 + $0x328] sm:$0xff]  ;;  %v1994_v14 = vsel %vm1866_vm3, %v3763_v17, 0.0  ;;  %vm1872_vm9 = vcmp.eq.s32.totalorder %v4966_v12, %v5177_v19  ;;  %v2238_v17 = vadd.s32 64, %v5415_v30  ;;  %v3773_v52 = vld [vmem:[%s3951_s5 + $0x318] sm:$0xff]  ;;  %295 = vst.msk [vmem:[%s5205_s22 + $0x1b8] sm:$0xff] %vm239_vm14, %v3879_v61 }
 0x2c5   : > { %v2488_v28 = vsel %vm2360_vm10, %v2424_v7, 0.0  ;;  %v1997_v7 = vsel %vm1869_vm13, %v3758_v20, 0.0  ;;  %v2008_v33 = vsel %vm1880_vm1, %v3761_v40, 0.0  ;;  %vm1885_vm10 = vcmp.eq.s32.totalorder %v4961_v56, %v5200_v63  ;;  %v3768_v40 = vld [vmem:[%s3951_s5 + $0x2e0] sm:$0xff]  ;;  %296 = vst.msk [vmem:[%s5205_s22 + $0x1c0] sm:$0xff] %vm239_vm14, %v3879_v61 }
 0x2c6   : > { %v2616_v5 = vadd.f32 %v2552_v46, %v2488_v28  ;;  %v3759_v46 = vld [vmem:[%s3951_s5 + $0x2d8] sm:$0xff]  ;;  %v3762_v28 = vld [vmem:[%s3951_s5 + $0x2b0] sm:$0xff]  ;;  %vm1878_vm13 = vcmp.eq.s32.totalorder %v4966_v12, %v5213_v55  ;;  %v1999_v11 = vsel %vm1871_vm8, %v3768_v40, 0.0  ;;  %v2014_v19 = vsel %vm1886_vm11, %v3771_v31, 0.0  ;;  %v3775_v40 = vld [vmem:[%s3951_s5 + $0x388] sm:$0xff]  ;;  %297 = vst.msk [vmem:[%s5205_s22 + $0x1c8] sm:$0xff] %vm239_vm14, %v3879_v61 }
 0x2c7   : > { %2177 = vadd.xlane.f32.xlu0 %v2176_v48  ;;  %v1998_v51 = vsel %vm1870_vm15, %v3759_v46, 0.0  ;;  %v6710_v48 = vld [vmem:[#allocation38_spill] sm:$0xff]  ;;  %v1993_v25 = vsel %vm1865_vm2, %v3762_v28, 0.0  ;;  %v5675_v47 = vpop.permute.xlu2 %1777  ;;  %v3766_v46 = vld [vmem:[%s3951_s5 + $0x330] sm:$0xff]  ;;  %vm1891_vm15 = vcmp.eq.s32.totalorder %v4961_v56, %v5258_v41  ;;  %v2300_v55 = vadd.s32 %v5465_v44, %v2235_v62  ;;  %298 = vst.msk [vmem:[%s5205_s22 + $0x1d0] sm:$0xff] %vm239_vm14, %v3879_v61 }
 0x2c8   : > { %2681 = vst.msk [vmem:[%s5205_s22 + $0x8] sm:$0xff] %vm239_vm14, %v2616_v5  ;;  %2156 = vadd.xlane.f32.xlu2 %v2155_v60  ;;  %3531 = vlog2.f32 %v6710_v48  ;;  %v5668_v5 = vmul.f32 0.6931472, %v3528_v32  ;;  %v2170_v10 = vadd.f32 %v1998_v51, %v1997_v7  ;;  %v3764_v60 = vld [vmem:[%s3951_s5 + $0x300] sm:$0xff]  ;;  %v2185_v32 = vadd.f32 %v2008_v33, %v2007_v38  ;;  %v3769_v33 = vld [vmem:[%s3951_s5 + $0x2e8] sm:$0xff]  ;;  %v3770_v28 = vld [vmem:[%s3951_s5 + $0x350] sm:$0xff] }
 0x2c9   : > { %3533 = vlog2.f32 %v6712_v21  ;;  %v2003_v15 = vsel %vm1875_vm4, %v3764_v60, 0.0  ;;  %v2164_v20 = vadd.f32 %v1994_v14, %v1993_v25  ;;  %v2009_v51 = vsel %vm1881_vm6, %v3766_v46, 0.0  ;;  %v3772_v21 = vld [vmem:[%s3951_s5 + $0x310] sm:$0xff]  ;;  %299 = vst.msk [vmem:[%s5205_s22 + $0x1d8] sm:$0xff] %vm239_vm14, %v3879_v61 }
 0x2ca   : > { %v5651_v59 = vpop.xlane.xlu0 %2051  ;;  %v2000_v48 = vsel %vm1872_vm9, %v3769_v33, 0.0  ;;  %v2013_v25 = vsel %vm1885_vm10, %v3770_v28, 0.0  ;;  %v2005_v60 = vsel %vm1877_vm12, %v3772_v21, 0.0  ;;  %v2232_v46 = vadd.s32 16, %v5415_v30  ;;  %300 = vst.msk [vmem:[%s5205_s22 + $0x1e0] sm:$0xff] %vm239_vm14, %v3879_v61 }
 0x2cb   : > { %2162 = vadd.xlane.f32.xlu1 %v2161_v45  ;;  %v3767_v45 = vld [vmem:[%s3951_s5 + $0x338] sm:$0xff]  ;;  %v2020_v33 = vsel %vm1892_vm0, %v3775_v40, 0.0  ;;  %v2233_v28 = vadd.s32 24, %v5415_v30  ;;  %v2179_v31 = vadd.f32 %v2004_v26, %v2003_v15  ;;  %v2173_v40 = vadd.f32 %v2000_v48, %v1999_v11  ;;  %301 = vst.msk [vmem:[%s5205_s22 + $0x1e8] sm:$0xff] %vm239_vm14, %v3879_v61 }
 0x2cc   : > { %v2010_v24 = vsel %vm1882_vm7, %v3767_v45, 0.0  ;;  %v3774_v45 = vld [vmem:[%s3951_s5 + $0x380] sm:$0xff]  ;;  %v2303_v15 = vadd.s32 %v5465_v44, %v2238_v17  ;;  %v2234_v26 = vadd.s32 32, %v5415_v30  ;;  %vm2364_vm1 = vcmp.lt.s32.totalorder %v2300_v55, 512  ;;  %302 = vst.msk [vmem:[%s5205_s22 + $0x1f0] sm:$0xff] %vm239_vm14, %v3879_v61 }
 0x2cd   : > { %v2019_v63 = vsel %vm1891_vm15, %v3774_v45, 0.0  ;;  %v5776_v21 = vadd.f32 %v2010_v24, %v2009_v51  ;;  %v2241_v45 = vadd.s32 88, %v5415_v30  ;;  %v2297_v24 = vadd.s32 %v5465_v44, %v2232_v46  ;;  %303 = vst.msk [vmem:[%s5205_s22 + $0x1f8] sm:$0xff] %vm239_vm14, %v3879_v61 }
 0x2ce   : > { %v5710_v7 = vpop.xlane.xlu1 %2036  ;;  %v5727_v38 = vpop.eup %3531  ;;  %v2203_v51 = vadd.f32 %v2020_v33, %v2019_v63  ;;  %v2298_v48 = vadd.s32 %v5465_v44, %v2233_v28  ;;  %v2236_v17 = vadd.s32 48, %v5415_v30  ;;  %vm1883_vm2 = vcmp.eq.s32.totalorder %v4961_v56, %v5283_v27  ;;  %v2559_v33 = vld [vmem:[%s5205_s22 + $0x40] sm:$0xff] }
 0x2cf   : > { %2186 = vadd.xlane.f32.xlu0 %v2185_v32  ;;  %6713 = vst [vmem:[#allocation49_spill] sm:$0xff] %v5727_v38  ;;  %v5745_v14 = vpop.eup %3533  ;;  %v2006_v32 = vsel %vm1878_vm13, %v3773_v52, 0.0  ;;  %v2295_v52 = vadd.s32 %v5465_v44, %v5415_v30  ;;  %v2194_v38 = vadd.f32 %v2014_v19, %v2013_v25  ;;  %v2423_v11 = vsub.f32 %v5352_v22, %v5710_v7 }
 0x2d0   : > { %2165 = vadd.xlane.f32.xlu2 %v2164_v20  ;;  %v5789_v62 = vadd.f32 %v2006_v32, %v2005_v60  ;;  %vm1887_vm4 = vcmp.eq.s32.totalorder %v4961_v56, %v5329_v1  ;;  %vm1884_vm5 = vcmp.eq.s32.totalorder %v4966_v12, %v5283_v27  ;;  %vm2367_vm6 = vcmp.lt.s32.totalorder %v2303_v15, 512  ;;  %v2554_v15 = vld [vmem:[%s5205_s22 + $0x18] sm:$0xff] }
 0x2d1   : > { %vm2359_vm3 = vcmp.lt.s32.totalorder %v2295_v52, 512  ;;  %v2299_v7 = vadd.s32 %v5465_v44, %v2234_v26  ;;  %vm1888_vm7 = vcmp.eq.s32.totalorder %v4966_v12, %v5329_v1  ;;  %vm2361_vm8 = vcmp.lt.s32.totalorder %v2297_v24, 512  ;;  %v2562_v24 = vld [vmem:[%s5205_s22 + $0x58] sm:$0xff] }
 0x2d2   : > { %v2061_v20 = vpop.xlane.xlu0 %2060  ;;  %v2487_v32 = vsel %vm2359_vm3, %v2423_v11, 0.0  ;;  %vm2362_vm9 = vcmp.lt.s32.totalorder %v2298_v48, 512  ;;  %v2301_v63 = vadd.s32 %v5465_v44, %v2236_v17  ;;  %vm1897_vm10 = vcmp.eq.s32.totalorder %v4961_v56, %v5346_v23 }
 0x2d3   : > { %2171 = vadd.xlane.f32.xlu1 %v2170_v10  ;;  %v2043_v41 = vpop.xlane.xlu2 %2042  ;;  %v2428_v10 = vsub.f32 %v5490_v36, %v5651_v59  ;;  %v2431_v36 = vsub.f32 %v5507_v18, %v2061_v20  ;;  %v2306_v59 = vadd.s32 %v5465_v44, %v2241_v45  ;;  %v2551_v20 = vld [vmem:[%s5205_s22] sm:$0xff]  ;;  %v2237_v28 = vadd.s32 56, %v5415_v30 }
 0x2d4   : > { %v2425_v22 = vsub.f32 %v5407_v29, %v2043_v41  ;;  %v2244_v29 = vadd.s32 112, %v5415_v30  ;;  %v2553_v41 = vld [vmem:[%s5205_s22 + $0x10] sm:$0xff]  ;;  %vm2363_vm12 = vcmp.lt.s32.totalorder %v2299_v7, 512  ;;  %vm1898_vm13 = vcmp.eq.s32.totalorder %v4966_v12, %v5346_v23  ;;  %v3779_v23 = vld [vmem:[%s3951_s5 + $0x348] sm:$0xff] }
 0x2d5   : > { %v2492_v18 = vsel %vm2364_vm1, %v2428_v10, 0.0  ;;  %vm2370_vm11 = vcmp.lt.s32.totalorder %v2306_v59, 512  ;;  %vm2365_vm15 = vcmp.lt.s32.totalorder %v2301_v63, 512  ;;  %v2239_v48 = vadd.s32 72, %v5415_v30 }
 0x2d6   : > { %v2046_v25 = vpop.xlane.xlu1 %2045  ;;  %v2489_v52 = vsel %vm2361_vm8, %v2425_v22, 0.0  ;;  %v2309_v26 = vadd.s32 %v5465_v44, %v2244_v29  ;;  %v2302_v22 = vadd.s32 %v5465_v44, %v2237_v28  ;;  %v3780_v28 = vld [vmem:[%s3951_s5 + $0x360] sm:$0xff]  ;;  %vm1904_vm3 = vcmp.eq.s32.totalorder %v4966_v12, %v5457_v35 }
 0x2d7   : > { %2195 = vadd.xlane.f32.xlu0 %v2194_v38  ;;  %v2556_v38 = vld [vmem:[%s5205_s22 + $0x28] sm:$0xff]  ;;  %v2426_v19 = vsub.f32 %v5385_v3, %v2046_v25  ;;  %v2495_v3 = vsel %vm2367_vm6, %v2431_v36, 0.0  ;;  %v2617_v25 = vadd.f32 %v2553_v41, %v2489_v52  ;;  %v2555_v36 = vld [vmem:[%s5205_s22 + $0x20] sm:$0xff]  ;;  %v2304_v63 = vadd.s32 %v5465_v44, %v2239_v48 }
 0x2d8   : > { %2174 = vadd.xlane.f32.xlu2 %v2173_v40  ;;  %v2623_v10 = vadd.f32 %v2559_v33, %v2495_v3  ;;  %vm2373_vm0 = vcmp.lt.s32.totalorder %v2309_v26, 512  ;;  %v2012_v3 = vsel %vm1884_vm5, %v3779_v23, 0.0  ;;  %vm2366_vm1 = vcmp.lt.s32.totalorder %v2302_v22, 512  ;;  %v3781_v41 = vld [vmem:[%s3951_s5 + $0x368] sm:$0xff] }
 0x2d9   : > { %v2490_v40 = vsel %vm2362_vm9, %v2426_v19, 0.0  ;;  %v3778_v19 = vld [vmem:[%s3951_s5 + $0x3b8] sm:$0xff]  ;;  %2682 = vst.msk [vmem:[%s5205_s22 + $0x10] sm:$0xff] %vm239_vm14, %v2617_v25  ;;  %vm1893_vm5 = vcmp.eq.s32.totalorder %v4961_v56, %v5432_v0  ;;  %vm1889_vm6 = vcmp.eq.s32.totalorder %v4961_v56, %v5376_v9  ;;  %vm1894_vm9 = vcmp.eq.s32.totalorder %v4966_v12, %v5432_v0 }
 0x2da   : > { %v2070_v60 = vpop.xlane.xlu0 %2069  ;;  %v2026_v7 = vsel %vm1898_vm13, %v3778_v19, 0.0  ;;  %2688 = vst.msk [vmem:[%s5205_s22 + $0x40] sm:$0xff] %vm239_vm14, %v2623_v10  ;;  %v2558_v10 = vld [vmem:[%s5205_s22 + $0x38] sm:$0xff]  ;;  %vm1896_vm13 = vcmp.eq.s32.totalorder %v4966_v12, %v5484_v50 }
 0x2db   : > { %v2434_v46 = vsub.f32 %v5528_v13, %v2070_v60  ;;  %2180 = vadd.xlane.f32.xlu1 %v2179_v31  ;;  %v2049_v55 = vpop.xlane.xlu2 %2048  ;;  %v2620_v13 = vadd.f32 %v2556_v38, %v2492_v18  ;;  %v2615_v31 = vadd.f32 %v2551_v20, %v2487_v32  ;;  %v3776_v18 = vld [vmem:[%s3951_s5 + $0x340] sm:$0xff]  ;;  %v3777_v38 = vld [vmem:[%s3951_s5 + $0x3b0] sm:$0xff] }
 0x2dc   : > { %v2427_v45 = vsub.f32 %v5388_v4, %v2049_v55  ;;  %v2025_v61 = vsel %vm1897_vm10, %v3777_v38, 0.0  ;;  %v2557_v60 = vld [vmem:[%s5205_s22 + $0x30] sm:$0xff] }
 0x2dd   : > { %v2498_v4 = vsel %vm2370_vm11, %v2434_v46, 0.0  ;;  %2685 = vst.msk [vmem:[%s5205_s22 + $0x28] sm:$0xff] %vm239_vm14, %v2620_v13  ;;  %v2247_v46 = vadd.s32 136, %v5415_v30  ;;  %v2565_v55 = vld [vmem:[%s5205_s22 + $0x70] sm:$0xff]  ;;  %v2015_v13 = vsel %vm1887_vm4, %v3780_v28, 0.0  ;;  %vm2368_vm4 = vcmp.lt.s32.totalorder %v2304_v63, 512 }
 0x2de   : > { %v2055_v11 = vpop.xlane.xlu1 %2054  ;;  %v2491_v17 = vsel %vm2363_vm12, %v2427_v45, 0.0  ;;  %2680 = vst.msk [vmem:[%s5205_s22] sm:$0xff] %vm239_vm14, %v2615_v31  ;;  %v2626_v29 = vadd.f32 %v2562_v24, %v2498_v4  ;;  %v2016_v45 = vsel %vm1888_vm7, %v3781_v41, 0.0  ;;  %v2212_v31 = vadd.f32 %v2026_v7, %v2025_v61  ;;  %v3786_v28 = vld [vmem:[%s3951_s5 + $0x390] sm:$0xff] }
 0x2df   : > { %2204 = vadd.xlane.f32.xlu0 %v2203_v51  ;;  %v2429_v59 = vsub.f32 %v5493_v39, %v2055_v11  ;;  %v2011_v51 = vsel %vm1883_vm2, %v3776_v18, 0.0  ;;  %v2618_v39 = vadd.f32 %v2554_v15, %v2490_v40  ;;  %vm1903_vm2 = vcmp.eq.s32.totalorder %v4961_v56, %v5457_v35 }
 0x2e0   : > { %2183 = vadd.xlane.f32.xlu2 %v5789_v62  ;;  %v2619_v62 = vadd.f32 %v2555_v36, %v2491_v17  ;;  %2691 = vst.msk [vmem:[%s5205_s22 + $0x58] sm:$0xff] %vm239_vm14, %v2626_v29  ;;  %v2312_v1 = vadd.s32 %v5465_v44, %v2247_v46  ;;  %v2242_v24 = vadd.s32 96, %v5415_v30  ;;  %v2197_v11 = vadd.f32 %v2016_v45, %v2015_v13  ;;  %v2560_v17 = vld [vmem:[%s5205_s22 + $0x48] sm:$0xff]  ;;  %v3787_v13 = vld [vmem:[%s3951_s5 + $0x398] sm:$0xff] }
 0x2e1   : > { %v2493_v32 = vsel %vm2365_vm15, %v2429_v59, 0.0  ;;  %2683 = vst.msk [vmem:[%s5205_s22 + $0x18] sm:$0xff] %vm239_vm14, %v2618_v39  ;;  %vm1890_vm7 = vcmp.eq.s32.totalorder %v4966_v12, %v5376_v9  ;;  %v3782_v59 = vld [vmem:[%s3951_s5 + $0x3e0] sm:$0xff]  ;;  %v2250_v61 = vadd.s32 160, %v5415_v30  ;;  %v2568_v39 = vld [vmem:[%s5205_s22 + $0x88] sm:$0xff]  ;;  %v2021_v9 = vsel %vm1893_vm5, %v3786_v28, 0.0 }
 0x2e2   : > { %v2079_v20 = vpop.xlane.xlu0 %2078  ;;  %v2621_v27 = vadd.f32 %v2557_v60, %v2493_v32  ;;  %2684 = vst.msk [vmem:[%s5205_s22 + $0x20] sm:$0xff] %vm239_vm14, %v2619_v62  ;;  %v2031_v22 = vsel %vm1903_vm2, %v3782_v59, 0.0  ;;  %vm2376_vm8 = vcmp.lt.s32.totalorder %v2312_v1, 512  ;;  %v2307_v35 = vadd.s32 %v5465_v44, %v2242_v24  ;;  %v3784_v60 = vld [vmem:[%s3951_s5 + $0x370] sm:$0xff]  ;;  %v3785_v32 = vld [vmem:[%s3951_s5 + $0x378] sm:$0xff]  ;;  %v2571_v24 = vld [vmem:[%s5205_s22 + $0xa0] sm:$0xff] }
 0x2e3   : > { %v2437_v33 = vsub.f32 %v5616_v16, %v2079_v20  ;;  %2189 = vadd.xlane.f32.xlu1 %v5776_v21  ;;  %v2058_v52 = vpop.xlane.xlu2 %2057  ;;  %v2240_v16 = vadd.s32 80, %v5415_v30  ;;  %v2191_v21 = vadd.f32 %v2012_v3, %v2011_v51  ;;  %v2017_v29 = vsel %vm1889_vm6, %v3784_v60, 0.0 }
 0x2e4   : > { %v2430_v15 = vsub.f32 %v5439_v42, %v2058_v52  ;;  %2686 = vst.msk [vmem:[%s5205_s22 + $0x30] sm:$0xff] %vm239_vm14, %v2621_v27  ;;  %v2018_v20 = vsel %vm1890_vm7, %v3785_v32, 0.0  ;;  %v2022_v27 = vsel %vm1894_vm9, %v3787_v13, 0.0  ;;  %vm2371_vm11 = vcmp.lt.s32.totalorder %v2307_v35, 512 }
 0x2e5   : > { %v2501_v40 = vsel %vm2373_vm0, %v2437_v33, 0.0  ;;  %v2305_v36 = vadd.s32 %v5465_v44, %v2240_v16  ;;  %v2561_v33 = vld [vmem:[%s5205_s22 + $0x50] sm:$0xff]  ;;  %v2315_v16 = vadd.s32 %v5465_v44, %v2250_v61  ;;  %v2245_v45 = vadd.s32 120, %v5415_v30  ;;  %v2564_v61 = vld [vmem:[%s5205_s22 + $0x68] sm:$0xff] }
 0x2e6   : > { %v2629_v4 = vadd.f32 %v2565_v55, %v2501_v40  ;;  %v2494_v26 = vsel %vm2366_vm1, %v2430_v15, 0.0  ;;  %v2064_v42 = vpop.xlane.xlu1 %2063  ;;  %v6714_v55 = vld [vmem:[#allocation61_spill] sm:$0xff]  ;;  %vm1895_vm12 = vcmp.eq.s32.totalorder %v4961_v56, %v5484_v50  ;;  %vm1899_vm15 = vcmp.eq.s32.totalorder %v4961_v56, %v5551_v57 }
 0x2e7   : > { %2213 = vadd.xlane.f32.xlu0 %v2212_v31  ;;  %v2622_v48 = vadd.f32 %v2558_v10, %v2494_v26  ;;  %v2432_v25 = vsub.f32 %v5510_v34, %v2064_v42  ;;  %v3783_v34 = vld [vmem:[%s3951_s5 + $0x3e8] sm:$0xff]  ;;  %vm2369_vm10 = vcmp.lt.s32.totalorder %v2305_v36, 512  ;;  %v1540_v63 = vadd.f32 %v5668_v5, %v6714_v55  ;;  %v2563_v15 = vld [vmem:[%s5205_s22 + $0x60] sm:$0xff] }
 0x2e8   : > { %2694 = vst.msk [vmem:[%s5205_s22 + $0x70] sm:$0xff] %vm239_vm14, %v2629_v4  ;;  %2192 = vadd.xlane.f32.xlu2 %v2191_v21  ;;  %v2032_v18 = vsel %vm1904_vm3, %v3783_v34, 0.0  ;;  %v1439_v31 = vmul.f32 0.6931472, %v5745_v14  ;;  %v6715_v21 = vld [vmem:[#allocation75_spill] sm:$0xff]  ;;  %v2206_v4 = vadd.f32 %v2022_v27, %v2021_v9  ;;  %vm2379_vm0 = vcmp.lt.s32.totalorder %v2315_v16, 512 }
 0x2e9   : > { %2687 = vst.msk [vmem:[%s5205_s22 + $0x38] sm:$0xff] %vm239_vm14, %v2622_v48  ;;  %v2496_v51 = vsel %vm2368_vm4, %v2432_v25, 0.0  ;;  %v2221_v23 = vadd.f32 %v2032_v18, %v2031_v22  ;;  %3535 = vlog2.f32 %v6715_v21  ;;  %v2253_v1 = vadd.s32 184, %v5415_v30  ;;  %v3788_v48 = vld [vmem:[%s3951_s5 + $0x3a0] sm:$0xff]  ;;  %v6716_v18 = vld [vmem:[#allocation43_spill] sm:$0xff] }
 0x2ea   : > { %v2088_v38 = vpop.xlane.xlu0 %2087  ;;  %v2624_v19 = vadd.f32 %v2560_v17, %v2496_v51  ;;  %vm1900_vm1 = vcmp.eq.s32.totalorder %v4966_v12, %v5551_v57  ;;  %v2023_v25 = vsel %vm1895_vm12, %v3788_v48, 0.0  ;;  %v3789_v17 = vld [vmem:[%s3951_s5 + $0x3a8] sm:$0xff]  ;;  %v2246_v22 = vadd.s32 128, %v5415_v30  ;;  %v3790_v50 = vld [vmem:[%s3951_s5 + $0x3c0] sm:$0xff]  ;;  %v6717_v57 = vld [vmem:[#allocation64_spill] sm:$0xff] }
 0x2eb   : > { %v2440_v7 = vsub.f32 %v5666_v53, %v2088_v38  ;;  %2198 = vadd.xlane.f32.xlu1 %v2197_v11  ;;  %v2067_v46 = vpop.xlane.xlu2 %2066  ;;  %v2243_v53 = vadd.s32 104, %v5415_v30  ;;  %v2310_v11 = vadd.s32 %v5465_v44, %v2245_v45  ;;  %v2024_v36 = vsel %vm1896_vm13, %v3789_v17, 0.0  ;;  %v2567_v21 = vld [vmem:[%s5205_s22 + $0x80] sm:$0xff] }
 0x2ec   : > { %2689 = vst.msk [vmem:[%s5205_s22 + $0x48] sm:$0xff] %vm239_vm14, %v2624_v19  ;;  %v2433_v62 = vsub.f32 %v5496_v6, %v2067_v46  ;;  %v2200_v6 = vadd.f32 %v2018_v20, %v2017_v29  ;;  %v1429_v34 = vmul.f32 0.6931472, %v5636_v2  ;;  %3537 = vlog2.f32 %v6716_v18 }
 0x2ed   : > { %v2504_v3 = vsel %vm2376_vm8, %v2440_v7, 0.0  ;;  %v2308_v10 = vadd.s32 %v5465_v44, %v2243_v53  ;;  %v2027_v19 = vsel %vm1899_vm15, %v3790_v50, 0.0  ;;  %v3791_v7 = vld [vmem:[%s3951_s5 + $0x3c8] sm:$0xff]  ;;  %v2318_v35 = vadd.s32 %v5465_v44, %v2253_v1  ;;  %v3795_v1 = vld [vmem:[%s3951_s5 + $0x3f8] sm:$0xff] }
 0x2ee   : > { %v2632_v52 = vadd.f32 %v2568_v39, %v2504_v3  ;;  %v2497_v41 = vsel %vm2369_vm10, %v2433_v62, 0.0  ;;  %v2073_v5 = vpop.xlane.xlu1 %2072  ;;  %v2028_v2 = vsel %vm1900_vm1, %v3791_v7, 0.0  ;;  %v2209_v29 = vadd.f32 %v2024_v36, %v2023_v25 }
 0x2ef   : > { %2222 = vadd.xlane.f32.xlu0 %v2221_v23  ;;  %v2625_v40 = vadd.f32 %v2561_v33, %v2497_v41  ;;  %v2435_v0 = vsub.f32 %v5531_v49, %v2073_v5  ;;  %vm2372_vm2 = vcmp.lt.s32.totalorder %v2308_v10, 512  ;;  %v3536_v60 = vpop.eup %3535  ;;  %vm2374_vm3 = vcmp.lt.s32.totalorder %v2310_v11, 512  ;;  %v2566_v23 = vld [vmem:[%s5205_s22 + $0x78] sm:$0xff]  ;;  %v6718_v33 = vld [vmem:[#allocation78_spill] sm:$0xff] }
 0x2f0   : > { %2697 = vst.msk [vmem:[%s5205_s22 + $0x88] sm:$0xff] %vm239_vm14, %v2632_v52  ;;  %2201 = vadd.xlane.f32.xlu2 %v2200_v6  ;;  %v2248_v20 = vadd.s32 144, %v5415_v30  ;;  %v1543_v3 = vadd.f32 %v1439_v31, %v6717_v57  ;;  %v2311_v62 = vadd.s32 %v5465_v44, %v2246_v22  ;;  %3539 = vlog2.f32 %v6718_v33  ;;  %v2574_v52 = vld [vmem:[%s5205_s22 + $0xb8] sm:$0xff]  ;;  %v3792_v6 = vld [vmem:[%s3951_s5 + $0x3d0] sm:$0xff]  ;;  %v6720_v22 = vld [vmem:[#allocation46_spill] sm:$0xff] }
 0x2f1   : > { %2690 = vst.msk [vmem:[%s5205_s22 + $0x50] sm:$0xff] %vm239_vm14, %v2625_v40  ;;  %v2499_v49 = vsel %vm2371_vm11, %v2435_v0, 0.0  ;;  %v2215_v55 = vadd.f32 %v2028_v2, %v2027_v19  ;;  %vm1901_vm4 = vcmp.eq.s32.totalorder %v4961_v56, %v5604_v37  ;;  %vm1902_vm5 = vcmp.eq.s32.totalorder %v4966_v12, %v5604_v37  ;;  %v3793_v5 = vld [vmem:[%s3951_s5 + $0x3d8] sm:$0xff]  ;;  %v2577_v2 = vld [vmem:[%s5205_s22 + $0xd0] sm:$0xff]  ;;  %v6724_v57 = vld [vmem:[#allocation45_spill] sm:$0xff] }
 0x2f2   : > { %v2097_v14 = vpop.xlane.xlu0 %2096  ;;  %v2627_v26 = vadd.f32 %v2563_v15, %v2499_v49  ;;  %vm1905_vm6 = vcmp.eq.s32.totalorder %v4961_v56, %v5675_v47  ;;  %vm2382_vm7 = vcmp.lt.s32.totalorder %v2318_v35, 512  ;;  %v2256_v28 = vadd.s32 208, %v5415_v30  ;;  %v3538_v9 = vpop.eup %3537 }
 0x2f3   : > { %v2443_v42 = vsub.f32 %v1540_v63, %v2097_v14  ;;  %2207 = vadd.xlane.f32.xlu1 %v2206_v4  ;;  %v2076_v59 = vpop.xlane.xlu2 %2075  ;;  %vm1906_vm8 = vcmp.eq.s32.totalorder %v4966_v12, %v5675_v47  ;;  %v2313_v16 = vadd.s32 %v5465_v44, %v2248_v20  ;;  %v2029_v41 = vsel %vm1901_vm4, %v3792_v6, 0.0  ;;  %v6719_v4 = vld [vmem:[#allocation63_spill] sm:$0xff] }
 0x2f4   : > { %2692 = vst.msk [vmem:[%s5205_s22 + $0x60] sm:$0xff] %vm239_vm14, %v2627_v26  ;;  %v2436_v38 = vsub.f32 %v5534_v58, %v2076_v59  ;;  %v2030_v45 = vsel %vm1902_vm5, %v3793_v5, 0.0  ;;  %vm2375_vm9 = vcmp.lt.s32.totalorder %v2311_v62, 512  ;;  %v2249_v40 = vadd.s32 152, %v5415_v30  ;;  %v3794_v14 = vld [vmem:[%s3951_s5 + $0x3f0] sm:$0xff]  ;;  %v6728_v5 = vld [vmem:[#allocation70_spill] sm:$0xff] }
 0x2f5   : > { %v2507_v51 = vsel %vm2379_vm0, %v2443_v42, 0.0  ;;  %v1445_v0 = vmul.f32 0.6931472, %v3536_v60  ;;  %v1538_v49 = vadd.f32 %v1429_v34, %v6719_v4  ;;  %v2033_v37 = vsel %vm1905_vm6, %v3794_v14, 0.0  ;;  %v2569_v59 = vld [vmem:[%s5205_s22 + $0x90] sm:$0xff]  ;;  %v6729_v14 = vld [vmem:[#allocation65_spill] sm:$0xff] }
 0x2f6   : > { %v2635_v39 = vadd.f32 %v2571_v24, %v2507_v51  ;;  %v2500_v32 = vsel %vm2372_vm2, %v2436_v38, 0.0  ;;  %v2082_v58 = vpop.xlane.xlu1 %2081  ;;  %v2034_v26 = vsel %vm1906_vm8, %v3795_v1, 0.0  ;;  %v2321_v24 = vadd.s32 %v5465_v44, %v2256_v28  ;;  %v3540_v11 = vpop.eup %3539  ;;  %v6721_v34 = vld [vmem:[#allocation67_spill] sm:$0xff] }
 0x2f7   : > { %v2628_v46 = vadd.f32 %v2564_v61, %v2500_v32  ;;  %v2438_v53 = vsub.f32 %v5583_v8, %v2082_v58  ;;  %vm2377_vm10 = vcmp.lt.s32.totalorder %v2313_v16, 512  ;;  %v2251_v17 = vadd.s32 168, %v5415_v30  ;;  %v2572_v16 = vld [vmem:[%s5205_s22 + $0xa8] sm:$0xff] }
 0x2f8   : > { %2700 = vst.msk [vmem:[%s5205_s22 + $0xa0] sm:$0xff] %vm239_vm14, %v2635_v39  ;;  %2210 = vadd.xlane.f32.xlu2 %v2209_v29  ;;  %v2314_v12 = vadd.s32 %v5465_v44, %v2249_v40  ;;  %v1435_v47 = vmul.f32 0.6931472, %v3538_v9  ;;  %3541 = vlog2.f32 %v6720_v22  ;;  %v1546_v18 = vadd.f32 %v1445_v0, %v6721_v34  ;;  %v6722_v39 = vld [vmem:[#allocation62_spill] sm:$0xff]  ;;  %v6723_v29 = vld [vmem:[#allocation81_spill] sm:$0xff] }
 0x2f9   : > { %2693 = vst.msk [vmem:[%s5205_s22 + $0x68] sm:$0xff] %vm239_vm14, %v2628_v46  ;;  %v2502_v8 = vsel %vm2374_vm3, %v2438_v53, 0.0  ;;  %v2224_v51 = vadd.f32 %v2034_v26, %v2033_v37  ;;  %vm2385_vm11 = vcmp.lt.s32.totalorder %v2321_v24, 512  ;;  %v2259_v50 = vadd.s32 232, %v5415_v30 }
 0x2fa   : > { %v2106_v63 = vpop.xlane.xlu0 %2105  ;;  %v2630_v13 = vadd.f32 %v2566_v23, %v2502_v8  ;;  %v1539_v35 = vadd.f32 %v5621_v43, %v6722_v39  ;;  %v2316_v60 = vadd.s32 %v5465_v44, %v2251_v17  ;;  %3543 = vlog2.f32 %v6723_v29  ;;  %v2570_v23 = vld [vmem:[%s5205_s22 + $0x98] sm:$0xff]  ;;  %v6726_v8 = vld [vmem:[#allocation49_spill] sm:$0xff]  ;;  %v2573_v17 = vld [vmem:[%s5205_s22 + $0xb0] sm:$0xff] }
 0x2fb   : > { %v2446_v27 = vsub.f32 %v1543_v3, %v2106_v63  ;;  %2216 = vadd.xlane.f32.xlu1 %v2215_v55  ;;  %v2085_v31 = vpop.xlane.xlu2 %2084  ;;  %vm2378_vm12 = vcmp.lt.s32.totalorder %v2314_v12, 512  ;;  %v2252_v58 = vadd.s32 176, %v5415_v30  ;;  %v1451_v20 = vmul.f32 0.6931472, %v3540_v11  ;;  %v6725_v3 = vld [vmem:[#allocation66_spill] sm:$0xff]  ;;  %v6734_v39 = vld [vmem:[#allocation5_spill] sm:$0xff] }
 0x2fc   : > { %2695 = vst.msk [vmem:[%s5205_s22 + $0x78] sm:$0xff] %vm239_vm14, %v2630_v13  ;;  %v2439_v10 = vsub.f32 %v5619_v54, %v2085_v31  ;;  %v2218_v54 = vadd.f32 %v2030_v45, %v2029_v41  ;;  %3545 = vlog2.f32 %v6724_v57  ;;  %v1541_v62 = vadd.f32 %v1435_v47, %v6725_v3  ;;  %v6727_v41 = vld [vmem:[#allocation74_spill] sm:$0xff]  ;;  %v6735_v57 = vld [vmem:[#allocation68_spill] sm:$0xff] }
 0x2fd   : > { %v2510_v15 = vsel %vm2382_vm7, %v2446_v27, 0.0  ;;  %v2324_v33 = vadd.s32 %v5465_v44, %v2259_v50  ;;  %v1437_v63 = vmul.f32 0.6931472, %v6726_v8  ;;  %vm2380_vm13 = vcmp.lt.s32.totalorder %v2316_v60, 512 }
 0x2fe   : > { %v2638_v42 = vadd.f32 %v2574_v52, %v2510_v15  ;;  %v2503_v48 = vsel %vm2375_vm9, %v2439_v10, 0.0  ;;  %v2091_v25 = vpop.xlane.xlu1 %2090  ;;  %v3542_v55 = vpop.eup %3541  ;;  %v2254_v13 = vadd.s32 192, %v5415_v30  ;;  %v2317_v6 = vadd.s32 %v5465_v44, %v2252_v58 }
 0x2ff   : > { %v2631_v56 = vadd.f32 %v2567_v21, %v2503_v48  ;;  %v2441_v36 = vsub.f32 %v1538_v49, %v2091_v25  ;;  %3547 = vlog2.f32 %v6727_v41  ;;  %v1549_v45 = vadd.f32 %v1451_v20, %v6728_v5  ;;  %v2580_v49 = vld [vmem:[%s5205_s22 + $0xe8] sm:$0xff] }
 0x300   : > { %2703 = vst.msk [vmem:[%s5205_s22 + $0xb8] sm:$0xff] %vm239_vm14, %v2638_v42  ;;  %2219 = vadd.xlane.f32.xlu2 %v2218_v54  ;;  %v3544_v31 = vpop.eup %3543  ;;  %v1441_v40 = vmul.f32 0.6931472, %v3542_v55  ;;  %vm2388_vm15 = vcmp.lt.s32.totalorder %v2324_v33, 512  ;;  %v2262_v10 = vadd.s32 256, %v5415_v30  ;;  %v1542_v37 = vadd.f32 %v1437_v63, %v6729_v14  ;;  %v6730_v42 = vld [vmem:[#allocation84_spill] sm:$0xff] }
 0x301   : > { %2696 = vst.msk [vmem:[%s5205_s22 + $0x80] sm:$0xff] %vm239_vm14, %v2631_v56  ;;  %v2505_v38 = vsel %vm2377_vm10, %v2441_v36, 0.0  ;;  %v2319_v1 = vadd.s32 %v5465_v44, %v2254_v13  ;;  %3549 = vlog2.f32 %v6730_v42  ;;  %vm2381_vm0 = vcmp.lt.s32.totalorder %v2317_v6, 512  ;;  %v6731_v56 = vld [vmem:[#allocation73_spill] sm:$0xff]  ;;  %v6736_v33 = vld [vmem:[#allocation87_spill] sm:$0xff]  ;;  %v2576_v13 = vld [vmem:[%s5205_s22 + $0xc8] sm:$0xff] }
 0x302   : > { %v2115_v61 = vpop.xlane.xlu0 %2114  ;;  %v2633_v19 = vadd.f32 %v2569_v59, %v2505_v38  ;;  %v3546_v26 = vpop.eup %3545  ;;  %v2255_v11 = vadd.s32 200, %v5415_v30  ;;  %v1457_v54 = vmul.f32 0.6931472, %v3544_v31  ;;  %3551 = vlog2.f32 %v6731_v56  ;;  %v6732_v59 = vld [vmem:[#allocation69_spill] sm:$0xff]  ;;  %v6740_v14 = vld [vmem:[#allocation10_spill] sm:$0xff] }
 0x303   : > { %v2449_v7 = vsub.f32 %v1546_v18, %v2115_v61  ;;  %2225 = vadd.xlane.f32.xlu1 %v2224_v51  ;;  %v2094_v32 = vpop.xlane.xlu2 %2093  ;;  %v1544_v12 = vadd.f32 %v1441_v40, %v6732_v59  ;;  %v2327_v47 = vadd.s32 %v5465_v44, %v2262_v10  ;;  %v1443_v34 = vmul.f32 0.6931472, %v3546_v26 }
 0x304   : > { %2698 = vst.msk [vmem:[%s5205_s22 + $0x90] sm:$0xff] %vm239_vm14, %v2633_v19  ;;  %v2442_v53 = vsub.f32 %v1539_v35, %v2094_v32  ;;  %vm2383_vm1 = vcmp.lt.s32.totalorder %v2319_v1, 512  ;;  %v2257_v38 = vadd.s32 216, %v5415_v30  ;;  %v2575_v19 = vld [vmem:[%s5205_s22 + $0xc0] sm:$0xff]  ;;  %v1552_v35 = vadd.f32 %v1457_v54, %v6734_v39 }
 0x305   : > { %v2513_v46 = vsel %vm2385_vm11, %v2449_v7, 0.0  ;;  %v3548_v22 = vpop.eup %3547  ;;  %v2320_v7 = vadd.s32 %v5465_v44, %v2255_v11  ;;  %vm2391_vm2 = vcmp.lt.s32.totalorder %v2327_v47, 512  ;;  %v2265_v20 = vadd.s32 280, %v5415_v30 }
 0x306   : > { %v2641_v43 = vadd.f32 %v2577_v2, %v2513_v46  ;;  %v2506_v28 = vsel %vm2378_vm12, %v2442_v53, 0.0  ;;  %v2100_v9 = vpop.xlane.xlu1 %2099  ;;  %v6733_v2 = vld [vmem:[#allocation77_spill] sm:$0xff]  ;;  %v1447_v29 = vmul.f32 0.6931472, %v3548_v22  ;;  %v2322_v3 = vadd.s32 %v5465_v44, %v2257_v38 }
 0x307   : > { %v2634_v27 = vadd.f32 %v2570_v23, %v2506_v28  ;;  %v2444_v52 = vsub.f32 %v1541_v62, %v2100_v9  ;;  %3553 = vlog2.f32 %v6733_v2  ;;  %v3550_v60 = vpop.eup %3549  ;;  %v2583_v23 = vld [vmem:[%s5205_s22 + $0x100] sm:$0xff]  ;;  %vm2384_vm3 = vcmp.lt.s32.totalorder %v2320_v7, 512 }
 0x308   : > { %2706 = vst.msk [vmem:[%s5205_s22 + $0xd0] sm:$0xff] %vm239_vm14, %v2641_v43  ;;  %v1545_v43 = vadd.f32 %v1443_v34, %v6735_v57  ;;  %v3552_v62 = vpop.eup %3551  ;;  %3555 = vlog2.f32 %v6736_v33  ;;  %v2258_v8 = vadd.s32 224, %v5415_v30  ;;  %v1463_v63 = vmul.f32 0.6931472, %v3550_v60  ;;  %v2579_v38 = vld [vmem:[%s5205_s22 + $0xe0] sm:$0xff]  ;;  %v6746_v57 = vld [vmem:[#allocation7_spill] sm:$0xff] }
 0x309   : > { %2699 = vst.msk [vmem:[%s5205_s22 + $0x98] sm:$0xff] %vm239_vm14, %v2634_v27  ;;  %v2508_v0 = vsel %vm2380_vm13, %v2444_v52, 0.0  ;;  %v6737_v27 = vld [vmem:[#allocation76_spill] sm:$0xff]  ;;  %v2330_v41 = vadd.s32 %v5465_v44, %v2265_v20  ;;  %vm2386_vm4 = vcmp.lt.s32.totalorder %v2322_v3, 512  ;;  %v2268_v11 = vadd.s32 304, %v5415_v30 }
 0x30a   : > { %v2124_v15 = vpop.xlane.xlu0 %2123  ;;  %v2636_v21 = vadd.f32 %v2572_v16, %v2508_v0  ;;  %3557 = vlog2.f32 %v6737_v27  ;;  %v6738_v16 = vld [vmem:[#allocation72_spill] sm:$0xff]  ;;  %v2260_v0 = vadd.s32 240, %v5415_v30  ;;  %v2261_v22 = vadd.s32 248, %v5415_v30 }
 0x30b   : > { %v2452_v4 = vsub.f32 %v1549_v45, %v2124_v15  ;;  %v2103_v24 = vpop.xlane.xlu2 %2102  ;;  %v1547_v6 = vadd.f32 %v1447_v29, %v6738_v16  ;;  %v1449_v45 = vmul.f32 0.6931472, %v3552_v62  ;;  %vm2394_vm5 = vcmp.lt.s32.totalorder %v2330_v41, 512 }
 0x30c   : > { %2701 = vst.msk [vmem:[%s5205_s22 + $0xa8] sm:$0xff] %vm239_vm14, %v2636_v21  ;;  %v2445_v25 = vsub.f32 %v1542_v37, %v2103_v24  ;;  %v2578_v21 = vld [vmem:[%s5205_s22 + $0xd8] sm:$0xff]  ;;  %v1555_v37 = vadd.f32 %v1463_v63, %v6740_v14  ;;  %v2333_v2 = vadd.s32 %v5465_v44, %v2268_v11 }
 0x30d   : > { %v2516_v48 = vsel %vm2388_vm15, %v2452_v4, 0.0  ;;  %v3554_v5 = vpop.eup %3553  ;;  %v2323_v4 = vadd.s32 %v5465_v44, %v2258_v8  ;;  %v2271_v8 = vadd.s32 328, %v5415_v30 }
 0x30e   : > { %v2644_v36 = vadd.f32 %v2580_v49, %v2516_v48  ;;  %v2509_v18 = vsel %vm2381_vm0, %v2445_v25, 0.0  ;;  %v2109_v51 = vpop.xlane.xlu1 %2108  ;;  %v6739_v49 = vld [vmem:[#allocation80_spill] sm:$0xff]  ;;  %v3556_v1 = vpop.eup %3555  ;;  %v1453_v26 = vmul.f32 0.6931472, %v3554_v5  ;;  %vm2397_vm8 = vcmp.lt.s32.totalorder %v2333_v2, 512 }
 0x30f   : > { %v2637_v61 = vadd.f32 %v2573_v17, %v2509_v18  ;;  %v2447_v50 = vsub.f32 %v1544_v12, %v2109_v51  ;;  %3559 = vlog2.f32 %v6739_v49  ;;  %v2586_v25 = vld [vmem:[%s5205_s22 + $0x118] sm:$0xff]  ;;  %v6741_v17 = vld [vmem:[#allocation71_spill] sm:$0xff]  ;;  %v6742_v12 = vld [vmem:[#allocation89_spill] sm:$0xff]  ;;  %vm2387_vm6 = vcmp.lt.s32.totalorder %v2323_v4, 512 }
 0x310   : > { %2709 = vst.msk [vmem:[%s5205_s22 + $0xe8] sm:$0xff] %vm239_vm14, %v2644_v36  ;;  %v1548_v56 = vadd.f32 %v1449_v45, %v6741_v17  ;;  %v2325_v36 = vadd.s32 %v5465_v44, %v2260_v0  ;;  %v3558_v59 = vpop.eup %3557  ;;  %3561 = vlog2.f32 %v6742_v12  ;;  %v1469_v34 = vmul.f32 0.6931472, %v3556_v1  ;;  %v2582_v0 = vld [vmem:[%s5205_s22 + $0xf8] sm:$0xff] }
 0x311   : > { %2702 = vst.msk [vmem:[%s5205_s22 + $0xb0] sm:$0xff] %vm239_vm14, %v2637_v61  ;;  %v2511_v32 = vsel %vm2383_vm1, %v2447_v50, 0.0  ;;  %v6743_v61 = vld [vmem:[#allocation79_spill] sm:$0xff]  ;;  %v2264_v5 = vadd.s32 272, %v5415_v30  ;;  %v2336_v49 = vadd.s32 %v5465_v44, %v2271_v8  ;;  %v6752_v17 = vld [vmem:[#allocation16_spill] sm:$0xff] }
 0x312   : > { %v2133_v58 = vpop.xlane.xlu0 %2132  ;;  %v2639_v46 = vadd.f32 %v2575_v19, %v2511_v32  ;;  %3563 = vlog2.f32 %v6743_v61  ;;  %v6744_v19 = vld [vmem:[#allocation9_spill] sm:$0xff]  ;;  %vm2389_vm7 = vcmp.lt.s32.totalorder %v2325_v36, 512  ;;  %v2263_v32 = vadd.s32 264, %v5415_v30 }
 0x313   : > { %v2455_v53 = vsub.f32 %v1552_v35, %v2133_v58  ;;  %v2112_v55 = vpop.xlane.xlu2 %2111  ;;  %v1550_v7 = vadd.f32 %v1453_v26, %v6744_v19  ;;  %v1455_v35 = vmul.f32 0.6931472, %v3558_v59  ;;  %vm2400_vm11 = vcmp.lt.s32.totalorder %v2336_v49, 512 }
 0x314   : > { %2704 = vst.msk [vmem:[%s5205_s22 + $0xc0] sm:$0xff] %vm239_vm14, %v2639_v46  ;;  %v2448_v9 = vsub.f32 %v1545_v43, %v2112_v55  ;;  %v2581_v46 = vld [vmem:[%s5205_s22 + $0xf0] sm:$0xff]  ;;  %v1558_v43 = vadd.f32 %v1469_v34, %v6746_v57 }
 0x315   : > { %v2519_v28 = vsel %vm2391_vm2, %v2455_v53, 0.0  ;;  %v3560_v39 = vpop.eup %3559  ;;  %v2326_v53 = vadd.s32 %v5465_v44, %v2261_v22  ;;  %v2274_v22 = vadd.s32 352, %v5415_v30 }
 0x316   : > { %v2647_v52 = vadd.f32 %v2583_v23, %v2519_v28  ;;  %v2512_v31 = vsel %vm2384_vm3, %v2448_v9, 0.0  ;;  %v2118_v40 = vpop.xlane.xlu1 %2117  ;;  %v6745_v23 = vld [vmem:[#allocation83_spill] sm:$0xff]  ;;  %v3562_v3 = vpop.eup %3561  ;;  %v1459_v62 = vmul.f32 0.6931472, %v3560_v39  ;;  %v2267_v39 = vadd.s32 296, %v5415_v30 }
 0x317   : > { %v2640_v15 = vadd.f32 %v2576_v13, %v2512_v31  ;;  %v2450_v10 = vsub.f32 %v1547_v6, %v2118_v40  ;;  %3565 = vlog2.f32 %v6745_v23  ;;  %v2589_v9 = vld [vmem:[%s5205_s22 + $0x130] sm:$0xff]  ;;  %v6747_v13 = vld [vmem:[#allocation6_spill] sm:$0xff]  ;;  %v6748_v6 = vld [vmem:[#allocation92_spill] sm:$0xff]  ;;  %vm2390_vm9 = vcmp.lt.s32.totalorder %v2326_v53, 512 }
 0x318   : > { %2712 = vst.msk [vmem:[%s5205_s22 + $0x100] sm:$0xff] %vm239_vm14, %v2647_v52  ;;  %v1551_v27 = vadd.f32 %v1455_v35, %v6747_v13  ;;  %v2328_v52 = vadd.s32 %v5465_v44, %v2263_v32  ;;  %v3564_v16 = vpop.eup %3563  ;;  %3567 = vlog2.f32 %v6748_v6  ;;  %v1475_v45 = vmul.f32 0.6931472, %v3562_v3  ;;  %v2585_v32 = vld [vmem:[%s5205_s22 + $0x110] sm:$0xff]  ;;  %v6758_v13 = vld [vmem:[#allocation13_spill] sm:$0xff] }
 0x319   : > { %2705 = vst.msk [vmem:[%s5205_s22 + $0xc8] sm:$0xff] %vm239_vm14, %v2640_v15  ;;  %v2514_v42 = vsel %vm2386_vm4, %v2450_v10, 0.0  ;;  %v6749_v15 = vld [vmem:[#allocation82_spill] sm:$0xff]  ;;  %v2339_v23 = vadd.s32 %v5465_v44, %v2274_v22 }
 0x31a   : > { %v2142_v24 = vpop.xlane.xlu0 %2141  ;;  %v2642_v54 = vadd.f32 %v2578_v21, %v2514_v42  ;;  %3569 = vlog2.f32 %v6749_v15  ;;  %v6750_v21 = vld [vmem:[#allocation12_spill] sm:$0xff]  ;;  %vm2392_vm10 = vcmp.lt.s32.totalorder %v2328_v52, 512  ;;  %v2266_v42 = vadd.s32 288, %v5415_v30 }
 0x31b   : > { %v2458_v48 = vsub.f32 %v1555_v37, %v2142_v24  ;;  %v2121_v47 = vpop.xlane.xlu2 %2120  ;;  %v1553_v4 = vadd.f32 %v1459_v62, %v6750_v21  ;;  %v1461_v37 = vmul.f32 0.6931472, %v3564_v16  ;;  %vm2403_vm15 = vcmp.lt.s32.totalorder %v2339_v23, 512 }
 0x31c   : > { %2707 = vst.msk [vmem:[%s5205_s22 + $0xd8] sm:$0xff] %vm239_vm14, %v2642_v54  ;;  %v2451_v51 = vsub.f32 %v1548_v56, %v2121_v47  ;;  %v2584_v54 = vld [vmem:[%s5205_s22 + $0x108] sm:$0xff]  ;;  %v1561_v56 = vadd.f32 %v1475_v45, %v6752_v17 }
 0x31d   : > { %v2522_v18 = vsel %vm2394_vm5, %v2458_v48, 0.0  ;;  %v3566_v14 = vpop.eup %3565  ;;  %v2329_v48 = vadd.s32 %v5465_v44, %v2264_v5  ;;  %v2277_v5 = vadd.s32 376, %v5415_v30 }
 0x31e   : > { %v2650_v50 = vadd.f32 %v2586_v25, %v2522_v18  ;;  %v2515_v60 = vsel %vm2387_vm6, %v2451_v51, 0.0  ;;  %v2127_v29 = vpop.xlane.xlu1 %2126  ;;  %v6751_v25 = vld [vmem:[#allocation86_spill] sm:$0xff]  ;;  %v3568_v36 = vpop.eup %3567  ;;  %v1465_v59 = vmul.f32 0.6931472, %v3566_v14  ;;  %v2270_v14 = vadd.s32 320, %v5415_v30 }
 0x31f   : > { %v2643_v58 = vadd.f32 %v2579_v38, %v2515_v60  ;;  %v2453_v20 = vsub.f32 %v1550_v7, %v2127_v29  ;;  %3571 = vlog2.f32 %v6751_v25  ;;  %v2592_v51 = vld [vmem:[%s5205_s22 + $0x148] sm:$0xff]  ;;  %v6753_v38 = vld [vmem:[#allocation11_spill] sm:$0xff]  ;;  %vm2393_vm12 = vcmp.lt.s32.totalorder %v2329_v48, 512 }
 0x320   : > { %2715 = vst.msk [vmem:[%s5205_s22 + $0x118] sm:$0xff] %vm239_vm14, %v2650_v50  ;;  %v1554_v61 = vadd.f32 %v1461_v37, %v6753_v38  ;;  %v2331_v50 = vadd.s32 %v5465_v44, %v2266_v42  ;;  %v3570_v19 = vpop.eup %3569  ;;  %v6754_v7 = vld [vmem:[#allocation95_spill] sm:$0xff]  ;;  %v1481_v35 = vmul.f32 0.6931472, %v3568_v36  ;;  %v2588_v42 = vld [vmem:[%s5205_s22 + $0x128] sm:$0xff]  ;;  %v2342_v25 = vadd.s32 %v5465_v44, %v2277_v5 }
 0x321   : > { %2708 = vst.msk [vmem:[%s5205_s22 + $0xe0] sm:$0xff] %vm239_vm14, %v2643_v58  ;;  %v2517_v33 = vsel %vm2389_vm7, %v2453_v20, 0.0  ;;  %3573 = vlog2.f32 %v6754_v7  ;;  %v6755_v58 = vld [vmem:[#allocation85_spill] sm:$0xff]  ;;  %v6764_v38 = vld [vmem:[#allocation22_spill] sm:$0xff] }
 0x322   : > { %v2151_v55 = vpop.xlane.xlu0 %2150  ;;  %v2645_v63 = vadd.f32 %v2581_v46, %v2517_v33  ;;  %3575 = vlog2.f32 %v6755_v58  ;;  %v6756_v46 = vld [vmem:[#allocation15_spill] sm:$0xff]  ;;  %vm2395_vm13 = vcmp.lt.s32.totalorder %v2331_v50, 512  ;;  %v2269_v33 = vadd.s32 312, %v5415_v30 }
 0x323   : > { %v2461_v28 = vsub.f32 %v1558_v43, %v2151_v55  ;;  %v2130_v41 = vpop.xlane.xlu2 %2129  ;;  %v1556_v53 = vadd.f32 %v1465_v59, %v6756_v46  ;;  %v1467_v43 = vmul.f32 0.6931472, %v3570_v19  ;;  %vm2406_vm2 = vcmp.lt.s32.totalorder %v2342_v25, 512 }
 0x324   : > { %2710 = vst.msk [vmem:[%s5205_s22 + $0xf0] sm:$0xff] %vm239_vm14, %v2645_v63  ;;  %v2454_v40 = vsub.f32 %v1551_v27, %v2130_v41  ;;  %v2587_v63 = vld [vmem:[%s5205_s22 + $0x120] sm:$0xff]  ;;  %v1564_v27 = vadd.f32 %v1481_v35, %v6758_v13 }
 0x325   : > { %v2525_v31 = vsel %vm2397_vm8, %v2461_v28, 0.0  ;;  %v3572_v57 = vpop.eup %3571  ;;  %v2332_v28 = vadd.s32 %v5465_v44, %v2267_v39  ;;  %v2280_v39 = vadd.s32 400, %v5415_v30 }
 0x326   : > { %v2653_v10 = vadd.f32 %v2589_v9, %v2525_v31  ;;  %v2518_v1 = vsel %vm2390_vm9, %v2454_v40, 0.0  ;;  %v2136_v26 = vpop.xlane.xlu1 %2135  ;;  %v6757_v9 = vld [vmem:[#allocation90_spill] sm:$0xff]  ;;  %v1471_v16 = vmul.f32 0.6931472, %v3572_v57  ;;  %v2595_v40 = vld [vmem:[%s5205_s22 + $0x160] sm:$0xff]  ;;  %v2273_v57 = vadd.s32 344, %v5415_v30 }
 0x327   : > { %v2646_v24 = vadd.f32 %v2582_v0, %v2518_v1  ;;  %v2456_v11 = vsub.f32 %v1553_v4, %v2136_v26  ;;  %3577 = vlog2.f32 %v6757_v9  ;;  %v3574_v52 = vpop.eup %3573  ;;  %v6759_v0 = vld [vmem:[#allocation8_spill] sm:$0xff]  ;;  %v6760_v4 = vld [vmem:[#allocation98_spill] sm:$0xff]  ;;  %vm2396_vm0 = vcmp.lt.s32.totalorder %v2332_v28, 512 }
 0x328   : > { %2718 = vst.msk [vmem:[%s5205_s22 + $0x130] sm:$0xff] %vm239_vm14, %v2653_v10  ;;  %v1557_v15 = vadd.f32 %v1467_v43, %v6759_v0  ;;  %v2334_v10 = vadd.s32 %v5465_v44, %v2269_v33  ;;  %v3576_v21 = vpop.eup %3575  ;;  %3579 = vlog2.f32 %v6760_v4  ;;  %v1487_v37 = vmul.f32 0.6931472, %v3574_v52  ;;  %v2591_v33 = vld [vmem:[%s5205_s22 + $0x140] sm:$0xff]  ;;  %v6770_v0 = vld [vmem:[#allocation19_spill] sm:$0xff] }
 0x329   : > { %2711 = vst.msk [vmem:[%s5205_s22 + $0xf8] sm:$0xff] %vm239_vm14, %v2646_v24  ;;  %v2520_v12 = vsel %vm2392_vm10, %v2456_v11, 0.0  ;;  %v6761_v24 = vld [vmem:[#allocation88_spill] sm:$0xff]  ;;  %v2345_v9 = vadd.s32 %v5465_v44, %v2280_v39 }
 0x32a   : > { %v2160_v47 = vpop.xlane.xlu0 %2159  ;;  %v2648_v34 = vadd.f32 %v2584_v54, %v2520_v12  ;;  %3581 = vlog2.f32 %v6761_v24  ;;  %v6762_v54 = vld [vmem:[#allocation18_spill] sm:$0xff]  ;;  %vm2398_vm1 = vcmp.lt.s32.totalorder %v2334_v10, 512  ;;  %v2272_v12 = vadd.s32 336, %v5415_v30 }
 0x32b   : > { %v2464_v18 = vsub.f32 %v1561_v56, %v2160_v47  ;;  %v2139_v2 = vpop.xlane.xlu2 %2138  ;;  %v1559_v48 = vadd.f32 %v1471_v16, %v6762_v54  ;;  %v1473_v56 = vmul.f32 0.6931472, %v3576_v21  ;;  %vm2409_vm5 = vcmp.lt.s32.totalorder %v2345_v9, 512 }
 0x32c   : > { %2713 = vst.msk [vmem:[%s5205_s22 + $0x108] sm:$0xff] %vm239_vm14, %v2648_v34  ;;  %v2457_v29 = vsub.f32 %v1554_v61, %v2139_v2  ;;  %v2590_v34 = vld [vmem:[%s5205_s22 + $0x138] sm:$0xff]  ;;  %v1567_v61 = vadd.f32 %v1487_v37, %v6764_v38 }
 0x32d   : > { %v2528_v60 = vsel %vm2400_vm11, %v2464_v18, 0.0  ;;  %v3578_v17 = vpop.eup %3577  ;;  %v2335_v18 = vadd.s32 %v5465_v44, %v2270_v14  ;;  %v2283_v14 = vadd.s32 424, %v5415_v30 }
 0x32e   : > { %v2656_v20 = vadd.f32 %v2592_v51, %v2528_v60  ;;  %v2521_v3 = vsel %vm2393_vm12, %v2457_v29, 0.0  ;;  %v2145_v62 = vpop.xlane.xlu1 %2144  ;;  %v6763_v51 = vld [vmem:[#allocation93_spill] sm:$0xff]  ;;  %v3580_v50 = vpop.eup %3579  ;;  %v1477_v19 = vmul.f32 0.6931472, %v3578_v17  ;;  %v2598_v29 = vld [vmem:[%s5205_s22 + $0x178] sm:$0xff]  ;;  %v2276_v17 = vadd.s32 368, %v5415_v30 }
 0x32f   : > { %v2649_v55 = vadd.f32 %v2585_v32, %v2521_v3  ;;  %v2459_v8 = vsub.f32 %v1556_v53, %v2145_v62  ;;  %3583 = vlog2.f32 %v6763_v51  ;;  %v6765_v32 = vld [vmem:[#allocation17_spill] sm:$0xff]  ;;  %vm2399_vm3 = vcmp.lt.s32.totalorder %v2335_v18, 512 }
 0x330   : > { %2721 = vst.msk [vmem:[%s5205_s22 + $0x148] sm:$0xff] %vm239_vm14, %v2656_v20  ;;  %v1560_v58 = vadd.f32 %v1473_v56, %v6765_v32  ;;  %v2337_v20 = vadd.s32 %v5465_v44, %v2272_v12  ;;  %v3582_v46 = vpop.eup %3581  ;;  %v6766_v53 = vld [vmem:[#allocation101_spill] sm:$0xff]  ;;  %v1493_v43 = vmul.f32 0.6931472, %v3580_v50  ;;  %v2594_v12 = vld [vmem:[%s5205_s22 + $0x158] sm:$0xff]  ;;  %v2348_v51 = vadd.s32 %v5465_v44, %v2283_v14 }
 0x331   : > { %2714 = vst.msk [vmem:[%s5205_s22 + $0x110] sm:$0xff] %vm239_vm14, %v2649_v55  ;;  %v2523_v6 = vsel %vm2395_vm13, %v2459_v8, 0.0  ;;  %3585 = vlog2.f32 %v6766_v53  ;;  %v6767_v55 = vld [vmem:[#allocation91_spill] sm:$0xff]  ;;  %v6776_v32 = vld [vmem:[#allocation28_spill] sm:$0xff] }
 0x332   : > { %v2169_v41 = vpop.xlane.xlu0 %2168  ;;  %v2651_v45 = vadd.f32 %v2587_v63, %v2523_v6  ;;  %3587 = vlog2.f32 %v6767_v55  ;;  %v6768_v63 = vld [vmem:[#allocation21_spill] sm:$0xff]  ;;  %vm2401_vm4 = vcmp.lt.s32.totalorder %v2337_v20, 512  ;;  %v2275_v6 = vadd.s32 360, %v5415_v30 }
 0x333   : > { %v2467_v31 = vsub.f32 %v1564_v27, %v2169_v41  ;;  %v2148_v49 = vpop.xlane.xlu2 %2147  ;;  %v1562_v28 = vadd.f32 %v1477_v19, %v6768_v63  ;;  %v1479_v27 = vmul.f32 0.6931472, %v3582_v46  ;;  %vm2412_vm8 = vcmp.lt.s32.totalorder %v2348_v51, 512 }
 0x334   : > { %2716 = vst.msk [vmem:[%s5205_s22 + $0x120] sm:$0xff] %vm239_vm14, %v2651_v45  ;;  %v2460_v26 = vsub.f32 %v1557_v15, %v2148_v49  ;;  %v2593_v45 = vld [vmem:[%s5205_s22 + $0x150] sm:$0xff]  ;;  %v1570_v15 = vadd.f32 %v1493_v43, %v6770_v0 }
 0x335   : > { %v2531_v1 = vsel %vm2403_vm15, %v2467_v31, 0.0  ;;  %v3584_v13 = vpop.eup %3583  ;;  %v2338_v31 = vadd.s32 %v5465_v44, %v2273_v57  ;;  %v2286_v57 = vadd.s32 448, %v5415_v30 }
 0x336   : > { %v2659_v11 = vadd.f32 %v2595_v40, %v2531_v1  ;;  %v2524_v36 = vsel %vm2396_vm0, %v2460_v26, 0.0  ;;  %v2154_v59 = vpop.xlane.xlu1 %2153  ;;  %v6769_v40 = vld [vmem:[#allocation96_spill] sm:$0xff]  ;;  %v1483_v21 = vmul.f32 0.6931472, %v3584_v13  ;;  %v2601_v26 = vld [vmem:[%s5205_s22 + $0x190] sm:$0xff]  ;;  %v2279_v13 = vadd.s32 392, %v5415_v30 }
 0x337   : > { %v2652_v47 = vadd.f32 %v2588_v42, %v2524_v36  ;;  %v2462_v22 = vsub.f32 %v1559_v48, %v2154_v59  ;;  %3589 = vlog2.f32 %v6769_v40  ;;  %v3586_v10 = vpop.eup %3585  ;;  %v6771_v42 = vld [vmem:[#allocation14_spill] sm:$0xff]  ;;  %v6772_v48 = vld [vmem:[#allocation104_spill] sm:$0xff]  ;;  %vm2402_vm6 = vcmp.lt.s32.totalorder %v2338_v31, 512 }
 0x338   : > { %2724 = vst.msk [vmem:[%s5205_s22 + $0x160] sm:$0xff] %vm239_vm14, %v2659_v11  ;;  %v1563_v24 = vadd.f32 %v1479_v27, %v6771_v42  ;;  %v2340_v11 = vadd.s32 %v5465_v44, %v2275_v6  ;;  %v3588_v54 = vpop.eup %3587  ;;  %3591 = vlog2.f32 %v6772_v48  ;;  %v1499_v56 = vmul.f32 0.6931472, %v3586_v10  ;;  %v2597_v6 = vld [vmem:[%s5205_s22 + $0x170] sm:$0xff]  ;;  %v6782_v42 = vld [vmem:[#allocation25_spill] sm:$0xff] }
 0x339   : > { %2717 = vst.msk [vmem:[%s5205_s22 + $0x128] sm:$0xff] %vm239_vm14, %v2652_v47  ;;  %v2526_v7 = vsel %vm2398_vm1, %v2462_v22, 0.0  ;;  %v6773_v47 = vld [vmem:[#allocation94_spill] sm:$0xff]  ;;  %v2351_v40 = vadd.s32 %v5465_v44, %v2286_v57 }
 0x33a   : > { %v2178_v2 = vpop.xlane.xlu0 %2177  ;;  %v2654_v35 = vadd.f32 %v2590_v34, %v2526_v7  ;;  %3593 = vlog2.f32 %v6773_v47  ;;  %v6774_v34 = vld [vmem:[#allocation24_spill] sm:$0xff]  ;;  %vm2404_vm7 = vcmp.lt.s32.totalorder %v2340_v11, 512  ;;  %v2278_v7 = vadd.s32 384, %v5415_v30 }
 0x33b   : > { %v2470_v60 = vsub.f32 %v1567_v61, %v2178_v2  ;;  %v2157_v23 = vpop.xlane.xlu2 %2156  ;;  %v1565_v18 = vadd.f32 %v1483_v21, %v6774_v34  ;;  %v1485_v61 = vmul.f32 0.6931472, %v3588_v54  ;;  %vm2415_vm11 = vcmp.lt.s32.totalorder %v2351_v40, 512 }
 0x33c   : > { %2719 = vst.msk [vmem:[%s5205_s22 + $0x138] sm:$0xff] %vm239_vm14, %v2654_v35  ;;  %v2463_v62 = vsub.f32 %v1560_v58, %v2157_v23  ;;  %v2596_v35 = vld [vmem:[%s5205_s22 + $0x168] sm:$0xff]  ;;  %v1573_v58 = vadd.f32 %v1499_v56, %v6776_v32  ;;  %v2285_v40 = vadd.s32 440, %v5415_v30 }
 0x33d   : > { %v2534_v3 = vsel %vm2406_vm2, %v2470_v60, 0.0  ;;  %v3590_v38 = vpop.eup %3589  ;;  %v2341_v60 = vadd.s32 %v5465_v44, %v2276_v17  ;;  %v2289_v17 = vadd.s32 472, %v5415_v30 }
 0x33e   : > { %v2662_v8 = vadd.f32 %v2598_v29, %v2534_v3  ;;  %v2527_v52 = vsel %vm2399_vm3, %v2463_v62, 0.0  ;;  %v2163_v16 = vpop.xlane.xlu1 %2162  ;;  %v6775_v29 = vld [vmem:[#allocation100_spill] sm:$0xff]  ;;  %v3592_v20 = vpop.eup %3591  ;;  %v1489_v46 = vmul.f32 0.6931472, %v3590_v38  ;;  %v2604_v62 = vld [vmem:[%s5205_s22 + $0x1a8] sm:$0xff]  ;;  %v2282_v38 = vadd.s32 416, %v5415_v30 }
 0x33f   : > { %v2655_v41 = vadd.f32 %v2591_v33, %v2527_v52  ;;  %v2465_v5 = vsub.f32 %v1562_v28, %v2163_v16  ;;  %3595 = vlog2.f32 %v6775_v29  ;;  %v6777_v33 = vld [vmem:[#allocation23_spill] sm:$0xff]  ;;  %vm2405_vm9 = vcmp.lt.s32.totalorder %v2341_v60, 512 }
 0x340   : > { %2727 = vst.msk [vmem:[%s5205_s22 + $0x178] sm:$0xff] %vm239_vm14, %v2662_v8  ;;  %v1566_v55 = vadd.f32 %v1485_v61, %v6777_v33  ;;  %v2343_v8 = vadd.s32 %v5465_v44, %v2278_v7  ;;  %v3594_v63 = vpop.eup %3593  ;;  %v6778_v28 = vld [vmem:[#allocation107_spill] sm:$0xff]  ;;  %v1505_v27 = vmul.f32 0.6931472, %v3592_v20  ;;  %v2600_v7 = vld [vmem:[%s5205_s22 + $0x188] sm:$0xff]  ;;  %v2354_v29 = vadd.s32 %v5465_v44, %v2289_v17 }
 0x341   : > { %2720 = vst.msk [vmem:[%s5205_s22 + $0x140] sm:$0xff] %vm239_vm14, %v2655_v41  ;;  %v2529_v4 = vsel %vm2401_vm4, %v2465_v5, 0.0  ;;  %3597 = vlog2.f32 %v6778_v28  ;;  %v6779_v41 = vld [vmem:[#allocation97_spill] sm:$0xff]  ;;  %v6788_v33 = vld [vmem:[#allocation34_spill] sm:$0xff]  ;;  %v2605_v17 = vld [vmem:[%s5205_s22 + $0x1b0] sm:$0xff] }
 0x342   : > { %v2187_v49 = vpop.xlane.xlu0 %2186  ;;  %v2657_v37 = vadd.f32 %v2593_v45, %v2529_v4  ;;  %3599 = vlog2.f32 %v6779_v41  ;;  %v6780_v45 = vld [vmem:[#allocation27_spill] sm:$0xff]  ;;  %vm2407_vm10 = vcmp.lt.s32.totalorder %v2343_v8, 512  ;;  %v2281_v4 = vadd.s32 408, %v5415_v30 }
 0x343   : > { %v2473_v1 = vsub.f32 %v1570_v15, %v2187_v49  ;;  %v2166_v25 = vpop.xlane.xlu2 %2165  ;;  %v1568_v31 = vadd.f32 %v1489_v46, %v6780_v45  ;;  %v1491_v15 = vmul.f32 0.6931472, %v3594_v63  ;;  %vm2418_vm15 = vcmp.lt.s32.totalorder %v2354_v29, 512  ;;  %v2606_v29 = vld [vmem:[%s5205_s22 + $0x1b8] sm:$0xff] }
 0x344   : > { %2722 = vst.msk [vmem:[%s5205_s22 + $0x150] sm:$0xff] %vm239_vm14, %v2657_v37  ;;  %v2466_v59 = vsub.f32 %v1563_v24, %v2166_v25  ;;  %v2599_v37 = vld [vmem:[%s5205_s22 + $0x180] sm:$0xff]  ;;  %v1576_v24 = vadd.f32 %v1505_v27, %v6782_v42 }
 0x345   : > { %v2537_v36 = vsel %vm2409_vm5, %v2473_v1, 0.0  ;;  %v3596_v0 = vpop.eup %3595  ;;  %v2344_v1 = vadd.s32 %v5465_v44, %v2279_v13  ;;  %v2292_v13 = vadd.s32 496, %v5415_v30 }
 0x346   : > { %v2665_v22 = vadd.f32 %v2601_v26, %v2537_v36  ;;  %v2530_v50 = vsel %vm2402_vm6, %v2466_v59, 0.0  ;;  %v2172_v19 = vpop.xlane.xlu1 %2171  ;;  %v6781_v26 = vld [vmem:[#allocation103_spill] sm:$0xff]  ;;  %v1495_v54 = vmul.f32 0.6931472, %v3596_v0  ;;  %v2607_v59 = vld [vmem:[%s5205_s22 + $0x1c0] sm:$0xff] }
 0x347   : > { %v2658_v2 = vadd.f32 %v2594_v12, %v2530_v50  ;;  %v2468_v39 = vsub.f32 %v1565_v18, %v2172_v19  ;;  %3601 = vlog2.f32 %v6781_v26  ;;  %v3598_v11 = vpop.eup %3597  ;;  %v6783_v12 = vld [vmem:[#allocation20_spill] sm:$0xff]  ;;  %v6784_v18 = vld [vmem:[#allocation109_spill] sm:$0xff]  ;;  %vm2408_vm12 = vcmp.lt.s32.totalorder %v2344_v1, 512 }
 0x348   : > { %2730 = vst.msk [vmem:[%s5205_s22 + $0x190] sm:$0xff] %vm239_vm14, %v2665_v22  ;;  %v1569_v47 = vadd.f32 %v1491_v15, %v6783_v12  ;;  %v2346_v22 = vadd.s32 %v5465_v44, %v2281_v4  ;;  %v3600_v34 = vpop.eup %3599  ;;  %3603 = vlog2.f32 %v6784_v18  ;;  %v1511_v61 = vmul.f32 0.6931472, %v3598_v11  ;;  %v6790_v4 = vld [vmem:[#allocation102_spill] sm:$0xff] }
 0x349   : > { %2723 = vst.msk [vmem:[%s5205_s22 + $0x158] sm:$0xff] %vm239_vm14, %v2658_v2  ;;  %v2532_v53 = vsel %vm2404_vm7, %v2468_v39, 0.0  ;;  %v6785_v2 = vld [vmem:[#allocation99_spill] sm:$0xff]  ;;  %v2357_v1 = vadd.s32 %v5465_v44, %v2292_v13 }
 0x34a   : > { %v2196_v23 = vpop.xlane.xlu0 %2195  ;;  %v2660_v43 = vadd.f32 %v2596_v35, %v2532_v53  ;;  %3605 = vlog2.f32 %v6785_v2  ;;  %v6786_v35 = vld [vmem:[#allocation30_spill] sm:$0xff]  ;;  %vm2410_vm13 = vcmp.lt.s32.totalorder %v2346_v22, 512  ;;  %v2284_v53 = vadd.s32 432, %v5415_v30 }
 0x34b   : > { %v2476_v3 = vsub.f32 %v1573_v58, %v2196_v23  ;;  %v2175_v9 = vpop.xlane.xlu2 %2174  ;;  %v1571_v60 = vadd.f32 %v1495_v54, %v6786_v35  ;;  %v1497_v58 = vmul.f32 0.6931472, %v3600_v34  ;;  %v2287_v54 = vadd.s32 456, %v5415_v30 }
 0x34c   : > { %2725 = vst.msk [vmem:[%s5205_s22 + $0x168] sm:$0xff] %vm239_vm14, %v2660_v43  ;;  %v2469_v16 = vsub.f32 %v1566_v55, %v2175_v9  ;;  %v2602_v43 = vld [vmem:[%s5205_s22 + $0x198] sm:$0xff]  ;;  %v1579_v55 = vadd.f32 %v1511_v61, %v6788_v33  ;;  %vm2421_vm2 = vcmp.lt.s32.totalorder %v2357_v1, 512  ;;  %v6794_v61 = vld [vmem:[#allocation26_spill] sm:$0xff]  ;;  %v2611_v1 = vld [vmem:[%s5205_s22 + $0x1e0] sm:$0xff] }
 0x34d   : > { %v2540_v52 = vsel %vm2412_vm8, %v2476_v3, 0.0  ;;  %v3602_v32 = vpop.eup %3601  ;;  %v2347_v3 = vadd.s32 %v5465_v44, %v2282_v38  ;;  %v2613_v38 = vld [vmem:[%s5205_s22 + $0x1f0] sm:$0xff] }
 0x34e   : > { %v2668_v5 = vadd.f32 %v2604_v62, %v2540_v52  ;;  %v2533_v10 = vsel %vm2405_vm9, %v2469_v16, 0.0  ;;  %v2181_v21 = vpop.xlane.xlu1 %2180  ;;  %v6787_v62 = vld [vmem:[#allocation106_spill] sm:$0xff]  ;;  %v3604_v8 = vpop.eup %3603  ;;  %v1501_v63 = vmul.f32 0.6931472, %v3602_v32  ;;  %v2610_v16 = vld [vmem:[%s5205_s22 + $0x1d8] sm:$0xff]  ;;  %v6795_v32 = vld [vmem:[#allocation105_spill] sm:$0xff] }
 0x34f   : > { %v2661_v49 = vadd.f32 %v2597_v6, %v2533_v10  ;;  %v2471_v14 = vsub.f32 %v1568_v31, %v2181_v21  ;;  %3607 = vlog2.f32 %v6787_v62  ;;  %v6789_v6 = vld [vmem:[#allocation29_spill] sm:$0xff]  ;;  %vm2411_vm0 = vcmp.lt.s32.totalorder %v2347_v3, 512 }
 0x350   : > { %2733 = vst.msk [vmem:[%s5205_s22 + $0x1a8] sm:$0xff] %vm239_vm14, %v2668_v5  ;;  %v1572_v41 = vadd.f32 %v1497_v58, %v6789_v6  ;;  %v2349_v5 = vadd.s32 %v5465_v44, %v2284_v53  ;;  %v3606_v45 = vpop.eup %3605  ;;  %v1517_v0 = vmul.f32 0.6931472, %v3604_v8  ;;  %v2603_v21 = vld [vmem:[%s5205_s22 + $0x1a0] sm:$0xff]  ;;  %3609 = vlog2.f32 %v6790_v4 }
 0x351   : > { %2726 = vst.msk [vmem:[%s5205_s22 + $0x170] sm:$0xff] %vm239_vm14, %v2661_v49  ;;  %v2535_v48 = vsel %vm2407_vm10, %v2471_v14, 0.0  ;;  %v6791_v14 = vld [vmem:[#allocation33_spill] sm:$0xff]  ;;  %v1503_v42 = vmul.f32 0.6931472, %v3606_v45  ;;  %v2290_v3 = vadd.s32 480, %v5415_v30 }
 0x352   : > { %v2205_v25 = vpop.xlane.xlu0 %2204  ;;  %v2663_v56 = vadd.f32 %v2599_v37, %v2535_v48  ;;  %v1574_v37 = vadd.f32 %v1501_v63, %v6791_v14  ;;  %vm2413_vm1 = vcmp.lt.s32.totalorder %v2349_v5, 512  ;;  %v6797_v63 = vld [vmem:[#allocation110_spill] sm:$0xff]  ;;  %v2291_v5 = vadd.s32 488, %v5415_v30 }
 0x353   : > { %v2479_v36 = vsub.f32 %v1576_v24, %v2205_v25  ;;  %v2184_v51 = vpop.xlane.xlu2 %2183 }
 0x354   : > { %2728 = vst.msk [vmem:[%s5205_s22 + $0x180] sm:$0xff] %vm239_vm14, %v2663_v56  ;;  %v2472_v19 = vsub.f32 %v1569_v47, %v2184_v51  ;;  %v2350_v56 = vadd.s32 %v5465_v44, %v2285_v40  ;;  %v6799_v40 = vld [vmem:[#allocation39_spill] sm:$0xff] }
 0x355   : > { %v2543_v50 = vsel %vm2415_vm11, %v2479_v36, 0.0  ;;  %v3608_v26 = vpop.eup %3607  ;;  %v6792_v36 = vld [vmem:[#allocation108_spill] sm:$0xff] }
 0x356   : > { %v2671_v39 = vadd.f32 %v2607_v59, %v2543_v50  ;;  %v2536_v20 = vsel %vm2408_vm12, %v2472_v19, 0.0  ;;  %v2190_v46 = vpop.xlane.xlu1 %2189  ;;  %3611 = vlog2.f32 %v6792_v36  ;;  %v6793_v59 = vld [vmem:[#allocation31_spill] sm:$0xff]  ;;  %v1507_v47 = vmul.f32 0.6931472, %v3608_v26  ;;  %v6801_v36 = vld [vmem:[#allocation40_spill] sm:$0xff] }
 0x357   : > { %v2664_v23 = vadd.f32 %v2600_v7, %v2536_v20  ;;  %v2474_v57 = vsub.f32 %v1571_v60, %v2190_v46  ;;  %v1582_v12 = vadd.f32 %v1517_v0, %v6793_v59  ;;  %v1575_v50 = vadd.f32 %v1503_v42, %v6794_v61  ;;  %v3610_v7 = vpop.eup %3609  ;;  %v6796_v20 = vld [vmem:[#allocation36_spill] sm:$0xff] }
 0x358   : > { %2736 = vst.msk [vmem:[%s5205_s22 + $0x1c0] sm:$0xff] %vm239_vm14, %v2671_v39  ;;  %v2352_v19 = vadd.s32 %v5465_v44, %v2287_v54  ;;  %vm2414_vm3 = vcmp.lt.s32.totalorder %v2350_v56, 512  ;;  %v2288_v39 = vadd.s32 464, %v5415_v30  ;;  %3613 = vlog2.f32 %v6795_v32  ;;  %v6800_v54 = vld [vmem:[#allocation32_spill] sm:$0xff]  ;;  %v2612_v56 = vld [vmem:[%s5205_s22 + $0x1e8] sm:$0xff] }
 0x359   : > { %2729 = vst.msk [vmem:[%s5205_s22 + $0x188] sm:$0xff] %vm239_vm14, %v2664_v23  ;;  %v2538_v28 = vsel %vm2410_vm13, %v2474_v57, 0.0  ;;  %v1577_v46 = vadd.f32 %v1507_v47, %v6796_v20  ;;  %v1509_v23 = vmul.f32 0.6931472, %v3610_v7  ;;  %3615 = vlog2.f32 %v6797_v63 }
 0x35a   : > { %v2214_v9 = vpop.xlane.xlu0 %2213  ;;  %v2666_v27 = vadd.f32 %v2602_v43, %v2538_v28  ;;  %vm2416_vm4 = vcmp.lt.s32.totalorder %v2352_v19, 512  ;;  %v2353_v8 = vadd.s32 %v5465_v44, %v2288_v39  ;;  %v2356_v26 = vadd.s32 %v5465_v44, %v2291_v5 }
 0x35b   : > { %v2482_v52 = vsub.f32 %v1579_v55, %v2214_v9  ;;  %v2193_v31 = vpop.xlane.xlu2 %2192  ;;  %v2608_v55 = vld [vmem:[%s5205_s22 + $0x1c8] sm:$0xff] }
 0x35c   : > { %2731 = vst.msk [vmem:[%s5205_s22 + $0x198] sm:$0xff] %vm239_vm14, %v2666_v27  ;;  %v2475_v10 = vsub.f32 %v1572_v41, %v2193_v31  ;;  %v3612_v53 = vpop.eup %3611  ;;  %v6798_v27 = vld [vmem:[#allocation35_spill] sm:$0xff]  ;;  %vm2417_vm5 = vcmp.lt.s32.totalorder %v2353_v8, 512  ;;  %vm2420_vm7 = vcmp.lt.s32.totalorder %v2356_v26, 512 }
 0x35d   : > { %v2546_v15 = vsel %vm2418_vm15, %v2482_v52, 0.0  ;;  %v1513_v28 = vmul.f32 0.6931472, %v3612_v53  ;;  %v1578_v52 = vadd.f32 %v1509_v23, %v6798_v27  ;;  %v2609_v31 = vld [vmem:[%s5205_s22 + $0x1d0] sm:$0xff] }
 0x35e   : > { %v2674_v49 = vadd.f32 %v2610_v16, %v2546_v15  ;;  %v2539_v24 = vsel %vm2411_vm0, %v2475_v10, 0.0  ;;  %v2199_v11 = vpop.xlane.xlu1 %2198  ;;  %v2355_v16 = vadd.s32 %v5465_v44, %v2290_v3  ;;  %v3614_v6 = vpop.eup %3613 }
 0x35f   : > { %v2667_v48 = vadd.f32 %v2603_v21, %v2539_v24  ;;  %v2477_v25 = vsub.f32 %v1574_v37, %v2199_v11  ;;  %v1580_v0 = vadd.f32 %v1513_v28, %v6799_v40  ;;  %v3616_v15 = vpop.eup %3615  ;;  %v1515_v10 = vmul.f32 0.6931472, %v3614_v6 }
 0x360   : > { %2739 = vst.msk [vmem:[%s5205_s22 + $0x1d8] sm:$0xff] %vm239_vm14, %v2674_v49  ;;  %vm2419_vm6 = vcmp.lt.s32.totalorder %v2355_v16, 512  ;;  %v2293_v49 = vadd.s32 504, %v5415_v30  ;;  %v1519_v42 = vmul.f32 0.6931472, %v3616_v15 }
 0x361   : > { %2732 = vst.msk [vmem:[%s5205_s22 + $0x1a0] sm:$0xff] %vm239_vm14, %v2667_v48  ;;  %v2541_v22 = vsel %vm2413_vm1, %v2477_v25, 0.0  ;;  %v1581_v48 = vadd.f32 %v1515_v10, %v6800_v54 }
 0x362   : > { %v2223_v34 = vpop.xlane.xlu0 %2222  ;;  %v2669_v18 = vadd.f32 %v2605_v17, %v2541_v22  ;;  %v2358_v25 = vadd.s32 %v5465_v44, %v2293_v49  ;;  %v1583_v59 = vadd.f32 %v1519_v42, %v6801_v36 }
 0x363   : > { %v2485_v51 = vsub.f32 %v1582_v12, %v2223_v34  ;;  %v2202_v2 = vpop.xlane.xlu2 %2201 }
 0x364   : > { %2734 = vst.msk [vmem:[%s5205_s22 + $0x1b0] sm:$0xff] %vm239_vm14, %v2669_v18  ;;  %v2478_v60 = vsub.f32 %v1575_v50, %v2202_v2  ;;  %vm2422_vm8 = vcmp.lt.s32.totalorder %v2358_v25, 512  ;;  %v2614_v18 = vld [vmem:[%s5205_s22 + $0x1f8] sm:$0xff] }
 0x365   : > { %v2549_v35 = vsel %vm2421_vm2, %v2485_v51, 0.0 }
 0x366   : > { %v2677_v58 = vadd.f32 %v2613_v38, %v2549_v35  ;;  %v2542_v57 = vsel %vm2414_vm3, %v2478_v60, 0.0  ;;  %v2208_v43 = vpop.xlane.xlu1 %2207 }
 0x367   : > { %v2670_v62 = vadd.f32 %v2606_v29, %v2542_v57  ;;  %v2480_v33 = vsub.f32 %v1577_v46, %v2208_v43 }
 0x368   : > { %2742 = vst.msk [vmem:[%s5205_s22 + $0x1f0] sm:$0xff] %vm239_vm14, %v2677_v58 }
 0x369   : > { %2735 = vst.msk [vmem:[%s5205_s22 + $0x1b8] sm:$0xff] %vm239_vm14, %v2670_v62  ;;  %v2544_v9 = vsel %vm2416_vm4, %v2480_v33, 0.0 }
 0x36a   : > { %v2672_v13 = vadd.f32 %v2608_v55, %v2544_v9 }
 0x36b   : > { %v2211_v41 = vpop.xlane.xlu2 %2210 }
 0x36c   : > { %2737 = vst.msk [vmem:[%s5205_s22 + $0x1c8] sm:$0xff] %vm239_vm14, %v2672_v13  ;;  %v2481_v45 = vsub.f32 %v1578_v52, %v2211_v41 }
 0x36e   : > { %v2545_v21 = vsel %vm2417_vm5, %v2481_v45, 0.0  ;;  %v2217_v4 = vpop.xlane.xlu1 %2216 }
 0x36f   : > { %v2673_v14 = vadd.f32 %v2609_v31, %v2545_v21  ;;  %v2483_v37 = vsub.f32 %v1580_v0, %v2217_v4 }
 0x371   : > { %2738 = vst.msk [vmem:[%s5205_s22 + $0x1d0] sm:$0xff] %vm239_vm14, %v2673_v14  ;;  %v2547_v24 = vsel %vm2419_vm6, %v2483_v37, 0.0 }
 0x372   : > { %v2675_v11 = vadd.f32 %v2611_v1, %v2547_v24 }
 0x373   : > { %v2220_v17 = vpop.xlane.xlu2 %2219 }
 0x374   : > { %2740 = vst.msk [vmem:[%s5205_s22 + $0x1e0] sm:$0xff] %vm239_vm14, %v2675_v11  ;;  %v2484_v30 = vsub.f32 %v1581_v48, %v2220_v17 }
 0x376   : > { %v2548_v12 = vsel %vm2420_vm7, %v2484_v30, 0.0  ;;  %v2226_v47 = vpop.xlane.xlu1 %2225 }
 0x377   : > { %v2676_v22 = vadd.f32 %v2612_v56, %v2548_v12  ;;  %v2486_v34 = vsub.f32 %v1583_v59, %v2226_v47 }
 0x379   : > { %2741 = vst.msk [vmem:[%s5205_s22 + $0x1e8] sm:$0xff] %vm239_vm14, %v2676_v22  ;;  %v2550_v51 = vsel %vm2422_vm8, %v2486_v34, 0.0 }
 0x37a   : > { %v2678_v38 = vadd.f32 %v2614_v18, %v2550_v51 }
 0x37c   : > { %2743 = vst.msk [vmem:[%s5205_s22 + $0x1f8] sm:$0xff] %vm239_vm14, %v2678_v38 }
 0x37d PF: > { %s15_s13 = sadd.s32 1, %s3873_s13   ;;  %s6802_s9 = smov %s3861_s10 }
 0x37e   : > { %p12_p7 = scmp.ge.s32.totalorder %s15_s13, 4   ;;  %s6382_s10 = smov 0  }
 0x37f   : > { %s6803_s11 = smov %s3869_s12  ;;  %s6804_s12 = smov %s6806_s15 }
 0x380   :  { %14 = sbr.rel (!%p12_p7) target bundleno = 4 (0x4), region = 75 }
 0x385   :  { %2765 = vsyncpa [#allocation3], 1 }
 0x386   :  { %2767 = vsyncpa [#allocation3 + $0x1], 1 }

</bundles_post_ra>
